<compile_context>
chip_gen: v6e
topology: v6e:2x2x1
jax: 0.10.0
libtpu: 0.0.40
codegen_flags: <defaults>
</compile_context>

<pallas_src>
import functools

import jax
import jax.numpy as jnp
from jax.experimental import pallas as pl
from jax.experimental.pallas import tpu as pltpu

_CompilerParams = getattr(pltpu, "CompilerParams", None)
if _CompilerParams is None:  # fallback for older jax releases
    _CompilerParams = getattr(pltpu, "TPUCompilerParams")

_LANE = 128
_VMEM_CACHE = [None]


def _round_up(n, m):
    return ((n + m - 1) // m) * m


def _pad_axis(a, axis, new_size):
    if a.shape[axis] == new_size:
        return a
    pads = [(0, 0)] * a.ndim
    pads[axis] = (0, new_size - a.shape[axis])
    return jnp.pad(a, pads)


def _vmem_limit():
    # ~half of physical VMEM, capped at 64 MiB (v5e/v6e: 64 MiB, v7x: 32 MiB).
    if _VMEM_CACHE[0] is None:
        try:
            cap = pltpu.get_tpu_info().vmem_capacity_bytes
        except Exception:
            cap = 128 * 1024 * 1024
        _VMEM_CACHE[0] = int(min(64 * 1024 * 1024, cap // 2))
    return _VMEM_CACHE[0]


def _params(dims):
    return _CompilerParams(dimension_semantics=dims,
                           vmem_limit_bytes=_vmem_limit())


# ----------------------------------------------------------------------------
# Single fused stride-1 conv (tap-folded single matmul, bias/ReLU epilogue)
# ----------------------------------------------------------------------------
def _conv_kernel(x_ref, w_ref, b_ref, o_ref, *, k, relu_in, relu_out):
    tl = o_ref.shape[0]
    start = pl.multiple_of(pl.program_id(2) * tl, tl)
    xw = x_ref[pl.ds(start, tl + k - 1), :]          # one load per grid step
    if relu_in:
        xw = jnp.maximum(xw, 0)
    xw = xw.astype(jnp.bfloat16)
    if k == 1:
        xin = xw
    else:
        xin = jnp.concatenate([xw[j:j + tl, :] for j in range(k)], axis=1)
    y = jnp.dot(xin, w_ref[...], preferred_element_type=jnp.float32) + b_ref[...]
    if relu_out:
        y = jnp.maximum(y, 0.0)
    o_ref[...] = y.astype(o_ref.dtype)


def conv1d_s1(x, w_folded, bias, k, pad_l, pad_r, relu_in=False, relu_out=False,
              out_dtype=jnp.bfloat16):
    """out[t] = concat_j(xpad[t+j]) @ W_folded + bias ; xpad zero-padded."""
    B, L, C = x.shape
    KC, Np = w_folded.shape
    assert KC == k * C and Np % _LANE == 0
    Lout = L + pad_l + pad_r - (k - 1)
    TL = min(128, _round_up(Lout, 8))
    TN = _LANE
    Lpad = _round_up(Lout, TL)
    slab = Lpad + k - 1
    xb = jnp.pad(x, ((0, 0), (pad_l, slab - L - pad_l), (0, 0)))
    out = pl.pallas_call(
        functools.partial(_conv_kernel, k=k, relu_in=relu_in, relu_out=relu_out),
        grid=(B, Np // TN, Lpad // TL),
        in_specs=[
            pl.BlockSpec((None, slab, C), lambda b, n, l: (b, 0, 0)),
            pl.BlockSpec((KC, TN), lambda b, n, l: (0, n)),
            pl.BlockSpec((1, TN), lambda b, n, l: (0, n)),
        ],
        out_specs=pl.BlockSpec((None, TL, TN), lambda b, n, l: (b, l, n)),
        out_shape=jax.ShapeDtypeStruct((B, Lpad, Np), out_dtype),
        compiler_params=_params(("parallel", "parallel", "parallel")),
    )(xb, w_folded, bias)
    return out[:, :Lout, :]


def conv1d_s2(x, w_folded, bias, relu_out=False):
    """k=4, stride=2, pad=1 conv via phase split (stride-1 k=2 over 2C chans)."""
    B, L, C = x.shape
    Lout = (L + 2 - 4) // 2 + 1
    Lp2 = _round_up(L + 2, 2)
    xp = jnp.pad(x, ((0, 0), (1, Lp2 - L - 1), (0, 0)))
    xd = xp.reshape(B, Lp2 // 2, 2 * C)               # free contiguous reshape
    return conv1d_s2_inner(xd, w_folded, bias, relu_out)[:, :Lout]


def conv1d_s2_inner(xd, w_folded, bias, relu_out):
    return conv1d_s1(xd, w_folded, bias, 2, 0, 0, relu_out=relu_out)


# ----------------------------------------------------------------------------
# Fused polyphase stride-2 ConvTranspose1d (k=4, pad=1): both phases, one call
# ----------------------------------------------------------------------------
def _upsample_kernel(x_ref, we_ref, wo_ref, b_ref, o_ref, *, relu_in, relu_out):
    tl = o_ref.shape[0]
    start = pl.multiple_of(pl.program_id(1) * tl, tl)
    xw = x_ref[pl.ds(start, tl + 2), :]
    if relu_in:
        xw = jnp.maximum(xw, 0)
    xw = xw.astype(jnp.bfloat16)
    # even out[m] = x[m-1]@W3 + x[m]@W1 ; odd out[m] = x[m]@W2 + x[m+1]@W0
    xe = jnp.concatenate([xw[0:tl, :], xw[1:tl + 1, :]], axis=1)
    xo = jnp.concatenate([xw[1:tl + 1, :], xw[2:tl + 2, :]], axis=1)
    b = b_ref[...]
    ye = jnp.dot(xe, we_ref[...], preferred_element_type=jnp.float32) + b
    yo = jnp.dot(xo, wo_ref[...], preferred_element_type=jnp.float32) + b
    if relu_out:
        ye = jnp.maximum(ye, 0.0)
        yo = jnp.maximum(yo, 0.0)
    # Lane-concatenated (even|odd): the row interleave becomes a free reshape.
    o_ref[...] = jnp.concatenate([ye, yo], axis=1).astype(o_ref.dtype)


def conv_transpose1d_s2(x, w_even, w_odd, bias, relu_in=False, relu_out=False):
    B, L, C = x.shape
    Np = w_even.shape[1]
    assert w_even.shape[0] == 2 * C and Np % _LANE == 0
    TL = min(128, _round_up(L, 8))
    Lpad = _round_up(L, TL)
    slab = Lpad + 2
    xb = jnp.pad(x, ((0, 0), (1, slab - L - 1), (0, 0)))
    out = pl.pallas_call(
        functools.partial(_upsample_kernel, relu_in=relu_in, relu_out=relu_out),
        grid=(B, Lpad // TL),
        in_specs=[
            pl.BlockSpec((None, slab, C), lambda b, l: (b, 0, 0)),
            pl.BlockSpec((2 * C, Np), lambda b, l: (0, 0)),
            pl.BlockSpec((2 * C, Np), lambda b, l: (0, 0)),
            pl.BlockSpec((1, Np), lambda b, l: (0, 0)),
        ],
        out_specs=pl.BlockSpec((None, TL, 2 * Np), lambda b, l: (b, l, 0)),
        out_shape=jax.ShapeDtypeStruct((B, Lpad, 2 * Np), jnp.bfloat16),
        compiler_params=_params(("parallel", "parallel")),
    )(xb, w_even, w_odd, bias)
    # (B, Lpad, 2*Np) -> (B, 2*Lpad, Np) is a contiguous (free) reshape.
    return out.reshape(B, 2 * Lpad, Np)[:, :2 * L, :]


# ----------------------------------------------------------------------------
# Fused chain: [head k3 conv] -> n_res residual layers -> [optional k3 tail]
# ----------------------------------------------------------------------------
def _chain_kernel(x_ref, *refs, n_res, has_tail, halo, l_true):
    o_ref = refs[-1]
    w = refs[:-1]
    tl = o_ref.shape[0]
    start = pl.multiple_of(pl.program_id(1) * tl, tl)   # slab idx == true tile start
    win = tl + 2 * halo
    a = x_ref[pl.ds(start, win), :]

    def conv(v, w_ref, k):
        rows = v.shape[0] - (k - 1)
        if k == 1:
            xin = v
        else:
            xin = jnp.concatenate([v[j:j + rows, :] for j in range(k)], axis=1)
        return jnp.dot(xin.astype(jnp.bfloat16), w_ref[...],
                       preferred_element_type=jnp.float32)

    def mask(v, rem):
        # Zero rows whose true position is outside [0, l_true): emulates the
        # per-layer zero padding for halo rows near sequence boundaries.
        pos = jax.lax.broadcasted_iota(jnp.int32, (v.shape[0], 1), 0) + (start - rem)
        ok = jnp.logical_and(pos >= 0, pos < l_true)
        return jnp.where(ok, v, 0.0)

    ri = 0
    rem = halo
    # head conv (k=3) + bias
    h = conv(a, w[ri], 3) + w[ri + 1][...]
    ri += 2
    rem -= 1
    if rem > 0:
        h = mask(h, rem)
    # residual layers: h = h + Conv1(ReLU(Conv3(ReLU(h))))   (no biases)
    for _ in range(n_res):
        r = conv(jnp.maximum(h, 0.0), w[ri], 3); ri += 1
        r = conv(jnp.maximum(r, 0.0), w[ri], 1); ri += 1
        h = h[1:-1, :] + r
        rem -= 1
        if rem > 0:
            h = mask(h, rem)
    # optional tail conv (k=3) with the stack's final ReLU folded into relu_in
    if has_tail:
        h = conv(jnp.maximum(h, 0.0), w[ri], 3) + w[ri + 1][...]
        ri += 2
        rem -= 1
    o_ref[...] = h.astype(o_ref.dtype)


def chain(x, weights, *, n_res, has_tail, out_channels, out_dtype=jnp.bfloat16):
    B, L, C = x.shape
    halo = 1 + n_res + (1 if has_tail else 0)
    TL = min(128, _round_up(L, 8))
    Lpad = _round_up(L, TL)
    slab = Lpad + 2 * halo
    xb = jnp.pad(x, ((0, 0), (halo, slab - L - halo), (0, 0)))

    in_specs = [pl.BlockSpec((None, slab, C), lambda b, l: (b, 0, 0))]
    for wgt in weights:
        in_specs.append(pl.BlockSpec(wgt.shape, lambda b, l: (0, 0)))

    out = pl.pallas_call(
        functools.partial(_chain_kernel, n_res=n_res, has_tail=has_tail,
                          halo=halo, l_true=L),
        grid=(B, Lpad // TL),
        in_specs=in_specs,
        out_specs=pl.BlockSpec((None, TL, out_channels), lambda b, l: (b, l, 0)),
        out_shape=jax.ShapeDtypeStruct((B, Lpad, out_channels), out_dtype),
        compiler_params=_params(("parallel", "parallel")),
    )(xb, *weights)
    return out[:, :L, :]


# ----------------------------------------------------------------------------
# Vector quantization (parallel grid, hoisted e_sq, bf16 cross, lean stores)
# ----------------------------------------------------------------------------
def _vq_kernel(z_ref, eb_ref, ef_ref, esq_ref, zq_ref, idx_ref, *, k_true):
    z = z_ref[...]                                     # (TM, Dp) f32
    tm = z.shape[0]
    kp = eb_ref.shape[0]

    cross = jax.lax.dot_general(z.astype(jnp.bfloat16), eb_ref[...],
                                (((1,), (1,)), ((), ())),
                                preferred_element_type=jnp.float32)   # (TM, Kp)
    z_sq = jnp.sum(z * z, axis=1, keepdims=True)
    d = z_sq + esq_ref[...] - 2.0 * cross

    col = jax.lax.broadcasted_iota(jnp.int32, (tm, kp), 1)
    d = jnp.where(col < k_true, d, 1e30)               # never pick padded codes
    dmin = jnp.min(d, axis=1, keepdims=True)
    idx = jnp.min(jnp.where(d == dmin, col, kp), axis=1, keepdims=True)
    onehot = (col == idx).astype(jnp.float32)

    zq = jax.lax.dot_general(onehot, ef_ref[...], (((1,), (0,)), ((), ())),
                             preferred_element_type=jnp.float32)      # exact f32

    zq_ref[...] = zq
    idx_ref[...] = idx


def vector_quantize(z_flat, e_bf, e_f32, e_sq, beta, d_true, k_true):
    M, Dp = z_flat.shape
    Kp = e_bf.shape[0]
    TM = min(256, _round_up(M, 8))
    M_pad = _round_up(M, TM)
    z_p = jnp.pad(z_flat, ((0, M_pad - M), (0, 0)))

    zq_all, idx_all = pl.pallas_call(
        functools.partial(_vq_kernel, k_true=k_true),
        grid=(M_pad // TM,),
        in_specs=[pl.BlockSpec((TM, Dp), lambda i: (i, 0)),
                  pl.BlockSpec((Kp, Dp), lambda i: (0, 0)),
                  pl.BlockSpec((Kp, Dp), lambda i: (0, 0)),
                  pl.BlockSpec((1, Kp), lambda i: (0, 0))],
        out_specs=(pl.BlockSpec((TM, Dp), lambda i: (i, 0)),
                   pl.BlockSpec((TM, 1), lambda i: (i, 0))),
        out_shape=(jax.ShapeDtypeStruct((M_pad, Dp), jnp.float32),
                   jax.ShapeDtypeStruct((M_pad, 1), jnp.int32)),
        compiler_params=_params(("parallel",)),
    )(z_p, e_bf, e_f32, e_sq)

    zq = zq_all[:M]
    idx = idx_all[:M]
    diff = zq - z_flat                                 # padded D cols are zero
    loss = (1.0 + beta) * jnp.sum(diff * diff) / (M * d_true)
    counts = jnp.zeros((k_true,), jnp.float32).at[idx[:, 0]].add(1.0)
    e_mean = counts / M
    perplexity = jnp.exp(-jnp.sum(e_mean * jnp.log(e_mean + 1e-10)))
    return zq, idx, loss, perplexity


# ----------------------------------------------------------------------------
# Weight preparation: pad channels, fold taps into the contraction dim
# ----------------------------------------------------------------------------
def _conv_folded(w, cin_pad, cout_pad):
    """PyTorch Conv1d weight (Cout, Cin, k) -> bf16 folded (k*cin_pad, cout_pad)."""
    k = w.shape[2]
    t = jnp.transpose(w, (2, 1, 0))                    # (k, Cin, Cout)
    t = _pad_axis(_pad_axis(t, 1, cin_pad), 2, cout_pad)
    return t.reshape(k * cin_pad, cout_pad).astype(jnp.bfloat16)


def _convT_taps(w, cin_pad, cout_pad):
    """PyTorch ConvTranspose1d weight (Cin, Cout, k) -> (k, cin_pad, cout_pad) f32."""
    t = jnp.transpose(w, (2, 0, 1))
    return _pad_axis(_pad_axis(t, 1, cin_pad), 2, cout_pad)


def _convT_k3_folded(w, cin_pad, cout_pad):
    """ConvTranspose1d k=3,s=1,p=1 == conv with flipped taps, p=1 (folded)."""
    t = _convT_taps(w, cin_pad, cout_pad)[::-1]
    return t.reshape(3 * cin_pad, cout_pad).astype(jnp.bfloat16)


def _convT_s2_polyphase(w, cin_pad, cout_pad):
    """ConvTranspose1d k=4,s=2,p=1 -> (even, odd) folded stride-1 k=2 taps."""
    t = _convT_taps(w, cin_pad, cout_pad)              # (4, Cin, Cout)
    even = jnp.concatenate([t[3], t[1]], axis=0).astype(jnp.bfloat16)
    odd = jnp.concatenate([t[2], t[0]], axis=0).astype(jnp.bfloat16)
    return even, odd


def _bias_pad(b, cout_pad):
    return _pad_axis(b.reshape(1, -1).astype(jnp.float32), 1, cout_pad)


def prepare_params(p):
    in_dim = p["enc_w1"].shape[1]
    h_half = p["enc_w1"].shape[0]
    h_dim = p["enc_w2"].shape[0]
    res_h = p["enc_res"][0][0].shape[0]
    K, D = p["embedding"].shape

    rp = lambda c: _round_up(c, _LANE)
    inp, h2p, hp, rhp, dp = rp(in_dim), rp(h_half), rp(h_dim), rp(res_h), rp(D)
    kp = rp(K)

    e_pad = _pad_axis(_pad_axis(p["embedding"].astype(jnp.float32), 0, kp), 1, dp)

    q = {
        # stride-2 encoder convs (phase-split): folded k=4 taps over 2*Cin chans
        "enc_w1": _conv_folded(p["enc_w1"], inp, h2p),
        "enc_b1": _bias_pad(p["enc_b1"], h2p),
        "enc_w2": _conv_folded(p["enc_w2"], h2p, hp),
        "enc_b2": _bias_pad(p["enc_b2"], hp),
        # fused encoder chain: conv3 -> res stack -> pre-quant conv
        "enc_chain": ([_conv_folded(p["enc_w3"], hp, hp), _bias_pad(p["enc_b3"], hp)]
                      + sum([[_conv_folded(wa, hp, rhp), _conv_folded(wb, rhp, hp)]
                             for wa, wb in p["enc_res"]], [])
                      + [_conv_folded(p["pre_w"], hp, dp), _bias_pad(p["pre_b"], dp)]),
        # codebook (f32 exact, bf16 for the distance matmul, hoisted norms)
        "e_pad": e_pad,
        "e_bf": e_pad.astype(jnp.bfloat16),
        "e_sq": jnp.sum(e_pad * e_pad, axis=1)[None, :],
        # fused decoder chain: convT1 (k3) -> res stack
        "dec_chain": ([_convT_k3_folded(p["dec_wt1"], dp, hp),
                       _bias_pad(p["dec_bt1"], hp)]
                      + sum([[_conv_folded(wa, hp, rhp), _conv_folded(wb, rhp, hp)]
                             for wa, wb in p["dec_res"]], [])),
        "dec_b2": _bias_pad(p["dec_bt2"], h2p),
        "dec_b3": _bias_pad(p["dec_bt3"], inp),
    }
    q["dec_t2e"], q["dec_t2o"] = _convT_s2_polyphase(p["dec_wt2"], hp, h2p)
    q["dec_t3e"], q["dec_t3o"] = _convT_s2_polyphase(p["dec_wt3"], h2p, inp)
    meta = dict(D=D, K=K, in_dim=in_dim, in_pad=inp, n_res=len(p["enc_res"]))
    return q, meta


# ----------------------------------------------------------------------------
# VQVAE forward
# ----------------------------------------------------------------------------
def vqvae_forward(x_ncl, q, *, meta, beta):
    D, K, in_dim = meta["D"], meta["K"], meta["in_dim"]
    n_res = meta["n_res"]
    B = x_ncl.shape[0]

    x = jnp.transpose(x_ncl, (0, 2, 1)).astype(jnp.bfloat16)   # NCL -> (B, L, C)
    x = _pad_axis(x, 2, meta["in_pad"])

    # --- encoder ---
    h = conv1d_s2(x, q["enc_w1"], q["enc_b1"], relu_out=True)
    h = conv1d_s2(h, q["enc_w2"], q["enc_b2"], relu_out=True)
    z_e = chain(h, q["enc_chain"], n_res=n_res, has_tail=True,
                out_channels=q["enc_chain"][-2].shape[1], out_dtype=jnp.float32)

    # --- vector quantization ---
    _, Lq, Dp = z_e.shape
    zq_flat, e_indices, embedding_loss, perplexity = vector_quantize(
        z_e.reshape(B * Lq, Dp), q["e_bf"], q["e_pad"], q["e_sq"], beta,
        d_true=D, k_true=K)
    z_q = zq_flat.reshape(B, Lq, Dp)

    # --- decoder ---
    h = chain(z_q, q["dec_chain"], n_res=n_res, has_tail=False,
              out_channels=q["dec_chain"][0].shape[1])
    h = conv_transpose1d_s2(h, q["dec_t2e"], q["dec_t2o"], q["dec_b2"],
                            relu_in=True, relu_out=True)
    x_hat = conv_transpose1d_s2(h, q["dec_t3e"], q["dec_t3o"], q["dec_b3"])

    x_hat_ncl = jnp.transpose(x_hat[:, :, :in_dim].astype(jnp.float32), (0, 2, 1))
    z_q_ncl = jnp.transpose(z_q[:, :, :D], (0, 2, 1))
    return embedding_loss, x_hat_ncl, perplexity, z_q_ncl, e_indices


# ----------------------------------------------------------------------------
# Deterministic parameter init (PyTorch-layout weights)
# ----------------------------------------------------------------------------
def init_params(key, h_dim, res_h_dim, n_res_layers, n_embeddings,
                embedding_dim, in_dim=256):
    keys = iter(jax.random.split(key, 64))

    def nk():
        return next(keys)

    def cw(cout, cin, k):        # Conv1d weight (Cout, Cin, k)
        s = 1.0 / jnp.sqrt(jnp.float32(cin * k))
        return s * jax.random.normal(nk(), (cout, cin, k), jnp.float32)

    def ctw(cin, cout, k):       # ConvTranspose1d weight (Cin, Cout, k)
        s = 1.0 / jnp.sqrt(jnp.float32(cin * k))
        return s * jax.random.normal(nk(), (cin, cout, k), jnp.float32)

    def bias(n):
        return 0.01 * jax.random.normal(nk(), (n,), jnp.float32)

    p = {}
    p["enc_w1"], p["enc_b1"] = cw(h_dim // 2, in_dim, 4), bias(h_dim // 2)
    p["enc_w2"], p["enc_b2"] = cw(h_dim, h_dim // 2, 4), bias(h_dim)
    p["enc_w3"], p["enc_b3"] = cw(h_dim, h_dim, 3), bias(h_dim)
    p["enc_res"] = [(cw(res_h_dim, h_dim, 3), cw(h_dim, res_h_dim, 1))
                    for _ in range(n_res_layers)]

    p["pre_w"], p["pre_b"] = cw(embedding_dim, h_dim, 3), bias(embedding_dim)

    p["embedding"] = jax.random.uniform(
        nk(), (n_embeddings, embedding_dim), jnp.float32,
        -1.0 / n_embeddings, 1.0 / n_embeddings)

    p["dec_wt1"], p["dec_bt1"] = ctw(embedding_dim, h_dim, 3), bias(h_dim)
    p["dec_res"] = [(cw(res_h_dim, h_dim, 3), cw(h_dim, res_h_dim, 1))
                    for _ in range(n_res_layers)]
    p["dec_wt2"], p["dec_bt2"] = ctw(h_dim, h_dim // 2, 4), bias(h_dim // 2)
    p["dec_wt3"], p["dec_bt3"] = ctw(h_dim // 2, in_dim, 4), bias(in_dim)
    return p


# ----------------------------------------------------------------------------
if __name__ == "__main__":
    h_dim, res_h_dim, n_res_layers = 32, 16, 2
    n_embeddings, embedding_dim, beta = 64, 8, 0.25
    B, C_in, L = 2, 256, 16                 # input x: (B, 256, L) NCL like PyTorch

    key = jax.random.PRNGKey(0)
    k_params, k_x = jax.random.split(key)
    params = init_params(k_params, h_dim, res_h_dim, n_res_layers,
                         n_embeddings, embedding_dim, in_dim=C_in)
    q, meta = prepare_params(params)
    x = jax.random.normal(k_x, (B, C_in, L), jnp.float32)

    fwd = jax.jit(functools.partial(vqvae_forward, meta=meta, beta=beta))
    outs = fwd(x, q)
    embedding_loss, x_hat, perplexity, z_q, e_indices = jax.block_until_ready(outs)

    assert x_hat.shape == x.shape, (x_hat.shape, x.shape)
    assert z_q.shape == (B, embedding_dim, L // 4), z_q.shape
    assert e_indices.shape == (B * (L // 4), 1), e_indices.shape
    assert embedding_loss.shape == () and perplexity.shape == ()
    assert bool(jnp.isfinite(x_hat).all())
    assert bool(jnp.isfinite(embedding_loss)) and bool(jnp.isfinite(perplexity))
    print("KERNEL_OK")
</pallas_src>

<mosaic_0001>
module attributes {stable_mosaic.version = 11 : i64} {
  func.func private @main(%arg0: i32) attributes {dimension_semantics = [#tpu.dimension_semantics<core_parallel>], iteration_bounds = array<i64: 2>, tpu.core_type = #tpu.core_type<sc_scalar_subcore>, window_params = []} {
    return
  }
}

module attributes {stable_mosaic.version = 11 : i64} {
  func.func private @main(%arg0: i32) attributes {dimension_semantics = [#tpu.dimension_semantics<core_parallel>], iteration_bounds = array<i64: 2>, tpu.core_type = #tpu.core_type<sc_scalar_subcore>, window_params = []} {
    return
  }
}

module attributes {stable_mosaic.version = 11 : i64} {
  func.func @_conv_kernel(%arg0: i32, %arg1: i32, %arg2: i32, %arg3: memref<1x9x512xbf16, #tpu.memory_space<vmem>>, %arg4: memref<1024x128xbf16, #tpu.memory_space<vmem>>, %arg5: memref<1x128xf32, #tpu.memory_space<vmem>>, %arg6: memref<1x8x128xbf16, #tpu.memory_space<vmem>>) attributes {dimension_semantics = [#tpu.dimension_semantics<parallel>, #tpu.dimension_semantics<parallel>, #tpu.dimension_semantics<parallel>], iteration_bounds = array<i64: 2, 1, 1>, scalar_prefetch = 0 : i64, scratch_operands = 0 : i64, tpu.core_type = #tpu.core_type<tc>, window_params = [{transform_indices = @transform_0, window_bounds = array<i64: 1, 9, 512>}, {transform_indices = @transform_1, window_bounds = array<i64: 1024, 128>}, {transform_indices = @transform_2, window_bounds = array<i64: 1, 128>}, {transform_indices = @transform_3, window_bounds = array<i64: 1, 8, 128>}]} {
    %c8_i32 = arith.constant 8 : i32
    %0 = arith.muli %arg2, %c8_i32 : i32
    %1 = tpu.assume_multiple %0, 8 : i32
    %c0 = arith.constant 0 : index
    %2 = arith.index_cast %1 : i32 to index
    %c0_0 = arith.constant 0 : index
    %3 = vector.load %arg3[%c0, %2, %c0_0] : memref<1x9x512xbf16, #tpu.memory_space<vmem>>, vector<1x9x512xbf16>
    %4 = vector.shape_cast %3 : vector<1x9x512xbf16> to vector<9x512xbf16>
    %5 = vector.extract_strided_slice %4 {offsets = [0, 0], sizes = [8, 512], strides = [1, 1]} : vector<9x512xbf16> to vector<8x512xbf16>
    %6 = vector.extract_strided_slice %4 {offsets = [1, 0], sizes = [8, 512], strides = [1, 1]} : vector<9x512xbf16> to vector<8x512xbf16>
    %7 = tpu.concatenate %5, %6 in 1 : vector<8x512xbf16>, vector<8x512xbf16> -> vector<8x1024xbf16>
    %c0_1 = arith.constant 0 : index
    %c0_2 = arith.constant 0 : index
    %8 = vector.load %arg4[%c0_1, %c0_2] : memref<1024x128xbf16, #tpu.memory_space<vmem>>, vector<1024x128xbf16>
    %cst = arith.constant dense<0.000000e+00> : vector<8x128xf32>
    %9 = tpu.matmul %7, %8, %cst {dimension_numbers = #tpu.dot_dimension_numbers<[1], [0], [0], [1], [0, 0, 1, 1], [], []>} : vector<8x1024xbf16>, vector<1024x128xbf16>, vector<8x128xf32> -> vector<8x128xf32>
    %c0_3 = arith.constant 0 : index
    %c0_4 = arith.constant 0 : index
    %10 = vector.load %arg5[%c0_3, %c0_4] : memref<1x128xf32, #tpu.memory_space<vmem>>, vector<1x128xf32>
    %11 = vector.broadcast %10 : vector<1x128xf32> to vector<8x128xf32>
    %12 = arith.addf %9, %11 : vector<8x128xf32>
    %cst_5 = arith.constant 0.000000e+00 : f32
    %13 = vector.broadcast %cst_5 : f32 to vector<8x128xf32>
    %14 = arith.maximumf %12, %13 : vector<8x128xf32>
    %15 = arith.truncf %14 : vector<8x128xf32> to vector<8x128xbf16>
    %c0_6 = arith.constant 0 : index
    %c0_7 = arith.constant 0 : index
    %c0_8 = arith.constant 0 : index
    %16 = vector.load %arg6[%c0_6, %c0_7, %c0_8] : memref<1x8x128xbf16, #tpu.memory_space<vmem>>, vector<1x8x128xbf16>
    %17 = vector.shape_cast %16 : vector<1x8x128xbf16> to vector<8x128xbf16>
    %18 = vector.shape_cast %15 : vector<8x128xbf16> to vector<1x8x128xbf16>
    tpu.vector_store %arg6[%c0_6, %c0_7, %c0_8], %18 {strides = array<i32>} : memref<1x8x128xbf16, #tpu.memory_space<vmem>>, vector<1x8x128xbf16>,
    return
  }
  func.func @transform_0(%arg0: i32, %arg1: i32, %arg2: i32) -> (i32, i32, i32) {
    %c0_i32 = arith.constant 0 : i32
    %c0_i32_0 = arith.constant 0 : i32
    %c0_i32_1 = arith.constant 0 : i32
    return %arg0, %c0_i32, %c0_i32_0 : i32, i32, i32
  }
  func.func @transform_1(%arg0: i32, %arg1: i32, %arg2: i32) -> (i32, i32) {
    %c0_i32 = arith.constant 0 : i32
    %c0_i32_0 = arith.constant 0 : i32
    return %c0_i32, %arg1 : i32, i32
  }
  func.func @transform_2(%arg0: i32, %arg1: i32, %arg2: i32) -> (i32, i32) {
    %c0_i32 = arith.constant 0 : i32
    %c0_i32_0 = arith.constant 0 : i32
    return %c0_i32, %arg1 : i32, i32
  }
  func.func @transform_3(%arg0: i32, %arg1: i32, %arg2: i32) -> (i32, i32, i32) {
    %c0_i32 = arith.constant 0 : i32
    return %arg0, %arg2, %arg1 : i32, i32, i32
  }
}

module attributes {stable_mosaic.version = 11 : i64} {
  func.func @_conv_kernel(%arg0: i32, %arg1: i32, %arg2: i32, %arg3: memref<1x9x256xbf16, #tpu.memory_space<vmem>>, %arg4: memref<512x128xbf16, #tpu.memory_space<vmem>>, %arg5: memref<1x128xf32, #tpu.memory_space<vmem>>, %arg6: memref<1x8x128xbf16, #tpu.memory_space<vmem>>) attributes {dimension_semantics = [#tpu.dimension_semantics<parallel>, #tpu.dimension_semantics<parallel>, #tpu.dimension_semantics<parallel>], iteration_bounds = array<i64: 2, 1, 1>, scalar_prefetch = 0 : i64, scratch_operands = 0 : i64, tpu.core_type = #tpu.core_type<tc>, window_params = [{transform_indices = @transform_0, window_bounds = array<i64: 1, 9, 256>}, {transform_indices = @transform_1, window_bounds = array<i64: 512, 128>}, {transform_indices = @transform_2, window_bounds = array<i64: 1, 128>}, {transform_indices = @transform_3, window_bounds = array<i64: 1, 8, 128>}]} {
    %c8_i32 = arith.constant 8 : i32
    %0 = arith.muli %arg2, %c8_i32 : i32
    %1 = tpu.assume_multiple %0, 8 : i32
    %c0 = arith.constant 0 : index
    %2 = arith.index_cast %1 : i32 to index
    %c0_0 = arith.constant 0 : index
    %3 = vector.load %arg3[%c0, %2, %c0_0] : memref<1x9x256xbf16, #tpu.memory_space<vmem>>, vector<1x9x256xbf16>
    %4 = vector.shape_cast %3 : vector<1x9x256xbf16> to vector<9x256xbf16>
    %5 = vector.extract_strided_slice %4 {offsets = [0, 0], sizes = [8, 256], strides = [1, 1]} : vector<9x256xbf16> to vector<8x256xbf16>
    %6 = vector.extract_strided_slice %4 {offsets = [1, 0], sizes = [8, 256], strides = [1, 1]} : vector<9x256xbf16> to vector<8x256xbf16>
    %7 = tpu.concatenate %5, %6 in 1 : vector<8x256xbf16>, vector<8x256xbf16> -> vector<8x512xbf16>
    %c0_1 = arith.constant 0 : index
    %c0_2 = arith.constant 0 : index
    %8 = vector.load %arg4[%c0_1, %c0_2] : memref<512x128xbf16, #tpu.memory_space<vmem>>, vector<512x128xbf16>
    %cst = arith.constant dense<0.000000e+00> : vector<8x128xf32>
    %9 = tpu.matmul %7, %8, %cst {dimension_numbers = #tpu.dot_dimension_numbers<[1], [0], [0], [1], [0, 0, 1, 1], [], []>} : vector<8x512xbf16>, vector<512x128xbf16>, vector<8x128xf32> -> vector<8x128xf32>
    %c0_3 = arith.constant 0 : index
    %c0_4 = arith.constant 0 : index
    %10 = vector.load %arg5[%c0_3, %c0_4] : memref<1x128xf32, #tpu.memory_space<vmem>>, vector<1x128xf32>
    %11 = vector.broadcast %10 : vector<1x128xf32> to vector<8x128xf32>
    %12 = arith.addf %9, %11 : vector<8x128xf32>
    %cst_5 = arith.constant 0.000000e+00 : f32
    %13 = vector.broadcast %cst_5 : f32 to vector<8x128xf32>
    %14 = arith.maximumf %12, %13 : vector<8x128xf32>
    %15 = arith.truncf %14 : vector<8x128xf32> to vector<8x128xbf16>
    %c0_6 = arith.constant 0 : index
    %c0_7 = arith.constant 0 : index
    %c0_8 = arith.constant 0 : index
    %16 = vector.load %arg6[%c0_6, %c0_7, %c0_8] : memref<1x8x128xbf16, #tpu.memory_space<vmem>>, vector<1x8x128xbf16>
    %17 = vector.shape_cast %16 : vector<1x8x128xbf16> to vector<8x128xbf16>
    %18 = vector.shape_cast %15 : vector<8x128xbf16> to vector<1x8x128xbf16>
    tpu.vector_store %arg6[%c0_6, %c0_7, %c0_8], %18 {strides = array<i32>} : memref<1x8x128xbf16, #tpu.memory_space<vmem>>, vector<1x8x128xbf16>,
    return
  }
  func.func @transform_0(%arg0: i32, %arg1: i32, %arg2: i32) -> (i32, i32, i32) {
    %c0_i32 = arith.constant 0 : i32
    %c0_i32_0 = arith.constant 0 : i32
    %c0_i32_1 = arith.constant 0 : i32
    return %arg0, %c0_i32, %c0_i32_0 : i32, i32, i32
  }
  func.func @transform_1(%arg0: i32, %arg1: i32, %arg2: i32) -> (i32, i32) {
    %c0_i32 = arith.constant 0 : i32
    %c0_i32_0 = arith.constant 0 : i32
    return %c0_i32, %arg1 : i32, i32
  }
  func.func @transform_2(%arg0: i32, %arg1: i32, %arg2: i32) -> (i32, i32) {
    %c0_i32 = arith.constant 0 : i32
    %c0_i32_0 = arith.constant 0 : i32
    return %c0_i32, %arg1 : i32, i32
  }
  func.func @transform_3(%arg0: i32, %arg1: i32, %arg2: i32) -> (i32, i32, i32) {
    %c0_i32 = arith.constant 0 : i32
    return %arg0, %arg2, %arg1 : i32, i32, i32
  }
}

module attributes {stable_mosaic.version = 11 : i64} {
  func.func @_chain_kernel(%arg0: i32, %arg1: i32, %arg2: memref<1x16x128xbf16, #tpu.memory_space<vmem>>, %arg3: memref<384x128xbf16, #tpu.memory_space<vmem>>, %arg4: memref<1x128xf32, #tpu.memory_space<vmem>>, %arg5: memref<384x128xbf16, #tpu.memory_space<vmem>>, %arg6: memref<128x128xbf16, #tpu.memory_space<vmem>>, %arg7: memref<384x128xbf16, #tpu.memory_space<vmem>>, %arg8: memref<128x128xbf16, #tpu.memory_space<vmem>>, %arg9: memref<384x128xbf16, #tpu.memory_space<vmem>>, %arg10: memref<1x128xf32, #tpu.memory_space<vmem>>, %arg11: memref<1x8x128xf32, #tpu.memory_space<vmem>>) attributes {dimension_semantics = [#tpu.dimension_semantics<parallel>, #tpu.dimension_semantics<parallel>], iteration_bounds = array<i64: 2, 1>, scalar_prefetch = 0 : i64, scratch_operands = 0 : i64, tpu.core_type = #tpu.core_type<tc>, window_params = [{transform_indices = @transform_0, window_bounds = array<i64: 1, 16, 128>}, {pipeline_mode = #tpu.pipeline_mode<synchronous>, transform_indices = @transform_1, window_bounds = array<i64: 384, 128>}, {pipeline_mode = #tpu.pipeline_mode<synchronous>, transform_indices = @transform_2, window_bounds = array<i64: 1, 128>}, {pipeline_mode = #tpu.pipeline_mode<synchronous>, transform_indices = @transform_3, window_bounds = array<i64: 384, 128>}, {pipeline_mode = #tpu.pipeline_mode<synchronous>, transform_indices = @transform_4, window_bounds = array<i64: 128, 128>}, {pipeline_mode = #tpu.pipeline_mode<synchronous>, transform_indices = @transform_5, window_bounds = array<i64: 384, 128>}, {pipeline_mode = #tpu.pipeline_mode<synchronous>, transform_indices = @transform_6, window_bounds = array<i64: 128, 128>}, {pipeline_mode = #tpu.pipeline_mode<synchronous>, transform_indices = @transform_7, window_bounds = array<i64: 384, 128>}, {pipeline_mode = #tpu.pipeline_mode<synchronous>, transform_indices = @transform_8, window_bounds = array<i64: 1, 128>}, {transform_indices = @transform_9, window_bounds = array<i64: 1, 8, 128>}]} {
    %c8_i32 = arith.constant 8 : i32
    %0 = arith.muli %arg1, %c8_i32 : i32
    %1 = tpu.assume_multiple %0, 8 : i32
    %c0 = arith.constant 0 : index
    %2 = arith.index_cast %1 : i32 to index
    %c0_0 = arith.constant 0 : index
    %3 = vector.load %arg2[%c0, %2, %c0_0] : memref<1x16x128xbf16, #tpu.memory_space<vmem>>, vector<1x16x128xbf16>
    %4 = vector.shape_cast %3 : vector<1x16x128xbf16> to vector<16x128xbf16>
    %5 = vector.extract_strided_slice %4 {offsets = [0, 0], sizes = [14, 128], strides = [1, 1]} : vector<16x128xbf16> to vector<14x128xbf16>
    %6 = vector.extract_strided_slice %4 {offsets = [1, 0], sizes = [14, 128], strides = [1, 1]} : vector<16x128xbf16> to vector<14x128xbf16>
    %7 = vector.extract_strided_slice %4 {offsets = [2, 0], sizes = [14, 128], strides = [1, 1]} : vector<16x128xbf16> to vector<14x128xbf16>
    %8 = tpu.concatenate %5, %6, %7 in 1 : vector<14x128xbf16>, vector<14x128xbf16>, vector<14x128xbf16> -> vector<14x384xbf16>
    %c0_1 = arith.constant 0 : index
    %c0_2 = arith.constant 0 : index
    %9 = vector.load %arg3[%c0_1, %c0_2] : memref<384x128xbf16, #tpu.memory_space<vmem>>, vector<384x128xbf16>
    %cst = arith.constant dense<0.000000e+00> : vector<14x128xf32>
    %10 = tpu.matmul %8, %9, %cst {dimension_numbers = #tpu.dot_dimension_numbers<[1], [0], [0], [1], [0, 0, 1, 1], [], []>} : vector<14x384xbf16>, vector<384x128xbf16>, vector<14x128xf32> -> vector<14x128xf32>
    %c0_3 = arith.constant 0 : index
    %c0_4 = arith.constant 0 : index
    %11 = vector.load %arg4[%c0_3, %c0_4] : memref<1x128xf32, #tpu.memory_space<vmem>>, vector<1x128xf32>
    %12 = vector.broadcast %11 : vector<1x128xf32> to vector<14x128xf32>
    %13 = arith.addf %10, %12 : vector<14x128xf32>
    %14 = tpu.iota {dimensions = array<i32: 0>} : vector<14x1xi32>
    %c3_i32 = arith.constant 3 : i32
    %15 = arith.subi %1, %c3_i32 : i32
    %16 = vector.broadcast %15 : i32 to vector<14x1xi32>
    %17 = arith.addi %14, %16 : vector<14x1xi32>
    %c0_i32 = arith.constant 0 : i32
    %18 = vector.broadcast %c0_i32 : i32 to vector<14x1xi32>
    %19 = arith.cmpi sge, %17, %18 : vector<14x1xi32>
    %c4_i32 = arith.constant 4 : i32
    %20 = vector.broadcast %c4_i32 : i32 to vector<14x1xi32>
    %21 = arith.cmpi slt, %17, %20 : vector<14x1xi32>
    %22 = arith.andi %19, %21 : vector<14x1xi1>
    %cst_5 = arith.constant 0.000000e+00 : f32
    %23 = vector.shape_cast %22 : vector<14x1xi1> to vector<14x1xi1>
    %24 = vector.broadcast %23 : vector<14x1xi1> to vector<14x128xi1>
    %25 = vector.broadcast %cst_5 : f32 to vector<14x128xf32>
    %26 = arith.select %24, %13, %25 : vector<14x128xi1>, vector<14x128xf32>
    %cst_6 = arith.constant 0.000000e+00 : f32
    %27 = vector.broadcast %cst_6 : f32 to vector<14x128xf32>
    %28 = arith.maximumf %26, %27 : vector<14x128xf32>
    %29 = vector.extract_strided_slice %28 {offsets = [0, 0], sizes = [12, 128], strides = [1, 1]} : vector<14x128xf32> to vector<12x128xf32>
    %30 = vector.extract_strided_slice %28 {offsets = [1, 0], sizes = [12, 128], strides = [1, 1]} : vector<14x128xf32> to vector<12x128xf32>
    %31 = vector.extract_strided_slice %28 {offsets = [2, 0], sizes = [12, 128], strides = [1, 1]} : vector<14x128xf32> to vector<12x128xf32>
    %32 = tpu.concatenate %29, %30, %31 in 1 : vector<12x128xf32>, vector<12x128xf32>, vector<12x128xf32> -> vector<12x384xf32>
    %33 = arith.truncf %32 : vector<12x384xf32> to vector<12x384xbf16>
    %c0_7 = arith.constant 0 : index
    %c0_8 = arith.constant 0 : index
    %34 = vector.load %arg5[%c0_7, %c0_8] : memref<384x128xbf16, #tpu.memory_space<vmem>>, vector<384x128xbf16>
    %cst_9 = arith.constant dense<0.000000e+00> : vector<12x128xf32>
    %35 = tpu.matmul %33, %34, %cst_9 {dimension_numbers = #tpu.dot_dimension_numbers<[1], [0], [0], [1], [0, 0, 1, 1], [], []>} : vector<12x384xbf16>, vector<384x128xbf16>, vector<12x128xf32> -> vector<12x128xf32>
    %cst_10 = arith.constant 0.000000e+00 : f32
    %36 = vector.broadcast %cst_10 : f32 to vector<12x128xf32>
    %37 = arith.maximumf %35, %36 : vector<12x128xf32>
    %38 = arith.truncf %37 : vector<12x128xf32> to vector<12x128xbf16>
    %c0_11 = arith.constant 0 : index
    %c0_12 = arith.constant 0 : index
    %39 = vector.load %arg6[%c0_11, %c0_12] : memref<128x128xbf16, #tpu.memory_space<vmem>>, vector<128x128xbf16>
    %cst_13 = arith.constant dense<0.000000e+00> : vector<12x128xf32>
    %40 = tpu.matmul %38, %39, %cst_13 {dimension_numbers = #tpu.dot_dimension_numbers<[1], [0], [0], [1], [0, 0, 1, 1], [], []>} : vector<12x128xbf16>, vector<128x128xbf16>, vector<12x128xf32> -> vector<12x128xf32>
    %41 = vector.extract_strided_slice %26 {offsets = [1, 0], sizes = [12, 128], strides = [1, 1]} : vector<14x128xf32> to vector<12x128xf32>
    %42 = arith.addf %41, %40 : vector<12x128xf32>
    %43 = tpu.iota {dimensions = array<i32: 0>} : vector<12x1xi32>
    %c2_i32 = arith.constant 2 : i32
    %44 = arith.subi %1, %c2_i32 : i32
    %45 = vector.broadcast %44 : i32 to vector<12x1xi32>
    %46 = arith.addi %43, %45 : vector<12x1xi32>
    %c0_i32_14 = arith.constant 0 : i32
    %47 = vector.broadcast %c0_i32_14 : i32 to vector<12x1xi32>
    %48 = arith.cmpi sge, %46, %47 : vector<12x1xi32>
    %c4_i32_15 = arith.constant 4 : i32
    %49 = vector.broadcast %c4_i32_15 : i32 to vector<12x1xi32>
    %50 = arith.cmpi slt, %46, %49 : vector<12x1xi32>
    %51 = arith.andi %48, %50 : vector<12x1xi1>
    %cst_16 = arith.constant 0.000000e+00 : f32
    %52 = vector.shape_cast %51 : vector<12x1xi1> to vector<12x1xi1>
    %53 = vector.broadcast %52 : vector<12x1xi1> to vector<12x128xi1>
    %54 = vector.broadcast %cst_16 : f32 to vector<12x128xf32>
    %55 = arith.select %53, %42, %54 : vector<12x128xi1>, vector<12x128xf32>
    %cst_17 = arith.constant 0.000000e+00 : f32
    %56 = vector.broadcast %cst_17 : f32 to vector<12x128xf32>
    %57 = arith.maximumf %55, %56 : vector<12x128xf32>
    %58 = vector.extract_strided_slice %57 {offsets = [0, 0], sizes = [10, 128], strides = [1, 1]} : vector<12x128xf32> to vector<10x128xf32>
    %59 = vector.extract_strided_slice %57 {offsets = [1, 0], sizes = [10, 128], strides = [1, 1]} : vector<12x128xf32> to vector<10x128xf32>
    %60 = vector.extract_strided_slice %57 {offsets = [2, 0], sizes = [10, 128], strides = [1, 1]} : vector<12x128xf32> to vector<10x128xf32>
    %61 = tpu.concatenate %58, %59, %60 in 1 : vector<10x128xf32>, vector<10x128xf32>, vector<10x128xf32> -> vector<10x384xf32>
    %62 = arith.truncf %61 : vector<10x384xf32> to vector<10x384xbf16>
    %c0_18 = arith.constant 0 : index
    %c0_19 = arith.constant 0 : index
    %63 = vector.load %arg7[%c0_18, %c0_19] : memref<384x128xbf16, #tpu.memory_space<vmem>>, vector<384x128xbf16>
    %cst_20 = arith.constant dense<0.000000e+00> : vector<10x128xf32>
    %64 = tpu.matmul %62, %63, %cst_20 {dimension_numbers = #tpu.dot_dimension_numbers<[1], [0], [0], [1], [0, 0, 1, 1], [], []>} : vector<10x384xbf16>, vector<384x128xbf16>, vector<10x128xf32> -> vector<10x128xf32>
    %cst_21 = arith.constant 0.000000e+00 : f32
    %65 = vector.broadcast %cst_21 : f32 to vector<10x128xf32>
    %66 = arith.maximumf %64, %65 : vector<10x128xf32>
    %67 = arith.truncf %66 : vector<10x128xf32> to vector<10x128xbf16>
    %c0_22 = arith.constant 0 : index
    %c0_23 = arith.constant 0 : index
    %68 = vector.load %arg8[%c0_22, %c0_23] : memref<128x128xbf16, #tpu.memory_space<vmem>>, vector<128x128xbf16>
    %cst_24 = arith.constant dense<0.000000e+00> : vector<10x128xf32>
    %69 = tpu.matmul %67, %68, %cst_24 {dimension_numbers = #tpu.dot_dimension_numbers<[1], [0], [0], [1], [0, 0, 1, 1], [], []>} : vector<10x128xbf16>, vector<128x128xbf16>, vector<10x128xf32> -> vector<10x128xf32>
    %70 = vector.extract_strided_slice %55 {offsets = [1, 0], sizes = [10, 128], strides = [1, 1]} : vector<12x128xf32> to vector<10x128xf32>
    %71 = arith.addf %70, %69 : vector<10x128xf32>
    %72 = tpu.iota {dimensions = array<i32: 0>} : vector<10x1xi32>
    %c1_i32 = arith.constant 1 : i32
    %73 = arith.subi %1, %c1_i32 : i32
    %74 = vector.broadcast %73 : i32 to vector<10x1xi32>
    %75 = arith.addi %72, %74 : vector<10x1xi32>
    %c0_i32_25 = arith.constant 0 : i32
    %76 = vector.broadcast %c0_i32_25 : i32 to vector<10x1xi32>
    %77 = arith.cmpi sge, %75, %76 : vector<10x1xi32>
    %c4_i32_26 = arith.constant 4 : i32
    %78 = vector.broadcast %c4_i32_26 : i32 to vector<10x1xi32>
    %79 = arith.cmpi slt, %75, %78 : vector<10x1xi32>
    %80 = arith.andi %77, %79 : vector<10x1xi1>
    %cst_27 = arith.constant 0.000000e+00 : f32
    %81 = vector.shape_cast %80 : vector<10x1xi1> to vector<10x1xi1>
    %82 = vector.broadcast %81 : vector<10x1xi1> to vector<10x128xi1>
    %83 = vector.broadcast %cst_27 : f32 to vector<10x128xf32>
    %84 = arith.select %82, %71, %83 : vector<10x128xi1>, vector<10x128xf32>
    %cst_28 = arith.constant 0.000000e+00 : f32
    %85 = vector.broadcast %cst_28 : f32 to vector<10x128xf32>
    %86 = arith.maximumf %84, %85 : vector<10x128xf32>
    %87 = vector.extract_strided_slice %86 {offsets = [0, 0], sizes = [8, 128], strides = [1, 1]} : vector<10x128xf32> to vector<8x128xf32>
    %88 = vector.extract_strided_slice %86 {offsets = [1, 0], sizes = [8, 128], strides = [1, 1]} : vector<10x128xf32> to vector<8x128xf32>
    %89 = vector.extract_strided_slice %86 {offsets = [2, 0], sizes = [8, 128], strides = [1, 1]} : vector<10x128xf32> to vector<8x128xf32>
    %90 = tpu.concatenate %87, %88, %89 in 1 : vector<8x128xf32>, vector<8x128xf32>, vector<8x128xf32> -> vector<8x384xf32>
    %91 = arith.truncf %90 : vector<8x384xf32> to vector<8x384xbf16>
    %c0_29 = arith.constant 0 : index
    %c0_30 = arith.constant 0 : index
    %92 = vector.load %arg9[%c0_29, %c0_30] : memref<384x128xbf16, #tpu.memory_space<vmem>>, vector<384x128xbf16>
    %cst_31 = arith.constant dense<0.000000e+00> : vector<8x128xf32>
    %93 = tpu.matmul %91, %92, %cst_31 {dimension_numbers = #tpu.dot_dimension_numbers<[1], [0], [0], [1], [0, 0, 1, 1], [], []>} : vector<8x384xbf16>, vector<384x128xbf16>, vector<8x128xf32> -> vector<8x128xf32>
    %c0_32 = arith.constant 0 : index
    %c0_33 = arith.constant 0 : index
    %94 = vector.load %arg10[%c0_32, %c0_33] : memref<1x128xf32, #tpu.memory_space<vmem>>, vector<1x128xf32>
    %95 = vector.broadcast %94 : vector<1x128xf32> to vector<8x128xf32>
    %96 = arith.addf %93, %95 : vector<8x128xf32>
    %c0_34 = arith.constant 0 : index
    %c0_35 = arith.constant 0 : index
    %c0_36 = arith.constant 0 : index
    %97 = vector.load %arg11[%c0_34, %c0_35, %c0_36] : memref<1x8x128xf32, #tpu.memory_space<vmem>>, vector<1x8x128xf32>
    %98 = vector.shape_cast %97 : vector<1x8x128xf32> to vector<8x128xf32>
    %99 = vector.shape_cast %96 : vector<8x128xf32> to vector<1x8x128xf32>
    tpu.vector_store %arg11[%c0_34, %c0_35, %c0_36], %99 {strides = array<i32>} : memref<1x8x128xf32, #tpu.memory_space<vmem>>, vector<1x8x128xf32>,
    return
  }
  func.func @transform_0(%arg0: i32, %arg1: i32) -> (i32, i32, i32) {
    %c0_i32 = arith.constant 0 : i32
    %c0_i32_0 = arith.constant 0 : i32
    %c0_i32_1 = arith.constant 0 : i32
    return %arg0, %c0_i32, %c0_i32_0 : i32, i32, i32
  }
  func.func @transform_1(%arg0: i32, %arg1: i32) -> (i32, i32) {
    %c0_i32 = arith.constant 0 : i32
    %c0_i32_0 = arith.constant 0 : i32
    %c0_i32_1 = arith.constant 0 : i32
    return %c0_i32, %c0_i32_0 : i32, i32
  }
  func.func @transform_2(%arg0: i32, %arg1: i32) -> (i32, i32) {
    %c0_i32 = arith.constant 0 : i32
    %c0_i32_0 = arith.constant 0 : i32
    %c0_i32_1 = arith.constant 0 : i32
    return %c0_i32, %c0_i32_0 : i32, i32
  }
  func.func @transform_3(%arg0: i32, %arg1: i32) -> (i32, i32) {
    %c0_i32 = arith.constant 0 : i32
    %c0_i32_0 = arith.constant 0 : i32
    %c0_i32_1 = arith.constant 0 : i32
    return %c0_i32, %c0_i32_0 : i32, i32
  }
  func.func @transform_4(%arg0: i32, %arg1: i32) -> (i32, i32) {
    %c0_i32 = arith.constant 0 : i32
    %c0_i32_0 = arith.constant 0 : i32
    %c0_i32_1 = arith.constant 0 : i32
    return %c0_i32, %c0_i32_0 : i32, i32
  }
  func.func @transform_5(%arg0: i32, %arg1: i32) -> (i32, i32) {
    %c0_i32 = arith.constant 0 : i32
    %c0_i32_0 = arith.constant 0 : i32
    %c0_i32_1 = arith.constant 0 : i32
    return %c0_i32, %c0_i32_0 : i32, i32
  }
  func.func @transform_6(%arg0: i32, %arg1: i32) -> (i32, i32) {
    %c0_i32 = arith.constant 0 : i32
    %c0_i32_0 = arith.constant 0 : i32
    %c0_i32_1 = arith.constant 0 : i32
    return %c0_i32, %c0_i32_0 : i32, i32
  }
  func.func @transform_7(%arg0: i32, %arg1: i32) -> (i32, i32) {
    %c0_i32 = arith.constant 0 : i32
    %c0_i32_0 = arith.constant 0 : i32
    %c0_i32_1 = arith.constant 0 : i32
    return %c0_i32, %c0_i32_0 : i32, i32
  }
  func.func @transform_8(%arg0: i32, %arg1: i32) -> (i32, i32) {
    %c0_i32 = arith.constant 0 : i32
    %c0_i32_0 = arith.constant 0 : i32
    %c0_i32_1 = arith.constant 0 : i32
    return %c0_i32, %c0_i32_0 : i32, i32
  }
  func.func @transform_9(%arg0: i32, %arg1: i32) -> (i32, i32, i32) {
    %c0_i32 = arith.constant 0 : i32
    %c0_i32_0 = arith.constant 0 : i32
    return %arg0, %arg1, %c0_i32 : i32, i32, i32
  }
}

module attributes {stable_mosaic.version = 11 : i64} {
  func.func @_vq_kernel(%arg0: i32, %arg1: memref<8x128xf32, #tpu.memory_space<vmem>>, %arg2: memref<128x128xbf16, #tpu.memory_space<vmem>>, %arg3: memref<128x128xf32, #tpu.memory_space<vmem>>, %arg4: memref<1x128xf32, #tpu.memory_space<vmem>>, %arg5: memref<8x128xf32, #tpu.memory_space<vmem>>, %arg6: memref<8x1xi32, #tpu.memory_space<vmem>>) attributes {dimension_semantics = [#tpu.dimension_semantics<parallel>], iteration_bounds = array<i64: 1>, scalar_prefetch = 0 : i64, scratch_operands = 0 : i64, tpu.core_type = #tpu.core_type<tc>, window_params = [{transform_indices = @transform_0, window_bounds = array<i64: 8, 128>}, {pipeline_mode = #tpu.pipeline_mode<synchronous>, transform_indices = @transform_1, window_bounds = array<i64: 128, 128>}, {pipeline_mode = #tpu.pipeline_mode<synchronous>, transform_indices = @transform_2, window_bounds = array<i64: 128, 128>}, {pipeline_mode = #tpu.pipeline_mode<synchronous>, transform_indices = @transform_3, window_bounds = array<i64: 1, 128>}, {transform_indices = @transform_4, window_bounds = array<i64: 8, 128>}, {transform_indices = @transform_5, window_bounds = array<i64: 8, 1>}]} {
    %c0 = arith.constant 0 : index
    %c0_0 = arith.constant 0 : index
    %0 = vector.load %arg1[%c0, %c0_0] : memref<8x128xf32, #tpu.memory_space<vmem>>, vector<8x128xf32>
    %1 = arith.truncf %0 : vector<8x128xf32> to vector<8x128xbf16>
    %c0_1 = arith.constant 0 : index
    %c0_2 = arith.constant 0 : index
    %2 = vector.load %arg2[%c0_1, %c0_2] : memref<128x128xbf16, #tpu.memory_space<vmem>>, vector<128x128xbf16>
    %cst = arith.constant dense<0.000000e+00> : vector<8x128xf32>
    %3 = tpu.matmul %1, %2, %cst {dimension_numbers = #tpu.dot_dimension_numbers<[1], [1], [0], [0], [0, 0, 1, 0], [], []>} : vector<8x128xbf16>, vector<128x128xbf16>, vector<8x128xf32> -> vector<8x128xf32>
    %4 = arith.mulf %0, %0 : vector<8x128xf32>
    %cst_3 = arith.constant dense<0.000000e+00> : vector<8xf32>
    %5 = vector.multi_reduction <add>, %4, %cst_3 [1] : vector<8x128xf32> to vector<8xf32>
    %6 = vector.shape_cast %5 : vector<8xf32> to vector<8x1xf32>
    %c0_4 = arith.constant 0 : index
    %c0_5 = arith.constant 0 : index
    %7 = vector.load %arg4[%c0_4, %c0_5] : memref<1x128xf32, #tpu.memory_space<vmem>>, vector<1x128xf32>
    %8 = vector.broadcast %6 : vector<8x1xf32> to vector<8x128xf32>
    %9 = vector.broadcast %7 : vector<1x128xf32> to vector<8x128xf32>
    %10 = arith.addf %8, %9 : vector<8x128xf32>
    %cst_6 = arith.constant 2.000000e+00 : f32
    %11 = vector.broadcast %cst_6 : f32 to vector<8x128xf32>
    %12 = arith.mulf %11, %3 : vector<8x128xf32>
    %13 = arith.subf %10, %12 : vector<8x128xf32>
    %14 = tpu.iota {dimensions = array<i32: 1>} : vector<8x128xi32>
    %c64_i32 = arith.constant 64 : i32
    %15 = vector.broadcast %c64_i32 : i32 to vector<8x128xi32>
    %16 = arith.cmpi slt, %14, %15 : vector<8x128xi32>
    %cst_7 = arith.constant 1.000000e+30 : f32
    %17 = vector.broadcast %cst_7 : f32 to vector<8x128xf32>
    %18 = arith.select %16, %13, %17 : vector<8x128xi1>, vector<8x128xf32>
    %cst_8 = arith.constant dense<0x7F800000> : vector<8xf32>
    %19 = vector.multi_reduction <minimumf>, %18, %cst_8 [1] : vector<8x128xf32> to vector<8xf32>
    %20 = vector.shape_cast %19 : vector<8xf32> to vector<8x1xf32>
    %21 = vector.broadcast %20 : vector<8x1xf32> to vector<8x128xf32>
    %22 = arith.cmpf oeq, %18, %21 : vector<8x128xf32>
    %c128_i32 = arith.constant 128 : i32
    %23 = vector.broadcast %c128_i32 : i32 to vector<8x128xi32>
    %24 = arith.select %22, %14, %23 : vector<8x128xi1>, vector<8x128xi32>
    %cst_9 = arith.constant dense<2147483647> : vector<8xi32>
    %25 = vector.multi_reduction <minsi>, %24, %cst_9 [1] : vector<8x128xi32> to vector<8xi32>
    %26 = vector.shape_cast %25 : vector<8xi32> to vector<8x1xi32>
    %27 = vector.broadcast %26 : vector<8x1xi32> to vector<8x128xi32>
    %28 = arith.cmpi eq, %14, %27 : vector<8x128xi32>
    %29 = arith.extui %28 : vector<8x128xi1> to vector<8x128xi32>
    %30 = arith.sitofp %29 : vector<8x128xi32> to vector<8x128xf32>
    %c0_10 = arith.constant 0 : index
    %c0_11 = arith.constant 0 : index
    %31 = vector.load %arg3[%c0_10, %c0_11] : memref<128x128xf32, #tpu.memory_space<vmem>>, vector<128x128xf32>
    %cst_12 = arith.constant dense<0.000000e+00> : vector<8x128xf32>
    %32 = tpu.matmul %30, %31, %cst_12 {dimension_numbers = #tpu.dot_dimension_numbers<[1], [0], [0], [1], [0, 0, 1, 1], [], []>} : vector<8x128xf32>, vector<128x128xf32>, vector<8x128xf32> -> vector<8x128xf32>
    %c0_13 = arith.constant 0 : index
    %c0_14 = arith.constant 0 : index
    %33 = vector.load %arg5[%c0_13, %c0_14] : memref<8x128xf32, #tpu.memory_space<vmem>>, vector<8x128xf32>
    tpu.vector_store %arg5[%c0_13, %c0_14], %32 {strides = array<i32>} : memref<8x128xf32, #tpu.memory_space<vmem>>, vector<8x128xf32>,
    %c0_15 = arith.constant 0 : index
    %c0_16 = arith.constant 0 : index
    %34 = vector.load %arg6[%c0_15, %c0_16] : memref<8x1xi32, #tpu.memory_space<vmem>>, vector<8x1xi32>
    tpu.vector_store %arg6[%c0_15, %c0_16], %26 {strides = array<i32>} : memref<8x1xi32, #tpu.memory_space<vmem>>, vector<8x1xi32>,
    return
  }
  func.func @transform_0(%arg0: i32) -> (i32, i32) {
    %c0_i32 = arith.constant 0 : i32
    %c0_i32_0 = arith.constant 0 : i32
    return %arg0, %c0_i32 : i32, i32
  }
  func.func @transform_1(%arg0: i32) -> (i32, i32) {
    %c0_i32 = arith.constant 0 : i32
    %c0_i32_0 = arith.constant 0 : i32
    %c0_i32_1 = arith.constant 0 : i32
    return %c0_i32, %c0_i32_0 : i32, i32
  }
  func.func @transform_2(%arg0: i32) -> (i32, i32) {
    %c0_i32 = arith.constant 0 : i32
    %c0_i32_0 = arith.constant 0 : i32
    %c0_i32_1 = arith.constant 0 : i32
    return %c0_i32, %c0_i32_0 : i32, i32
  }
  func.func @transform_3(%arg0: i32) -> (i32, i32) {
    %c0_i32 = arith.constant 0 : i32
    %c0_i32_0 = arith.constant 0 : i32
    %c0_i32_1 = arith.constant 0 : i32
    return %c0_i32, %c0_i32_0 : i32, i32
  }
  func.func @transform_4(%arg0: i32) -> (i32, i32) {
    %c0_i32 = arith.constant 0 : i32
    %c0_i32_0 = arith.constant 0 : i32
    return %arg0, %c0_i32 : i32, i32
  }
  func.func @transform_5(%arg0: i32) -> (i32, i32) {
    %c0_i32 = arith.constant 0 : i32
    %c0_i32_0 = arith.constant 0 : i32
    return %arg0, %c0_i32 : i32, i32
  }
}

module attributes {stable_mosaic.version = 11 : i64} {
  func.func @_chain_kernel(%arg0: i32, %arg1: i32, %arg2: memref<1x14x128xf32, #tpu.memory_space<vmem>>, %arg3: memref<384x128xbf16, #tpu.memory_space<vmem>>, %arg4: memref<1x128xf32, #tpu.memory_space<vmem>>, %arg5: memref<384x128xbf16, #tpu.memory_space<vmem>>, %arg6: memref<128x128xbf16, #tpu.memory_space<vmem>>, %arg7: memref<384x128xbf16, #tpu.memory_space<vmem>>, %arg8: memref<128x128xbf16, #tpu.memory_space<vmem>>, %arg9: memref<1x8x128xbf16, #tpu.memory_space<vmem>>) attributes {dimension_semantics = [#tpu.dimension_semantics<parallel>, #tpu.dimension_semantics<parallel>], iteration_bounds = array<i64: 2, 1>, scalar_prefetch = 0 : i64, scratch_operands = 0 : i64, tpu.core_type = #tpu.core_type<tc>, window_params = [{transform_indices = @transform_0, window_bounds = array<i64: 1, 14, 128>}, {pipeline_mode = #tpu.pipeline_mode<synchronous>, transform_indices = @transform_1, window_bounds = array<i64: 384, 128>}, {pipeline_mode = #tpu.pipeline_mode<synchronous>, transform_indices = @transform_2, window_bounds = array<i64: 1, 128>}, {pipeline_mode = #tpu.pipeline_mode<synchronous>, transform_indices = @transform_3, window_bounds = array<i64: 384, 128>}, {pipeline_mode = #tpu.pipeline_mode<synchronous>, transform_indices = @transform_4, window_bounds = array<i64: 128, 128>}, {pipeline_mode = #tpu.pipeline_mode<synchronous>, transform_indices = @transform_5, window_bounds = array<i64: 384, 128>}, {pipeline_mode = #tpu.pipeline_mode<synchronous>, transform_indices = @transform_6, window_bounds = array<i64: 128, 128>}, {transform_indices = @transform_7, window_bounds = array<i64: 1, 8, 128>}]} {
    %c8_i32 = arith.constant 8 : i32
    %0 = arith.muli %arg1, %c8_i32 : i32
    %1 = tpu.assume_multiple %0, 8 : i32
    %c0 = arith.constant 0 : index
    %2 = arith.index_cast %1 : i32 to index
    %c0_0 = arith.constant 0 : index
    %3 = vector.load %arg2[%c0, %2, %c0_0] : memref<1x14x128xf32, #tpu.memory_space<vmem>>, vector<1x14x128xf32>
    %4 = vector.shape_cast %3 : vector<1x14x128xf32> to vector<14x128xf32>
    %5 = vector.extract_strided_slice %4 {offsets = [0, 0], sizes = [12, 128], strides = [1, 1]} : vector<14x128xf32> to vector<12x128xf32>
    %6 = vector.extract_strided_slice %4 {offsets = [1, 0], sizes = [12, 128], strides = [1, 1]} : vector<14x128xf32> to vector<12x128xf32>
    %7 = vector.extract_strided_slice %4 {offsets = [2, 0], sizes = [12, 128], strides = [1, 1]} : vector<14x128xf32> to vector<12x128xf32>
    %8 = tpu.concatenate %5, %6, %7 in 1 : vector<12x128xf32>, vector<12x128xf32>, vector<12x128xf32> -> vector<12x384xf32>
    %9 = arith.truncf %8 : vector<12x384xf32> to vector<12x384xbf16>
    %c0_1 = arith.constant 0 : index
    %c0_2 = arith.constant 0 : index
    %10 = vector.load %arg3[%c0_1, %c0_2] : memref<384x128xbf16, #tpu.memory_space<vmem>>, vector<384x128xbf16>
    %cst = arith.constant dense<0.000000e+00> : vector<12x128xf32>
    %11 = tpu.matmul %9, %10, %cst {dimension_numbers = #tpu.dot_dimension_numbers<[1], [0], [0], [1], [0, 0, 1, 1], [], []>} : vector<12x384xbf16>, vector<384x128xbf16>, vector<12x128xf32> -> vector<12x128xf32>
    %c0_3 = arith.constant 0 : index
    %c0_4 = arith.constant 0 : index
    %12 = vector.load %arg4[%c0_3, %c0_4] : memref<1x128xf32, #tpu.memory_space<vmem>>, vector<1x128xf32>
    %13 = vector.broadcast %12 : vector<1x128xf32> to vector<12x128xf32>
    %14 = arith.addf %11, %13 : vector<12x128xf32>
    %15 = tpu.iota {dimensions = array<i32: 0>} : vector<12x1xi32>
    %c2_i32 = arith.constant 2 : i32
    %16 = arith.subi %1, %c2_i32 : i32
    %17 = vector.broadcast %16 : i32 to vector<12x1xi32>
    %18 = arith.addi %15, %17 : vector<12x1xi32>
    %c0_i32 = arith.constant 0 : i32
    %19 = vector.broadcast %c0_i32 : i32 to vector<12x1xi32>
    %20 = arith.cmpi sge, %18, %19 : vector<12x1xi32>
    %c4_i32 = arith.constant 4 : i32
    %21 = vector.broadcast %c4_i32 : i32 to vector<12x1xi32>
    %22 = arith.cmpi slt, %18, %21 : vector<12x1xi32>
    %23 = arith.andi %20, %22 : vector<12x1xi1>
    %cst_5 = arith.constant 0.000000e+00 : f32
    %24 = vector.shape_cast %23 : vector<12x1xi1> to vector<12x1xi1>
    %25 = vector.broadcast %24 : vector<12x1xi1> to vector<12x128xi1>
    %26 = vector.broadcast %cst_5 : f32 to vector<12x128xf32>
    %27 = arith.select %25, %14, %26 : vector<12x128xi1>, vector<12x128xf32>
    %cst_6 = arith.constant 0.000000e+00 : f32
    %28 = vector.broadcast %cst_6 : f32 to vector<12x128xf32>
    %29 = arith.maximumf %27, %28 : vector<12x128xf32>
    %30 = vector.extract_strided_slice %29 {offsets = [0, 0], sizes = [10, 128], strides = [1, 1]} : vector<12x128xf32> to vector<10x128xf32>
    %31 = vector.extract_strided_slice %29 {offsets = [1, 0], sizes = [10, 128], strides = [1, 1]} : vector<12x128xf32> to vector<10x128xf32>
    %32 = vector.extract_strided_slice %29 {offsets = [2, 0], sizes = [10, 128], strides = [1, 1]} : vector<12x128xf32> to vector<10x128xf32>
    %33 = tpu.concatenate %30, %31, %32 in 1 : vector<10x128xf32>, vector<10x128xf32>, vector<10x128xf32> -> vector<10x384xf32>
    %34 = arith.truncf %33 : vector<10x384xf32> to vector<10x384xbf16>
    %c0_7 = arith.constant 0 : index
    %c0_8 = arith.constant 0 : index
    %35 = vector.load %arg5[%c0_7, %c0_8] : memref<384x128xbf16, #tpu.memory_space<vmem>>, vector<384x128xbf16>
    %cst_9 = arith.constant dense<0.000000e+00> : vector<10x128xf32>
    %36 = tpu.matmul %34, %35, %cst_9 {dimension_numbers = #tpu.dot_dimension_numbers<[1], [0], [0], [1], [0, 0, 1, 1], [], []>} : vector<10x384xbf16>, vector<384x128xbf16>, vector<10x128xf32> -> vector<10x128xf32>
    %cst_10 = arith.constant 0.000000e+00 : f32
    %37 = vector.broadcast %cst_10 : f32 to vector<10x128xf32>
    %38 = arith.maximumf %36, %37 : vector<10x128xf32>
    %39 = arith.truncf %38 : vector<10x128xf32> to vector<10x128xbf16>
    %c0_11 = arith.constant 0 : index
    %c0_12 = arith.constant 0 : index
    %40 = vector.load %arg6[%c0_11, %c0_12] : memref<128x128xbf16, #tpu.memory_space<vmem>>, vector<128x128xbf16>
    %cst_13 = arith.constant dense<0.000000e+00> : vector<10x128xf32>
    %41 = tpu.matmul %39, %40, %cst_13 {dimension_numbers = #tpu.dot_dimension_numbers<[1], [0], [0], [1], [0, 0, 1, 1], [], []>} : vector<10x128xbf16>, vector<128x128xbf16>, vector<10x128xf32> -> vector<10x128xf32>
    %42 = vector.extract_strided_slice %27 {offsets = [1, 0], sizes = [10, 128], strides = [1, 1]} : vector<12x128xf32> to vector<10x128xf32>
    %43 = arith.addf %42, %41 : vector<10x128xf32>
    %44 = tpu.iota {dimensions = array<i32: 0>} : vector<10x1xi32>
    %c1_i32 = arith.constant 1 : i32
    %45 = arith.subi %1, %c1_i32 : i32
    %46 = vector.broadcast %45 : i32 to vector<10x1xi32>
    %47 = arith.addi %44, %46 : vector<10x1xi32>
    %c0_i32_14 = arith.constant 0 : i32
    %48 = vector.broadcast %c0_i32_14 : i32 to vector<10x1xi32>
    %49 = arith.cmpi sge, %47, %48 : vector<10x1xi32>
    %c4_i32_15 = arith.constant 4 : i32
    %50 = vector.broadcast %c4_i32_15 : i32 to vector<10x1xi32>
    %51 = arith.cmpi slt, %47, %50 : vector<10x1xi32>
    %52 = arith.andi %49, %51 : vector<10x1xi1>
    %cst_16 = arith.constant 0.000000e+00 : f32
    %53 = vector.shape_cast %52 : vector<10x1xi1> to vector<10x1xi1>
    %54 = vector.broadcast %53 : vector<10x1xi1> to vector<10x128xi1>
    %55 = vector.broadcast %cst_16 : f32 to vector<10x128xf32>
    %56 = arith.select %54, %43, %55 : vector<10x128xi1>, vector<10x128xf32>
    %cst_17 = arith.constant 0.000000e+00 : f32
    %57 = vector.broadcast %cst_17 : f32 to vector<10x128xf32>
    %58 = arith.maximumf %56, %57 : vector<10x128xf32>
    %59 = vector.extract_strided_slice %58 {offsets = [0, 0], sizes = [8, 128], strides = [1, 1]} : vector<10x128xf32> to vector<8x128xf32>
    %60 = vector.extract_strided_slice %58 {offsets = [1, 0], sizes = [8, 128], strides = [1, 1]} : vector<10x128xf32> to vector<8x128xf32>
    %61 = vector.extract_strided_slice %58 {offsets = [2, 0], sizes = [8, 128], strides = [1, 1]} : vector<10x128xf32> to vector<8x128xf32>
    %62 = tpu.concatenate %59, %60, %61 in 1 : vector<8x128xf32>, vector<8x128xf32>, vector<8x128xf32> -> vector<8x384xf32>
    %63 = arith.truncf %62 : vector<8x384xf32> to vector<8x384xbf16>
    %c0_18 = arith.constant 0 : index
    %c0_19 = arith.constant 0 : index
    %64 = vector.load %arg7[%c0_18, %c0_19] : memref<384x128xbf16, #tpu.memory_space<vmem>>, vector<384x128xbf16>
    %cst_20 = arith.constant dense<0.000000e+00> : vector<8x128xf32>
    %65 = tpu.matmul %63, %64, %cst_20 {dimension_numbers = #tpu.dot_dimension_numbers<[1], [0], [0], [1], [0, 0, 1, 1], [], []>} : vector<8x384xbf16>, vector<384x128xbf16>, vector<8x128xf32> -> vector<8x128xf32>
    %cst_21 = arith.constant 0.000000e+00 : f32
    %66 = vector.broadcast %cst_21 : f32 to vector<8x128xf32>
    %67 = arith.maximumf %65, %66 : vector<8x128xf32>
    %68 = arith.truncf %67 : vector<8x128xf32> to vector<8x128xbf16>
    %c0_22 = arith.constant 0 : index
    %c0_23 = arith.constant 0 : index
    %69 = vector.load %arg8[%c0_22, %c0_23] : memref<128x128xbf16, #tpu.memory_space<vmem>>, vector<128x128xbf16>
    %cst_24 = arith.constant dense<0.000000e+00> : vector<8x128xf32>
    %70 = tpu.matmul %68, %69, %cst_24 {dimension_numbers = #tpu.dot_dimension_numbers<[1], [0], [0], [1], [0, 0, 1, 1], [], []>} : vector<8x128xbf16>, vector<128x128xbf16>, vector<8x128xf32> -> vector<8x128xf32>
    %71 = vector.extract_strided_slice %56 {offsets = [1, 0], sizes = [8, 128], strides = [1, 1]} : vector<10x128xf32> to vector<8x128xf32>
    %72 = arith.addf %71, %70 : vector<8x128xf32>
    %73 = arith.truncf %72 : vector<8x128xf32> to vector<8x128xbf16>
    %c0_25 = arith.constant 0 : index
    %c0_26 = arith.constant 0 : index
    %c0_27 = arith.constant 0 : index
    %74 = vector.load %arg9[%c0_25, %c0_26, %c0_27] : memref<1x8x128xbf16, #tpu.memory_space<vmem>>, vector<1x8x128xbf16>
    %75 = vector.shape_cast %74 : vector<1x8x128xbf16> to vector<8x128xbf16>
    %76 = vector.shape_cast %73 : vector<8x128xbf16> to vector<1x8x128xbf16>
    tpu.vector_store %arg9[%c0_25, %c0_26, %c0_27], %76 {strides = array<i32>} : memref<1x8x128xbf16, #tpu.memory_space<vmem>>, vector<1x8x128xbf16>,
    return
  }
  func.func @transform_0(%arg0: i32, %arg1: i32) -> (i32, i32, i32) {
    %c0_i32 = arith.constant 0 : i32
    %c0_i32_0 = arith.constant 0 : i32
    %c0_i32_1 = arith.constant 0 : i32
    return %arg0, %c0_i32, %c0_i32_0 : i32, i32, i32
  }
  func.func @transform_1(%arg0: i32, %arg1: i32) -> (i32, i32) {
    %c0_i32 = arith.constant 0 : i32
    %c0_i32_0 = arith.constant 0 : i32
    %c0_i32_1 = arith.constant 0 : i32
    return %c0_i32, %c0_i32_0 : i32, i32
  }
  func.func @transform_2(%arg0: i32, %arg1: i32) -> (i32, i32) {
    %c0_i32 = arith.constant 0 : i32
    %c0_i32_0 = arith.constant 0 : i32
    %c0_i32_1 = arith.constant 0 : i32
    return %c0_i32, %c0_i32_0 : i32, i32
  }
  func.func @transform_3(%arg0: i32, %arg1: i32) -> (i32, i32) {
    %c0_i32 = arith.constant 0 : i32
    %c0_i32_0 = arith.constant 0 : i32
    %c0_i32_1 = arith.constant 0 : i32
    return %c0_i32, %c0_i32_0 : i32, i32
  }
  func.func @transform_4(%arg0: i32, %arg1: i32) -> (i32, i32) {
    %c0_i32 = arith.constant 0 : i32
    %c0_i32_0 = arith.constant 0 : i32
    %c0_i32_1 = arith.constant 0 : i32
    return %c0_i32, %c0_i32_0 : i32, i32
  }
  func.func @transform_5(%arg0: i32, %arg1: i32) -> (i32, i32) {
    %c0_i32 = arith.constant 0 : i32
    %c0_i32_0 = arith.constant 0 : i32
    %c0_i32_1 = arith.constant 0 : i32
    return %c0_i32, %c0_i32_0 : i32, i32
  }
  func.func @transform_6(%arg0: i32, %arg1: i32) -> (i32, i32) {
    %c0_i32 = arith.constant 0 : i32
    %c0_i32_0 = arith.constant 0 : i32
    %c0_i32_1 = arith.constant 0 : i32
    return %c0_i32, %c0_i32_0 : i32, i32
  }
  func.func @transform_7(%arg0: i32, %arg1: i32) -> (i32, i32, i32) {
    %c0_i32 = arith.constant 0 : i32
    %c0_i32_0 = arith.constant 0 : i32
    return %arg0, %arg1, %c0_i32 : i32, i32, i32
  }
}

module attributes {stable_mosaic.version = 11 : i64} {
  func.func @_upsample_kernel(%arg0: i32, %arg1: i32, %arg2: memref<1x10x128xbf16, #tpu.memory_space<vmem>>, %arg3: memref<256x256xbf16, #tpu.memory_space<vmem>>, %arg4: memref<256x256xbf16, #tpu.memory_space<vmem>>, %arg5: memref<1x256xf32, #tpu.memory_space<vmem>>, %arg6: memref<1x8x512xbf16, #tpu.memory_space<vmem>>) attributes {dimension_semantics = [#tpu.dimension_semantics<parallel>, #tpu.dimension_semantics<parallel>], iteration_bounds = array<i64: 2, 1>, scalar_prefetch = 0 : i64, scratch_operands = 0 : i64, tpu.core_type = #tpu.core_type<tc>, window_params = [{transform_indices = @transform_0, window_bounds = array<i64: 1, 10, 128>}, {pipeline_mode = #tpu.pipeline_mode<synchronous>, transform_indices = @transform_1, window_bounds = array<i64: 256, 256>}, {pipeline_mode = #tpu.pipeline_mode<synchronous>, transform_indices = @transform_2, window_bounds = array<i64: 256, 256>}, {pipeline_mode = #tpu.pipeline_mode<synchronous>, transform_indices = @transform_3, window_bounds = array<i64: 1, 256>}, {transform_indices = @transform_4, window_bounds = array<i64: 1, 8, 512>}]} {
    %c8_i32 = arith.constant 8 : i32
    %0 = arith.muli %arg1, %c8_i32 : i32
    %1 = tpu.assume_multiple %0, 8 : i32
    %c0 = arith.constant 0 : index
    %2 = arith.index_cast %1 : i32 to index
    %c0_0 = arith.constant 0 : index
    %3 = vector.load %arg2[%c0, %2, %c0_0] : memref<1x10x128xbf16, #tpu.memory_space<vmem>>, vector<1x10x128xbf16>
    %4 = vector.shape_cast %3 : vector<1x10x128xbf16> to vector<10x128xbf16>
    %5 = vector.extract_strided_slice %4 {offsets = [0, 0], sizes = [8, 128], strides = [1, 1]} : vector<10x128xbf16> to vector<8x128xbf16>
    %6 = vector.extract_strided_slice %4 {offsets = [1, 0], sizes = [8, 128], strides = [1, 1]} : vector<10x128xbf16> to vector<8x128xbf16>
    %7 = tpu.concatenate %5, %6 in 1 : vector<8x128xbf16>, vector<8x128xbf16> -> vector<8x256xbf16>
    %8 = vector.extract_strided_slice %4 {offsets = [1, 0], sizes = [8, 128], strides = [1, 1]} : vector<10x128xbf16> to vector<8x128xbf16>
    %9 = vector.extract_strided_slice %4 {offsets = [2, 0], sizes = [8, 128], strides = [1, 1]} : vector<10x128xbf16> to vector<8x128xbf16>
    %10 = tpu.concatenate %8, %9 in 1 : vector<8x128xbf16>, vector<8x128xbf16> -> vector<8x256xbf16>
    %c0_1 = arith.constant 0 : index
    %c0_2 = arith.constant 0 : index
    %11 = vector.load %arg5[%c0_1, %c0_2] : memref<1x256xf32, #tpu.memory_space<vmem>>, vector<1x256xf32>
    %c0_3 = arith.constant 0 : index
    %c0_4 = arith.constant 0 : index
    %12 = vector.load %arg3[%c0_3, %c0_4] : memref<256x256xbf16, #tpu.memory_space<vmem>>, vector<256x256xbf16>
    %cst = arith.constant dense<0.000000e+00> : vector<8x256xf32>
    %13 = tpu.matmul %7, %12, %cst {dimension_numbers = #tpu.dot_dimension_numbers<[1], [0], [0], [1], [0, 0, 1, 1], [], []>} : vector<8x256xbf16>, vector<256x256xbf16>, vector<8x256xf32> -> vector<8x256xf32>
    %14 = vector.broadcast %11 : vector<1x256xf32> to vector<8x256xf32>
    %15 = arith.addf %13, %14 : vector<8x256xf32>
    %c0_5 = arith.constant 0 : index
    %c0_6 = arith.constant 0 : index
    %16 = vector.load %arg4[%c0_5, %c0_6] : memref<256x256xbf16, #tpu.memory_space<vmem>>, vector<256x256xbf16>
    %cst_7 = arith.constant dense<0.000000e+00> : vector<8x256xf32>
    %17 = tpu.matmul %10, %16, %cst_7 {dimension_numbers = #tpu.dot_dimension_numbers<[1], [0], [0], [1], [0, 0, 1, 1], [], []>} : vector<8x256xbf16>, vector<256x256xbf16>, vector<8x256xf32> -> vector<8x256xf32>
    %18 = vector.broadcast %11 : vector<1x256xf32> to vector<8x256xf32>
    %19 = arith.addf %17, %18 : vector<8x256xf32>
    %20 = tpu.concatenate %15, %19 in 1 : vector<8x256xf32>, vector<8x256xf32> -> vector<8x512xf32>
    %21 = arith.truncf %20 : vector<8x512xf32> to vector<8x512xbf16>
    %c0_8 = arith.constant 0 : index
    %c0_9 = arith.constant 0 : index
    %c0_10 = arith.constant 0 : index
    %22 = vector.load %arg6[%c0_8, %c0_9, %c0_10] : memref<1x8x512xbf16, #tpu.memory_space<vmem>>, vector<1x8x512xbf16>
    %23 = vector.shape_cast %22 : vector<1x8x512xbf16> to vector<8x512xbf16>
    %24 = vector.shape_cast %21 : vector<8x512xbf16> to vector<1x8x512xbf16>
    tpu.vector_store %arg6[%c0_8, %c0_9, %c0_10], %24 {strides = array<i32>} : memref<1x8x512xbf16, #tpu.memory_space<vmem>>, vector<1x8x512xbf16>,
    return
  }
  func.func @transform_0(%arg0: i32, %arg1: i32) -> (i32, i32, i32) {
    %c0_i32 = arith.constant 0 : i32
    %c0_i32_0 = arith.constant 0 : i32
    %c0_i32_1 = arith.constant 0 : i32
    return %arg0, %c0_i32, %c0_i32_0 : i32, i32, i32
  }
  func.func @transform_1(%arg0: i32, %arg1: i32) -> (i32, i32) {
    %c0_i32 = arith.constant 0 : i32
    %c0_i32_0 = arith.constant 0 : i32
    %c0_i32_1 = arith.constant 0 : i32
    return %c0_i32, %c0_i32_0 : i32, i32
  }
  func.func @transform_2(%arg0: i32, %arg1: i32) -> (i32, i32) {
    %c0_i32 = arith.constant 0 : i32
    %c0_i32_0 = arith.constant 0 : i32
    %c0_i32_1 = arith.constant 0 : i32
    return %c0_i32, %c0_i32_0 : i32, i32
  }
  func.func @transform_3(%arg0: i32, %arg1: i32) -> (i32, i32) {
    %c0_i32 = arith.constant 0 : i32
    %c0_i32_0 = arith.constant 0 : i32
    %c0_i32_1 = arith.constant 0 : i32
    return %c0_i32, %c0_i32_0 : i32, i32
  }
  func.func @transform_4(%arg0: i32, %arg1: i32) -> (i32, i32, i32) {
    %c0_i32 = arith.constant 0 : i32
    %c0_i32_0 = arith.constant 0 : i32
    return %arg0, %arg1, %c0_i32 : i32, i32, i32
  }
}

module attributes {stable_mosaic.version = 11 : i64} {
  func.func @_upsample_kernel(%arg0: i32, %arg1: i32, %arg2: memref<1x10x128xbf16, #tpu.memory_space<vmem>>, %arg3: memref<256x128xbf16, #tpu.memory_space<vmem>>, %arg4: memref<256x128xbf16, #tpu.memory_space<vmem>>, %arg5: memref<1x128xf32, #tpu.memory_space<vmem>>, %arg6: memref<1x8x256xbf16, #tpu.memory_space<vmem>>) attributes {dimension_semantics = [#tpu.dimension_semantics<parallel>, #tpu.dimension_semantics<parallel>], iteration_bounds = array<i64: 2, 1>, scalar_prefetch = 0 : i64, scratch_operands = 0 : i64, tpu.core_type = #tpu.core_type<tc>, window_params = [{transform_indices = @transform_0, window_bounds = array<i64: 1, 10, 128>}, {pipeline_mode = #tpu.pipeline_mode<synchronous>, transform_indices = @transform_1, window_bounds = array<i64: 256, 128>}, {pipeline_mode = #tpu.pipeline_mode<synchronous>, transform_indices = @transform_2, window_bounds = array<i64: 256, 128>}, {pipeline_mode = #tpu.pipeline_mode<synchronous>, transform_indices = @transform_3, window_bounds = array<i64: 1, 128>}, {transform_indices = @transform_4, window_bounds = array<i64: 1, 8, 256>}]} {
    %c8_i32 = arith.constant 8 : i32
    %0 = arith.muli %arg1, %c8_i32 : i32
    %1 = tpu.assume_multiple %0, 8 : i32
    %c0 = arith.constant 0 : index
    %2 = arith.index_cast %1 : i32 to index
    %c0_0 = arith.constant 0 : index
    %3 = vector.load %arg2[%c0, %2, %c0_0] : memref<1x10x128xbf16, #tpu.memory_space<vmem>>, vector<1x10x128xbf16>
    %4 = vector.shape_cast %3 : vector<1x10x128xbf16> to vector<10x128xbf16>
    %cst = arith.constant 0.000000e+00 : bf16
    %5 = vector.broadcast %cst : bf16 to vector<10x128xbf16>
    %6 = arith.maximumf %4, %5 : vector<10x128xbf16>
    %7 = vector.extract_strided_slice %6 {offsets = [0, 0], sizes = [8, 128], strides = [1, 1]} : vector<10x128xbf16> to vector<8x128xbf16>
    %8 = vector.extract_strided_slice %6 {offsets = [1, 0], sizes = [8, 128], strides = [1, 1]} : vector<10x128xbf16> to vector<8x128xbf16>
    %9 = tpu.concatenate %7, %8 in 1 : vector<8x128xbf16>, vector<8x128xbf16> -> vector<8x256xbf16>
    %10 = vector.extract_strided_slice %6 {offsets = [1, 0], sizes = [8, 128], strides = [1, 1]} : vector<10x128xbf16> to vector<8x128xbf16>
    %11 = vector.extract_strided_slice %6 {offsets = [2, 0], sizes = [8, 128], strides = [1, 1]} : vector<10x128xbf16> to vector<8x128xbf16>
    %12 = tpu.concatenate %10, %11 in 1 : vector<8x128xbf16>, vector<8x128xbf16> -> vector<8x256xbf16>
    %c0_1 = arith.constant 0 : index
    %c0_2 = arith.constant 0 : index
    %13 = vector.load %arg5[%c0_1, %c0_2] : memref<1x128xf32, #tpu.memory_space<vmem>>, vector<1x128xf32>
    %c0_3 = arith.constant 0 : index
    %c0_4 = arith.constant 0 : index
    %14 = vector.load %arg3[%c0_3, %c0_4] : memref<256x128xbf16, #tpu.memory_space<vmem>>, vector<256x128xbf16>
    %cst_5 = arith.constant dense<0.000000e+00> : vector<8x128xf32>
    %15 = tpu.matmul %9, %14, %cst_5 {dimension_numbers = #tpu.dot_dimension_numbers<[1], [0], [0], [1], [0, 0, 1, 1], [], []>} : vector<8x256xbf16>, vector<256x128xbf16>, vector<8x128xf32> -> vector<8x128xf32>
    %16 = vector.broadcast %13 : vector<1x128xf32> to vector<8x128xf32>
    %17 = arith.addf %15, %16 : vector<8x128xf32>
    %c0_6 = arith.constant 0 : index
    %c0_7 = arith.constant 0 : index
    %18 = vector.load %arg4[%c0_6, %c0_7] : memref<256x128xbf16, #tpu.memory_space<vmem>>, vector<256x128xbf16>
    %cst_8 = arith.constant dense<0.000000e+00> : vector<8x128xf32>
    %19 = tpu.matmul %12, %18, %cst_8 {dimension_numbers = #tpu.dot_dimension_numbers<[1], [0], [0], [1], [0, 0, 1, 1], [], []>} : vector<8x256xbf16>, vector<256x128xbf16>, vector<8x128xf32> -> vector<8x128xf32>
    %20 = vector.broadcast %13 : vector<1x128xf32> to vector<8x128xf32>
    %21 = arith.addf %19, %20 : vector<8x128xf32>
    %cst_9 = arith.constant 0.000000e+00 : f32
    %22 = vector.broadcast %cst_9 : f32 to vector<8x128xf32>
    %23 = arith.maximumf %17, %22 : vector<8x128xf32>
    %cst_10 = arith.constant 0.000000e+00 : f32
    %24 = vector.broadcast %cst_10 : f32 to vector<8x128xf32>
    %25 = arith.maximumf %21, %24 : vector<8x128xf32>
    %26 = tpu.concatenate %23, %25 in 1 : vector<8x128xf32>, vector<8x128xf32> -> vector<8x256xf32>
    %27 = arith.truncf %26 : vector<8x256xf32> to vector<8x256xbf16>
    %c0_11 = arith.constant 0 : index
    %c0_12 = arith.constant 0 : index
    %c0_13 = arith.constant 0 : index
    %28 = vector.load %arg6[%c0_11, %c0_12, %c0_13] : memref<1x8x256xbf16, #tpu.memory_space<vmem>>, vector<1x8x256xbf16>
    %29 = vector.shape_cast %28 : vector<1x8x256xbf16> to vector<8x256xbf16>
    %30 = vector.shape_cast %27 : vector<8x256xbf16> to vector<1x8x256xbf16>
    tpu.vector_store %arg6[%c0_11, %c0_12, %c0_13], %30 {strides = array<i32>} : memref<1x8x256xbf16, #tpu.memory_space<vmem>>, vector<1x8x256xbf16>,
    return
  }
  func.func @transform_0(%arg0: i32, %arg1: i32) -> (i32, i32, i32) {
    %c0_i32 = arith.constant 0 : i32
    %c0_i32_0 = arith.constant 0 : i32
    %c0_i32_1 = arith.constant 0 : i32
    return %arg0, %c0_i32, %c0_i32_0 : i32, i32, i32
  }
  func.func @transform_1(%arg0: i32, %arg1: i32) -> (i32, i32) {
    %c0_i32 = arith.constant 0 : i32
    %c0_i32_0 = arith.constant 0 : i32
    %c0_i32_1 = arith.constant 0 : i32
    return %c0_i32, %c0_i32_0 : i32, i32
  }
  func.func @transform_2(%arg0: i32, %arg1: i32) -> (i32, i32) {
    %c0_i32 = arith.constant 0 : i32
    %c0_i32_0 = arith.constant 0 : i32
    %c0_i32_1 = arith.constant 0 : i32
    return %c0_i32, %c0_i32_0 : i32, i32
  }
  func.func @transform_3(%arg0: i32, %arg1: i32) -> (i32, i32) {
    %c0_i32 = arith.constant 0 : i32
    %c0_i32_0 = arith.constant 0 : i32
    %c0_i32_1 = arith.constant 0 : i32
    return %c0_i32, %c0_i32_0 : i32, i32
  }
  func.func @transform_4(%arg0: i32, %arg1: i32) -> (i32, i32, i32) {
    %c0_i32 = arith.constant 0 : i32
    %c0_i32_0 = arith.constant 0 : i32
    return %arg0, %arg1, %c0_i32 : i32, i32, i32
  }
}

</mosaic_0001>

<bundles_post_ra>
// kernel: vqvae_forward.8
= control target key start
LH: loop header
LB: loop body
LE: loop exit
PB: predicated region body
PF: predicated region fallthrough
CT: control target
= control target key end

     0   :  { %s930_s12 = smov 0   ;;  %s932_s13 = smov 0   ;;  %s1070_s0 = inlined_call_operand.vmem [shape: bf16[2,9,256], index: 0, kind: input, shape index: {}]   ;;  %s1071_s1 = inlined_call_operand.vmem [shape: bf16[512,128], index: 1, kind: input, shape index: {}]   ;;  %s1072_s2 = inlined_call_operand.vmem [shape: f32[1,128], index: 2, kind: input, shape index: {}]   ;;  %s1073_s3 = inlined_call_operand.vmem [shape: bf16[2,8,128], index: 3, kind: output, shape index: {}]  }
   0x1   :  { %s934_s14 = smov 0  }
   0x2 LB: > { %s32_s15 = sadd.s32 1, %s904_s13  ;;  %p738_p0 = scmp.ge.s32.totalorder %s908_s14, 1  ;;  %s908_s14 = sphi %s934_s14, %s13_s14   ;;  %s904_s13 = sphi %s932_s13, %s1075_s13   ;;  %s900_s12 = sphi %s930_s12, %s1074_s12  }
   0x3   : > { %p34_p1 = scmp.ge.s32.totalorder %s32_s15, 2  ;;  %p177_p2 = scmp.lt.s32.totalorder %s908_s14, 3 }
   0x5   : > { %s1077_s15 = smov (%p34_p1, %s32_s15), 0  ;;  %p178_p3 = pnand %p738_p0, %p177_p2 }
   0x6   : > { %p213_p4 = scmp.lt.s32.totalorder (!%p178_p3), %s900_s12, 1 }
   0x7   : > { %181 = sbr.rel (%p178_p3) target bundleno = 252 (0xfc), region = 32 }
   0xc   : > { %v850_v0 = vld [vmem:[%s1071_s1 + $0x78] sm:$0xff]   ;;  %v854_v4 = vld [vmem:[%s1071_s1 + $0x70] sm:$0xff]   ;;  %v858_v8 = vld [vmem:[%s1071_s1 + $0x68] sm:$0xff]   ;;  %s1079_s12 = smov (!%p213_p4, %s900_s12), 1 }
   0xd   : > { %v851_v1 = vld [vmem:[%s1071_s1 + $0xf8] sm:$0xff]   ;;  %782 = vmatprep.subr.bf16.mxu0 %v850_v0  ;;  %v855_v5 = vld [vmem:[%s1071_s1 + $0xf0] sm:$0xff]   ;;  %v859_v9 = vld [vmem:[%s1071_s1 + $0xe8] sm:$0xff]   ;;  %s781_s24 = sshll.u32 %s1079_s12, 4  ;;  %s741_s17 = sshll.u32 %s1079_s12, 2 }
   0xe   : > { %v852_v2 = vld [vmem:[%s1071_s1 + $0x38] sm:$0xff]   ;;  %804 = vmatprep.subr.bf16.mxu1 %v851_v1  ;;  %v856_v6 = vld [vmem:[%s1071_s1 + $0x30] sm:$0xff]   ;;  %v860_v10 = vld [vmem:[%s1071_s1 + $0x28] sm:$0xff]   ;;  %s217_s6 = scalar_lea.vmem %s1070_s0, %s781_s24  ;;  %s234_s20 = scalar_lea.vmem %s1073_s3, %s741_s17 }
   0xf   : > { %v853_v3 = vld [vmem:[%s1071_s1 + $0xb8] sm:$0xff]   ;;  %783 = vmatpush3.bf16.msra.mxu0 %v852_v2  ;;  %v857_v7 = vld [vmem:[%s1071_s1 + $0xb0] sm:$0xff]   ;;  %v861_v11 = vld [vmem:[%s1071_s1 + $0xa8] sm:$0xff]  }
  0x10   : > { %805 = vmatpush3.bf16.msra.mxu1 %v853_v3  ;;  %784 = vmatprep.subr.bf16.mxu0 %v854_v4  ;;  %v862_v12 = vld [vmem:[%s1071_s1 + $0x60] sm:$0xff]   ;;  %v866_v16 = vld [vmem:[%s1071_s1 + $0x58] sm:$0xff]   ;;  %v870_v20 = vld [vmem:[%s1071_s1 + $0x50] sm:$0xff]  }
  0x11   : > { %806 = vmatprep.subr.bf16.mxu1 %v855_v5  ;;  %v863_v13 = vld [vmem:[%s1071_s1 + $0xe0] sm:$0xff]   ;;  %v867_v17 = vld [vmem:[%s1071_s1 + $0xd8] sm:$0xff]   ;;  %v871_v21 = vld [vmem:[%s1071_s1 + $0xd0] sm:$0xff]  }
  0x12   : > { %v864_v14 = vld [vmem:[%s1071_s1 + $0x20] sm:$0xff]   ;;  %v868_v18 = vld [vmem:[%s1071_s1 + $0x18] sm:$0xff]   ;;  %v872_v22 = vld [vmem:[%s1071_s1 + $0x10] sm:$0xff]  }
  0x13   : > { %785 = vmatpush3.bf16.msra.mxu0 %v856_v6  ;;  %v865_v15 = vld [vmem:[%s1071_s1 + $0xa0] sm:$0xff]   ;;  %v869_v19 = vld [vmem:[%s1071_s1 + $0x98] sm:$0xff]   ;;  %v873_v23 = vld [vmem:[%s1071_s1 + $0x90] sm:$0xff]  }
  0x14   : > { %807 = vmatpush3.bf16.msra.mxu1 %v857_v7  ;;  %786 = vmatprep.subr.bf16.mxu0 %v858_v8  ;;  %v874_v24 = vld [vmem:[%s1071_s1 + $0x48] sm:$0xff]   ;;  %v878_v28 = vld [vmem:[%s1071_s1 + $0x40] sm:$0xff]  }
  0x15   : > { %808 = vmatprep.subr.bf16.mxu1 %v859_v9  ;;  %v875_v25 = vld [vmem:[%s1071_s1 + $0xc8] sm:$0xff]   ;;  %v879_v29 = vld [vmem:[%s1071_s1 + $0xc0] sm:$0xff]  }
  0x16   : > { %v876_v26 = vld [vmem:[%s1071_s1 + $0x8] sm:$0xff]   ;;  %v880_v30 = vld [vmem:[%s1071_s1] sm:$0xff]  }
  0x17   : > { %787 = vmatpush3.bf16.msra.mxu0 %v860_v10  ;;  %v877_v27 = vld [vmem:[%s1071_s1 + $0x88] sm:$0xff]   ;;  %v881_v31 = vld [vmem:[%s1071_s1 + $0x80] sm:$0xff]  }
  0x18   : > { %809 = vmatpush3.bf16.msra.mxu1 %v861_v11  ;;  %788 = vmatprep.subr.bf16.mxu0 %v862_v12  ;;  %v242_v32 = vld [vmem:[%s217_s6] sm:$0xff]  ;;  %v243_v33 = vld [vmem:[%s217_s6 + $0x8] sm:$0x11] }
  0x19   : > { %810 = vmatprep.subr.bf16.mxu1 %v863_v13  ;;  %v743_v34 = vcombine.high %v242_v32, %v242_v32  ;;  %v744_v35 = vcombine.low %v242_v32, %v243_v33  ;;  %v745_v36 = vcombine.high %v242_v32, %v243_v33  ;;  %v742_v37 = vcombine.low %v242_v32, %v242_v32  ;;  %v746_v49 = vld [vmem:[%s1072_s2] ss:$0 sm:$0xff] }
  0x1b   : > { %789 = vmatpush3.bf16.msra.mxu0 %v864_v14  ;;  %567 = vmatprep.mubr.bf16.mxu0 %v743_v34  ;;  %v264_v38 = vshrl.u32 %v745_v36, 16  ;;  %v266_v39 = vshll.u32 %v745_v36, 16  ;;  %v257_v40 = vshrl.u32 %v744_v35, 16  ;;  %v259_v41 = vshll.u32 %v744_v35, 16 }
  0x1c   : > { %811 = vmatpush3.bf16.msra.mxu1 %v865_v15  ;;  %790 = vmatprep.subr.bf16.mxu0 %v866_v16 }
  0x1d   : > { %812 = vmatprep.subr.bf16.mxu1 %v867_v17  ;;  %v268_v42 = vrot.slane %v266_v39, 1  ;;  %v261_v43 = vrot.slane %v259_v41, 1 }
  0x1f   : > { %791 = vmatpush3.bf16.msra.mxu0 %v868_v18  ;;  %v269_v44 = vor.u32 %v268_v42, %v264_v38  ;;  %v262_v45 = vor.u32 %v261_v43, %v257_v40 }
  0x20   : > { %813 = vmatpush3.bf16.msra.mxu1 %v869_v19  ;;  %792 = vmatprep.subr.bf16.mxu0 %v870_v20 }
  0x21   : > { %814 = vmatprep.subr.bf16.mxu1 %v871_v21  ;;  %607 = vmatprep.mubr.bf16.mxu1 %v269_v44 }
  0x23   : > { %793 = vmatpush3.bf16.msra.mxu0 %v872_v22 }
  0x24   : > { %815 = vmatpush3.bf16.msra.mxu1 %v873_v23  ;;  %794 = vmatprep.subr.bf16.mxu0 %v874_v24 }
  0x25   : > { %816 = vmatprep.subr.bf16.mxu1 %v875_v25 }
  0x27   : > { %795 = vmatpush3.bf16.msra.mxu0 %v876_v26 }
  0x28   : > { %817 = vmatpush3.bf16.msra.mxu1 %v877_v27  ;;  %796 = vmatprep.subr.bf16.mxu0 %v878_v28 }
  0x29   : > { %818 = vmatprep.subr.bf16.mxu1 %v879_v29 }
  0x2b   : > { %797 = vmatpush3.bf16.msra.mxu0 %v880_v30 }
  0x2c   : > { %819 = vmatpush3.bf16.msra.mxu1 %v881_v31 }
  0x2e   : > { %568 = vmatmul.mubr.bf16.vlgmr.msra.gmra.mxu0 %v742_v37 }
  0x2f   : > { %608 = vmatmul.mubr.bf16.vlgmr.msra.gmra.mxu1 %v262_v45 }
  0xee   : > { %v798_v46 = vpop.f32.mrf.mxu0 }
  0xef   : > { %v820_v51 = vpop.f32.mrf.mxu1 }
  0xf0   : > { %v799_v47 = vpop.f32.mrf.mxu0 }
  0xf1   : > { %v800_v48 = vadd.f32 %v799_v47, %v798_v46  ;;  %v821_v54 = vpop.f32.mrf.mxu1 }
  0xf2   : > { %v801_v50 = vpop.f32.mrf.mxu0  ;;  %v822_v55 = vadd.f32 %v821_v54, %v820_v51 }
  0xf3   : > { %v570_v53 = vadd.f32 %v800_v48, %v746_v49  ;;  %v823_v56 = vpop.f32.mrf.mxu1 }
  0xf4   : > { %v802_v52 = vpop.f32.mrf.mxu0 }
  0xf5   : > { %v610_v57 = vadd.f32 %v822_v55, %v570_v53  ;;  %v824_v58 = vpop.f32.mrf.mxu1 }
  0xf7   : > { %v615_v59 = vmax.f32 %v610_v57, 0.0 }
  0xf9   : > { %v616_v60 = vpack.c.bf16 %v615_v59, %v615_v59 }
  0xfb   : > { %617 = vst [vmem:[%s234_s20] sm:$0xf] %v616_v60 }
  0xfc PF: > { %s13_s14 = sadd.s32 1, %s908_s14   ;;  %s1074_s12 = smov %s904_s13 }
  0xfd   : > { %p10_p5 = scmp.ge.s32.totalorder %s13_s14, 4   ;;  %s1075_s13 = smov %s1077_s15 }
  0xff   :  { %12 = sbr.rel (!%p10_p5) target bundleno = 2 (0x2), region = 69 }

// kernel: vqvae_forward.7
= control target key start
LH: loop header
LB: loop body
LE: loop exit
PB: predicated region body
PF: predicated region fallthrough
CT: control target
= control target key end

     0   :  { %8 = vsyncpa [#allocation3], 0  ;;  %s1463_s12 = smov 0   ;;  %s1465_s13 = smov 0   ;;  %s1529_s0 = inlined_call_operand.vmem [shape: bf16[2,9,512], index: 0, kind: input, shape index: {}]   ;;  %s1530_s1 = inlined_call_operand.hbm [shape: bf16[1024,128], index: 1, kind: input, shape index: {}]   ;;  %s1531_s2 = inlined_call_operand.vmem [shape: f32[1,128], index: 2, kind: input, shape index: {}]   ;;  %s1532_s3 = inlined_call_operand.vmem [shape: bf16[2,8,128], index: 3, kind: output, shape index: {}]  }
   0x1   :  { %s1467_s14 = smov 0  }
   0x2 LB: > { %s1102_s15 = sadd.s32 4294967295, %s1438_s14   ;;  %s33_s16 = sadd.s32 1, %s1434_s13  ;;  %s1438_s14 = sphi %s1467_s14, %s14_s14   ;;  %s1434_s13 = sphi %s1465_s13, %s1536_s13   ;;  %s1430_s12 = sphi %s1463_s12, %s1535_s12  }
   0x3   : > { %p35_p0 = scmp.ge.s32.totalorder %s33_s16, 2  ;;  %p1104_p1 = scmp.ge.s32.totalorder %s1438_s14, 1 }
   0x4   : > { %p146_p2 = scmp.lt.s32.totalorder %s1438_s14, 3  ;;  %p1488_p4 = scmp.eq.s32.totalorder %s1102_s15, 0 }
   0x5   : > { %s1538_s16 = smov (%p35_p0, %s33_s16), 0  ;;  %s1440_s19 = smov [#allocation2]  }
   0x6   : > { %p1484_p3 = pnand %p1104_p1, %p146_p2  ;;  %s160_s20 = sshll.u32 %s1440_s19, 4  ;;  %s161_s20 = int_to_ptr.vmem [resolvable:$true] %s160_s20 }
   0x7   : > { %s1397_s21 = scalar_lea.vmem %s161_s20, 8192  ;;  %p1405_p11 = scmp.lt.s32.totalorder %s161_s20, %s161_s20 }
   0x8   : > { %p1281_p5 = pneg %p1484_p3  ;;  %p1398_p8 = scmp.ne.s32.totalorder %s161_s20, %s1397_s21 }
   0x9   : > { %p1406_p12 = scmp.lt.s32.totalorder %s1397_s21, %s1397_s21 }
   0xa   : > { %p1282_p6 = pnand %p1488_p4, %p1281_p5 }
   0xb   : > { %p1407_p13 = por %p1406_p12, %p1405_p11 }
   0xc   : > { %p1388_p7 = pneg %p1282_p6 }
   0xe   : > { %p1400_p9 = pnand %p1398_p8, %p1388_p7 }
  0x10   : > { %p1401_p10 = pneg %p1400_p9 }
  0x12   : > { %p1408_p0 = pnand %p1407_p13, %p1401_p10 }
  0x14   : > { %1411 = shalt.err (!%p1408_p0)
}
  0x15   : > { %s1441_s22 = smov 64   ;;  %s1442_s23 = smov 4  }
  0x16   : > { %1284 = dma.hbm_to_vmem [thread:$0]  (!%p1282_p6), %s1530_s1, 8192, %s161_s20, [#allocation3], %s1441_s22, %s1441_s22, %s1442_s23  }
  0x17   : > { %190 = sbr.rel (%p1484_p3) target bundleno = 301 (0x12d), region = 32 }
  0x1c   : > { %1425 = dma.done.wait (%p1488_p4), [#allocation3], 8192  }
  0x1d   : > { %1427 = vsyncadd (%p1488_p4), [#allocation3], 4294959104  ;;  %v1314_v0 = vld [vmem:[#allocation2 + $0x78] sm:$0xff]   ;;  %v1318_v4 = vld [vmem:[#allocation2 + $0x70] sm:$0xff]   ;;  %p222_p1 = scmp.lt.s32.totalorder %s1430_s12, 1 }
  0x1e   : > { %v1315_v1 = vld [vmem:[#allocation2 + $0xf8] sm:$0xff]   ;;  %1189 = vmatprep.subr.bf16.mxu0 %v1314_v0  ;;  %v1319_v5 = vld [vmem:[#allocation2 + $0xf0] sm:$0xff]   ;;  %v1322_v8 = vld [vmem:[#allocation2 + $0x68] sm:$0xff]  }
  0x1f   : > { %v1316_v2 = vld [vmem:[#allocation2 + $0x38] sm:$0xff]   ;;  %1211 = vmatprep.subr.bf16.mxu1 %v1315_v1  ;;  %v1320_v6 = vld [vmem:[#allocation2 + $0x30] sm:$0xff]   ;;  %v1323_v9 = vld [vmem:[#allocation2 + $0xe8] sm:$0xff]   ;;  %s1540_s12 = smov (!%p222_p1, %s1430_s12), 1 }
  0x20   : > { %v1317_v3 = vld [vmem:[#allocation2 + $0xb8] sm:$0xff]   ;;  %1190 = vmatpush3.bf16.msra.mxu0 %v1316_v2  ;;  %v1321_v7 = vld [vmem:[#allocation2 + $0xb0] sm:$0xff]   ;;  %v1324_v10 = vld [vmem:[#allocation2 + $0x28] sm:$0xff]   ;;  %s1188_s26 = sshll.u32 %s1540_s12, 5  ;;  %s1112_s5 = sshll.u32 %s1540_s12, 2 }
  0x21   : > { %1212 = vmatpush3.bf16.msra.mxu1 %v1317_v3  ;;  %1191 = vmatprep.subr.bf16.mxu0 %v1318_v4  ;;  %v1325_v11 = vld [vmem:[#allocation2 + $0xa8] sm:$0xff]   ;;  %v1326_v12 = vld [vmem:[#allocation2 + $0x60] sm:$0xff]   ;;  %v1330_v16 = vld [vmem:[#allocation2 + $0x58] sm:$0xff]   ;;  %s226_s29 = scalar_lea.vmem %s1529_s0, %s1188_s26  ;;  %s239_s8 = scalar_lea.vmem %s1532_s3, %s1112_s5 }
  0x22   : > { %1213 = vmatprep.subr.bf16.mxu1 %v1319_v5  ;;  %v1327_v13 = vld [vmem:[#allocation2 + $0xe0] sm:$0xff]   ;;  %v1331_v17 = vld [vmem:[#allocation2 + $0xd8] sm:$0xff]   ;;  %v1334_v20 = vld [vmem:[#allocation2 + $0x50] sm:$0xff]  }
  0x23   : > { %v1328_v14 = vld [vmem:[#allocation2 + $0x20] sm:$0xff]   ;;  %v1332_v18 = vld [vmem:[#allocation2 + $0x18] sm:$0xff]   ;;  %v1335_v21 = vld [vmem:[#allocation2 + $0xd0] sm:$0xff]  }
  0x24   : > { %1192 = vmatpush3.bf16.msra.mxu0 %v1320_v6  ;;  %v1329_v15 = vld [vmem:[#allocation2 + $0xa0] sm:$0xff]   ;;  %v1333_v19 = vld [vmem:[#allocation2 + $0x98] sm:$0xff]   ;;  %v1336_v22 = vld [vmem:[#allocation2 + $0x10] sm:$0xff]  }
  0x25   : > { %1214 = vmatpush3.bf16.msra.mxu1 %v1321_v7  ;;  %1193 = vmatprep.subr.bf16.mxu0 %v1322_v8  ;;  %v1337_v23 = vld [vmem:[#allocation2 + $0x90] sm:$0xff]   ;;  %v1338_v24 = vld [vmem:[#allocation2 + $0x48] sm:$0xff]   ;;  %v1342_v28 = vld [vmem:[#allocation2 + $0x40] sm:$0xff]  }
  0x26   : > { %1215 = vmatprep.subr.bf16.mxu1 %v1323_v9  ;;  %v1339_v25 = vld [vmem:[#allocation2 + $0xc8] sm:$0xff]   ;;  %v1343_v29 = vld [vmem:[#allocation2 + $0xc0] sm:$0xff]   ;;  %v249_v33 = vld [vmem:[%s226_s29 + $0x10] sm:$0x11] }
  0x27   : > { %v1340_v26 = vld [vmem:[#allocation2 + $0x8] sm:$0xff]   ;;  %v1344_v30 = vld [vmem:[#allocation2] sm:$0xff]   ;;  %v250_v36 = vld [vmem:[%s226_s29 + $0x18] sm:$0x11] }
  0x28   : > { %1194 = vmatpush3.bf16.msra.mxu0 %v1324_v10  ;;  %v1341_v27 = vld [vmem:[#allocation2 + $0x88] sm:$0xff]   ;;  %v1345_v31 = vld [vmem:[#allocation2 + $0x80] sm:$0xff]   ;;  %v1352_v40 = vld [vmem:[#allocation2 + $0x178] sm:$0xff]  }
  0x29   : > { %1216 = vmatpush3.bf16.msra.mxu1 %v1325_v11  ;;  %1195 = vmatprep.subr.bf16.mxu0 %v1326_v12  ;;  %v247_v32 = vld [vmem:[%s226_s29] sm:$0xff]  ;;  %v248_v34 = vld [vmem:[%s226_s29 + $0x8] sm:$0xff]  ;;  %v1353_v42 = vld [vmem:[#allocation2 + $0x1f8] sm:$0xff]  }
  0x2a   : > { %1217 = vmatprep.subr.bf16.mxu1 %v1327_v13  ;;  %v1114_v35 = vcombine.high %v247_v32, %v247_v32  ;;  %v1116_v37 = vcombine.high %v248_v34, %v248_v34  ;;  %v1113_v38 = vcombine.low %v247_v32, %v247_v32  ;;  %v1115_v39 = vcombine.low %v248_v34, %v248_v34  ;;  %v1354_v43 = vld [vmem:[#allocation2 + $0x138] sm:$0xff]   ;;  %v1356_v48 = vld [vmem:[#allocation2 + $0x170] sm:$0xff]   ;;  %v1360_v56 = vld [vmem:[#allocation2 + $0x168] sm:$0xff]  }
  0x2b   : > { %v1118_v41 = vcombine.high %v247_v32, %v249_v33  ;;  %v1120_v45 = vcombine.high %v248_v34, %v250_v36  ;;  %v1355_v46 = vld [vmem:[#allocation2 + $0x1b8] sm:$0xff]   ;;  %v1357_v50 = vld [vmem:[#allocation2 + $0x1f0] sm:$0xff]   ;;  %v1361_v58 = vld [vmem:[#allocation2 + $0x1e8] sm:$0xff]   ;;  %v1117_v4 = vcombine.low %v247_v32, %v249_v33  ;;  %v1119_v7 = vcombine.low %v248_v34, %v250_v36 }
  0x2c   : > { %1196 = vmatpush3.bf16.msra.mxu0 %v1328_v14  ;;  %858 = vmatprep.mubr.bf16.mxu0 %v1114_v35  ;;  %v1358_v52 = vld [vmem:[#allocation2 + $0x130] sm:$0xff]   ;;  %v1362_v59 = vld [vmem:[#allocation2 + $0x128] sm:$0xff]   ;;  %v1364_v62 = vld [vmem:[#allocation2 + $0x160] sm:$0xff]  }
  0x2d   : > { %1218 = vmatpush3.bf16.msra.mxu1 %v1329_v15  ;;  %1197 = vmatprep.subr.bf16.mxu0 %v1330_v16  ;;  %v283_v44 = vshrl.u32 %v1118_v41, 16  ;;  %v285_v47 = vshll.u32 %v1118_v41, 16  ;;  %v297_v49 = vshrl.u32 %v1120_v45, 16  ;;  %v299_v53 = vshll.u32 %v1120_v45, 16  ;;  %v1359_v54 = vld [vmem:[#allocation2 + $0x1b0] sm:$0xff]   ;;  %v1363_v61 = vld [vmem:[#allocation2 + $0x1a8] sm:$0xff]  }
  0x2e   : > { %1219 = vmatprep.subr.bf16.mxu1 %v1331_v17  ;;  %898 = vmatprep.mubr.bf16.mxu1 %v1116_v37  ;;  %v1365_v63 = vld [vmem:[#allocation2 + $0x1e0] sm:$0xff]   ;;  %v1368_v2 = vld [vmem:[#allocation2 + $0x158] sm:$0xff]   ;;  %v1372_v8 = vld [vmem:[#allocation2 + $0x150] sm:$0xff]   ;;  %v278_v11 = vshll.u32 %v1117_v4, 16  ;;  %v292_v14 = vshll.u32 %v1119_v7, 16  ;;  %v276_v16 = vshrl.u32 %v1117_v4, 16 }
  0x2f   : > { %v287_v51 = vrot.slane %v285_v47, 1  ;;  %v301_v57 = vrot.slane %v299_v53, 1  ;;  %v1366_v0 = vld [vmem:[#allocation2 + $0x120] sm:$0xff]   ;;  %v1369_v3 = vld [vmem:[#allocation2 + $0x1d8] sm:$0xff]   ;;  %v1373_v9 = vld [vmem:[#allocation2 + $0x1d0] sm:$0xff]  }
  0x30   : > { %1198 = vmatpush3.bf16.msra.mxu0 %v1332_v18  ;;  %v1367_v1 = vld [vmem:[#allocation2 + $0x1a0] sm:$0xff]   ;;  %v1370_v5 = vld [vmem:[#allocation2 + $0x118] sm:$0xff]   ;;  %v1374_v10 = vld [vmem:[#allocation2 + $0x110] sm:$0xff]   ;;  %v280_v18 = vrot.slane %v278_v11, 1 }
  0x31   : > { %1220 = vmatpush3.bf16.msra.mxu1 %v1333_v19  ;;  %1199 = vmatprep.subr.bf16.mxu0 %v1334_v20  ;;  %v288_v55 = vor.u32 %v287_v51, %v283_v44  ;;  %v302_v60 = vor.u32 %v301_v57, %v297_v49  ;;  %v1371_v6 = vld [vmem:[#allocation2 + $0x198] sm:$0xff]   ;;  %v1375_v12 = vld [vmem:[#allocation2 + $0x190] sm:$0xff]   ;;  %v1376_v13 = vld [vmem:[#allocation2 + $0x148] sm:$0xff]   ;;  %v290_v20 = vshrl.u32 %v1119_v7, 16 }
  0x32   : > { %1221 = vmatprep.subr.bf16.mxu1 %v1335_v21  ;;  %v1377_v15 = vld [vmem:[#allocation2 + $0x1c8] sm:$0xff]   ;;  %v1380_v21 = vld [vmem:[#allocation2 + $0x140] sm:$0xff]  }
  0x33   : > { %v1378_v17 = vld [vmem:[#allocation2 + $0x108] sm:$0xff]   ;;  %v1121_v37 = vld [vmem:[%s1531_s2] ss:$0 sm:$0xff] }
  0x34   : > { %1200 = vmatpush3.bf16.msra.mxu0 %v1336_v22  ;;  %v1379_v19 = vld [vmem:[#allocation2 + $0x188] sm:$0xff]   ;;  %v294_v22 = vrot.slane %v292_v14, 1 }
  0x35   : > { %1222 = vmatpush3.bf16.msra.mxu1 %v1337_v23  ;;  %1201 = vmatprep.subr.bf16.mxu0 %v1338_v24  ;;  %v1381_v23 = vld [vmem:[#allocation2 + $0x1c0] sm:$0xff]  }
  0x36   : > { %1223 = vmatprep.subr.bf16.mxu1 %v1339_v25  ;;  %v1382_v24 = vld [vmem:[#allocation2 + $0x100] sm:$0xff]  }
  0x37   : > { %v1383_v25 = vld [vmem:[#allocation2 + $0x180] sm:$0xff]  }
  0x38   : > { %1202 = vmatpush3.bf16.msra.mxu0 %v1340_v26  ;;  %v281_v26 = vor.u32 %v280_v18, %v276_v16 }
  0x39   : > { %1224 = vmatpush3.bf16.msra.mxu1 %v1341_v27  ;;  %1203 = vmatprep.subr.bf16.mxu0 %v1342_v28  ;;  %v295_v27 = vor.u32 %v294_v22, %v290_v20 }
  0x3a   : > { %1225 = vmatprep.subr.bf16.mxu1 %v1343_v29 }
  0x3c   : > { %1204 = vmatpush3.bf16.msra.mxu0 %v1344_v30 }
  0x3d   : > { %1226 = vmatpush3.bf16.msra.mxu1 %v1345_v31  ;;  %1233 = vmatprep.subr.bf16.mxu0 %v1352_v40 }
  0x3e   : > { %1255 = vmatprep.subr.bf16.mxu1 %v1353_v42 }
  0x3f   : > { %859 = vmatmul.mubr.bf16.vlgmr.msra.gmra.mxu0 %v1113_v38 }
  0x40   : > { %899 = vmatmul.mubr.bf16.vlgmr.msra.gmra.mxu1 %v1115_v39  ;;  %1234 = vmatpush3.bf16.msra.mxu0 %v1354_v43 }
  0x41   : > { %1256 = vmatpush3.bf16.msra.mxu1 %v1355_v46  ;;  %1235 = vmatprep.subr.bf16.mxu0 %v1356_v48 }
  0x42   : > { %1257 = vmatprep.subr.bf16.mxu1 %v1357_v50  ;;  %938 = vmatprep.mubr.bf16.mxu0 %v288_v55 }
  0x43   : > { %978 = vmatprep.mubr.bf16.mxu1 %v302_v60 }
  0x44   : > { %1236 = vmatpush3.bf16.msra.mxu0 %v1358_v52 }
  0x45   : > { %1258 = vmatpush3.bf16.msra.mxu1 %v1359_v54  ;;  %1237 = vmatprep.subr.bf16.mxu0 %v1360_v56 }
  0x46   : > { %1259 = vmatprep.subr.bf16.mxu1 %v1361_v58 }
  0x48   : > { %1238 = vmatpush3.bf16.msra.mxu0 %v1362_v59 }
  0x49   : > { %1260 = vmatpush3.bf16.msra.mxu1 %v1363_v61  ;;  %1239 = vmatprep.subr.bf16.mxu0 %v1364_v62 }
  0x4a   : > { %1261 = vmatprep.subr.bf16.mxu1 %v1365_v63 }
  0x4c   : > { %1240 = vmatpush3.bf16.msra.mxu0 %v1366_v0 }
  0x4d   : > { %1262 = vmatpush3.bf16.msra.mxu1 %v1367_v1  ;;  %1241 = vmatprep.subr.bf16.mxu0 %v1368_v2 }
  0x4e   : > { %1263 = vmatprep.subr.bf16.mxu1 %v1369_v3 }
  0x50   : > { %1242 = vmatpush3.bf16.msra.mxu0 %v1370_v5 }
  0x51   : > { %1264 = vmatpush3.bf16.msra.mxu1 %v1371_v6  ;;  %1243 = vmatprep.subr.bf16.mxu0 %v1372_v8 }
  0x52   : > { %1265 = vmatprep.subr.bf16.mxu1 %v1373_v9 }
  0x54   : > { %1244 = vmatpush3.bf16.msra.mxu0 %v1374_v10 }
  0x55   : > { %1266 = vmatpush3.bf16.msra.mxu1 %v1375_v12  ;;  %1245 = vmatprep.subr.bf16.mxu0 %v1376_v13 }
  0x56   : > { %1267 = vmatprep.subr.bf16.mxu1 %v1377_v15 }
  0x58   : > { %1246 = vmatpush3.bf16.msra.mxu0 %v1378_v17 }
  0x59   : > { %1268 = vmatpush3.bf16.msra.mxu1 %v1379_v19  ;;  %1247 = vmatprep.subr.bf16.mxu0 %v1380_v21 }
  0x5a   : > { %1269 = vmatprep.subr.bf16.mxu1 %v1381_v23 }
  0x5c   : > { %1248 = vmatpush3.bf16.msra.mxu0 %v1382_v24 }
  0x5d   : > { %1270 = vmatpush3.bf16.msra.mxu1 %v1383_v25 }
  0x5f   : > { %939 = vmatmul.mubr.bf16.vlgmr.msra.gmra.mxu0 %v281_v26 }
  0x60   : > { %979 = vmatmul.mubr.bf16.vlgmr.msra.gmra.mxu1 %v295_v27 }
  0xff   : > { %v1205_v28 = vpop.f32.mrf.mxu0 }
 0x100   : > { %v1227_v29 = vpop.f32.mrf.mxu1 }
 0x101   : > { %v1206_v30 = vpop.f32.mrf.mxu0 }
 0x102   : > { %v1228_v31 = vpop.f32.mrf.mxu1  ;;  %v1207_v36 = vadd.f32 %v1206_v30, %v1205_v28 }
 0x103   : > { %v1208_v32 = vpop.f32.mrf.mxu0  ;;  %v1229_v39 = vadd.f32 %v1228_v31, %v1227_v29 }
 0x104   : > { %v1230_v33 = vpop.f32.mrf.mxu1  ;;  %v861_v38 = vadd.f32 %v1207_v36, %v1121_v37 }
 0x105   : > { %v1209_v34 = vpop.f32.mrf.mxu0 }
 0x106   : > { %v1231_v35 = vpop.f32.mrf.mxu1  ;;  %v901_v43 = vadd.f32 %v1229_v39, %v861_v38 }
 0x11f   : > { %v1249_v40 = vpop.f32.mrf.mxu0 }
 0x120   : > { %v1271_v41 = vpop.f32.mrf.mxu1 }
 0x121   : > { %v1250_v42 = vpop.f32.mrf.mxu0 }
 0x122   : > { %v1251_v44 = vadd.f32 %v1250_v42, %v1249_v40  ;;  %v1272_v45 = vpop.f32.mrf.mxu1 }
 0x123   : > { %v1252_v46 = vpop.f32.mrf.mxu0  ;;  %v1273_v48 = vadd.f32 %v1272_v45, %v1271_v41 }
 0x124   : > { %v941_v47 = vadd.f32 %v1251_v44, %v901_v43  ;;  %v1274_v49 = vpop.f32.mrf.mxu1 }
 0x125   : > { %v1253_v50 = vpop.f32.mrf.mxu0 }
 0x126   : > { %v981_v51 = vadd.f32 %v1273_v48, %v941_v47  ;;  %v1275_v52 = vpop.f32.mrf.mxu1 }
 0x128   : > { %v986_v53 = vmax.f32 %v981_v51, 0.0 }
 0x12a   : > { %v987_v54 = vpack.c.bf16 %v986_v53, %v986_v53 }
 0x12c   : > { %988 = vst [vmem:[%s239_s8] sm:$0xf] %v987_v54 }
 0x12d PF: > { %s14_s14 = sadd.s32 1, %s1438_s14   ;;  %s1535_s12 = smov %s1434_s13 }
 0x12e   : > { %p11_p2 = scmp.ge.s32.totalorder %s14_s14, 4   ;;  %s1536_s13 = smov %s1538_s16 }
 0x130   :  { %13 = sbr.rel (!%p11_p2) target bundleno = 2 (0x2), region = 72 }
 0x135   :  { %1020 = vsyncpa [#allocation3], 1 }
 0x136   :  { %1022 = vsyncpa [#allocation3 + $0x1], 1 }

// kernel: vqvae_forward.10
= control target key start
LH: loop header
LB: loop body
LE: loop exit
PB: predicated region body
PF: predicated region fallthrough
CT: control target
= control target key end

     0   :  { %v364_v0 = vmov 0.0   ;;  %vm365_vm0 = vmmov 0   ;;  %v139_v12 = vlaneseq  ;;  %vm251_vm4 = vcmask 7168   ;;  %s512_s1 = inlined_call_operand.vmem [shape: bf16[128,128], index: 1, kind: input, shape index: {}]   ;;  %s513_s0 = inlined_call_operand.vmem [shape: f32[8,128], index: 0, kind: input, shape index: {}]   ;;  %s514_s3 = inlined_call_operand.vmem [shape: f32[1,128], index: 3, kind: input, shape index: {}]   ;;  %s515_s2 = inlined_call_operand.vmem [shape: f32[128,128], index: 2, kind: input, shape index: {}]   ;;  %s516_s5 = inlined_call_operand.vmem [shape: s32[8,1], index: 5, kind: output, shape index: {1}]   ;;  %s517_s4 = inlined_call_operand.vmem [shape: f32[8,128], index: 4, kind: output, shape index: {0}]  }
   0x1   :  { %298 = vmatprep.subr.bf16.mxu0 %v364_v0  ;;  %v356_v1 = vld [vmem:[%s512_s1 + $0x38] sm:$0xff]   ;;  %314 = vmatprep.mubr.msk.bf16.mxu0 %vm365_vm0, %v364_v0  ;;  %v357_v2 = vld [vmem:[%s512_s1 + $0x30] sm:$0xff]   ;;  %v20_v3 = vld [vmem:[%s513_s0] sm:$0xff]  ;;  %v366_v53 = vmov 1.0  }
   0x2   :  { %318 = vmatprep.subr.mxu1 %v364_v0  ;;  %350 = vmatprep.mubr.msk.f32.mxu1 %vm365_vm0, %v364_v0  ;;  %v126_v4 = vmul.f32 %v20_v3, %v20_v3  ;;  %v358_v5 = vld [vmem:[%s512_s1 + $0x28] sm:$0xff]   ;;  %v359_v6 = vld [vmem:[%s512_s1 + $0x20] sm:$0xff]   ;;  %v360_v7 = vld [vmem:[%s512_s1 + $0x18] sm:$0xff]   ;;  %v21_v11 = vpack.c.bf16 %v20_v3, %v20_v3  ;;  %v438_v15 = vand.u32 127, %v139_v12 }
   0x3   :  { %299 = vmatpush3.bf16.xpose.msra.mxu0 %v356_v1  ;;  %v361_v8 = vld [vmem:[%s512_s1 + $0x10] sm:$0xff]   ;;  %v362_v9 = vld [vmem:[%s512_s1 + $0x8] sm:$0xff]   ;;  %v363_v10 = vld [vmem:[%s512_s1] sm:$0xff]  }
   0x4   :  { %300 = vmatprep.subr.bf16.mxu0 %v364_v0  ;;  %127 = vadd.xlane.f32.xlu0 %v126_v4  ;;  %v269_v13 = vld [vmem:[%s514_s3] ss:$0 sm:$0xff]  ;;  %vm141_vm1 = vcmp.lt.s32.totalorder %v438_v15, 64  ;;  %v179_v28 = vld [vmem:[%s515_s2 + $0x78] sm:$0xff]  ;;  %v178_v29 = vld [vmem:[%s515_s2 + $0x70] sm:$0xff] }
   0x5   :  { %319 = vmatpush3.msra.mxu1 %v179_v28  ;;  %v177_v30 = vld [vmem:[%s515_s2 + $0x68] sm:$0xff]  ;;  %v176_v31 = vld [vmem:[%s515_s2 + $0x60] sm:$0xff]  ;;  %v175_v32 = vld [vmem:[%s515_s2 + $0x58] sm:$0xff] }
   0x6   :  { %320 = vmatprep.subr.mxu1 %v364_v0  ;;  %v174_v33 = vld [vmem:[%s515_s2 + $0x50] sm:$0xff]  ;;  %v173_v34 = vld [vmem:[%s515_s2 + $0x48] sm:$0xff]  ;;  %v172_v35 = vld [vmem:[%s515_s2 + $0x40] sm:$0xff] }
   0x7   :  { %321 = vmatpush3.msra.mxu1 %v178_v29  ;;  %v171_v36 = vld [vmem:[%s515_s2 + $0x38] sm:$0xff]  ;;  %v170_v37 = vld [vmem:[%s515_s2 + $0x30] sm:$0xff]  ;;  %v169_v38 = vld [vmem:[%s515_s2 + $0x28] sm:$0xff] }
   0x8   :  { %322 = vmatprep.subr.mxu1 %v364_v0  ;;  %v168_v39 = vld [vmem:[%s515_s2 + $0x20] sm:$0xff]  ;;  %v167_v40 = vld [vmem:[%s515_s2 + $0x18] sm:$0xff]  ;;  %v166_v45 = vld [vmem:[%s515_s2 + $0x10] sm:$0xff] }
   0x9   :  { %323 = vmatpush3.msra.mxu1 %v177_v30  ;;  %v165_v46 = vld [vmem:[%s515_s2 + $0x8] sm:$0xff]  ;;  %v164_v47 = vld [vmem:[%s515_s2] sm:$0xff] }
   0xa   :  { %324 = vmatprep.subr.mxu1 %v364_v0 }
   0xb   :  { %301 = vmatpush3.bf16.xpose.msra.mxu0 %v357_v2  ;;  %325 = vmatpush3.msra.mxu1 %v176_v31 }
   0xc   :  { %302 = vmatprep.subr.bf16.mxu0 %v364_v0  ;;  %326 = vmatprep.subr.mxu1 %v364_v0 }
   0xd   :  { %327 = vmatpush3.msra.mxu1 %v175_v32 }
   0xe   :  { %328 = vmatprep.subr.mxu1 %v364_v0 }
   0xf   :  { %329 = vmatpush3.msra.mxu1 %v174_v33 }
  0x10   :  { %330 = vmatprep.subr.mxu1 %v364_v0 }
  0x11   :  { %331 = vmatpush3.msra.mxu1 %v173_v34 }
  0x12   :  { %332 = vmatprep.subr.mxu1 %v364_v0 }
  0x13   :  { %303 = vmatpush3.bf16.xpose.msra.mxu0 %v358_v5  ;;  %333 = vmatpush3.msra.mxu1 %v172_v35 }
  0x14   :  { %304 = vmatprep.subr.bf16.mxu0 %v364_v0  ;;  %334 = vmatprep.subr.mxu1 %v364_v0 }
  0x15   :  { %335 = vmatpush3.msra.mxu1 %v171_v36 }
  0x16   :  { %336 = vmatprep.subr.mxu1 %v364_v0 }
  0x17   :  { %337 = vmatpush3.msra.mxu1 %v170_v37 }
  0x18   :  { %338 = vmatprep.subr.mxu1 %v364_v0 }
  0x19   :  { %339 = vmatpush3.msra.mxu1 %v169_v38 }
  0x1a   :  { %340 = vmatprep.subr.mxu1 %v364_v0 }
  0x1b   :  { %305 = vmatpush3.bf16.xpose.msra.mxu0 %v359_v6  ;;  %341 = vmatpush3.msra.mxu1 %v168_v39 }
  0x1c   :  { %306 = vmatprep.subr.bf16.mxu0 %v364_v0  ;;  %342 = vmatprep.subr.mxu1 %v364_v0 }
  0x1d   :  { %343 = vmatpush3.msra.mxu1 %v167_v40 }
  0x1e   :  { %344 = vmatprep.subr.mxu1 %v364_v0 }
  0x1f   :  { %345 = vmatpush3.msra.mxu1 %v166_v45 }
  0x20   :  { %346 = vmatprep.subr.mxu1 %v364_v0 }
  0x21   :  { %347 = vmatpush3.msra.mxu1 %v165_v46 }
  0x22   :  { %348 = vmatprep.subr.mxu1 %v364_v0 }
  0x23   :  { %307 = vmatpush3.bf16.xpose.msra.mxu0 %v360_v7  ;;  %349 = vmatpush3.msra.mxu1 %v164_v47 }
  0x24   :  { %308 = vmatprep.subr.bf16.mxu0 %v364_v0 }
  0x2b   :  { %309 = vmatpush3.bf16.xpose.msra.mxu0 %v361_v8 }
  0x2c   :  { %310 = vmatprep.subr.bf16.mxu0 %v364_v0 }
  0x33   :  { %311 = vmatpush3.bf16.xpose.msra.mxu0 %v362_v9 }
  0x34   :  { %312 = vmatprep.subr.bf16.mxu0 %v364_v0 }
  0x3b   :  { %313 = vmatpush3.bf16.xpose.msra.mxu0 %v363_v10 }
  0x42   :  { %315 = vmatmul.mubr.bf16.vlgmr.msra.gmra.mxu0 %v21_v11 }
  0x8d   :  { %v128_v14 = vpop.xlane.xlu0 %127 }
  0x8e   :  { %v136_v16 = vadd.f32 %v269_v13, %v128_v14 }
 0x102   :  { %v120_v17 = vpop.f32.mrf.mxu0 }
 0x103   :  { %v137_v18 = vmul.f32 2.0, %v120_v17 }
 0x104   :  { %v316_v19 = vpop.f32.mrf.mxu0 }
 0x105   :  { %v138_v20 = vsub.f32 %v136_v16, %v137_v18 }
 0x106   :  { %v123_v21 = vpop.f32.mrf.mxu0 }
 0x107   :  { %v142_v22 = vsel %vm141_vm1, %v138_v20, 1e+30 }
 0x108   :  { %143 = vmin.xlane.f32.xlu0 %v142_v22  ;;  %v317_v23 = vpop.f32.mrf.mxu0 }
 0x191   :  { %v144_v24 = vpop.xlane.xlu0 %143 }
 0x192   :  { %vm145_vm2 = vcmp.eq.f32.partialorder %v142_v22, %v144_v24 }
 0x193   :  { %v146_v25 = vsel %vm145_vm2, %v438_v15, 128 }
 0x194   :  { %v148_v26 = vshra.s32 %v146_v25, 16  ;;  %v147_v41 = vand.u32 65535, %v146_v25 }
 0x196   :  { %v150_v27 = vcvt.s32.f32 %v148_v26  ;;  %v149_v43 = vcvt.s32.f32 %v147_v41 }
 0x198   :  { %151 = vmin.xlane.f32.xlu1 %v150_v27 }
 0x221   :  { %v152_v42 = vpop.xlane.xlu1 %151 }
 0x222   :  { %vm153_vm3 = vcmp.eq.f32.partialorder %v150_v27, %v152_v42  ;;  %v158_v48 = vcvt.f32.s32 %v152_v42 }
 0x223   :  { %v154_v44 = vsel %vm153_vm3, %v149_v43, inf }
 0x224   :  { %155 = vmin.xlane.f32.xlu1 %v154_v44  ;;  %v159_v50 = vshll.u32 %v158_v48, 16 }
 0x2ad   :  { %v156_v49 = vpop.xlane.xlu1 %155 }
 0x2ae   :  { %v157_v51 = vcvt.f32.s32 %v156_v49 }
 0x2b0   :  { %v160_v52 = vadd.s32 %v159_v50, %v157_v51 }
 0x2b2   :  { %252 = vst.msk [vmem:[%s516_s5] sm:$0xff] %vm251_vm4, %v160_v52  ;;  %vm161_vm5 = vcmp.eq.s32.totalorder %v438_v15, %v160_v52 }
 0x2b3   :  { %351 = vmatmul.mubr.msk.f32.vlgmr.msra.gmra.mxu1 %vm161_vm5, %v366_v53 }
 0x373   :  { %v246_v54 = vpop.f32.mrf.mxu1 }
 0x374   :  { %250 = vst [vmem:[%s517_s4] sm:$0xff] %v246_v54 }
 0x375   :  { %v352_v55 = vpop.f32.mrf.mxu1 }

// kernel: vqvae_forward.9
= control target key start
LH: loop header
LB: loop body
LE: loop exit
PB: predicated region body
PF: predicated region fallthrough
CT: control target
= control target key end

     0   :  { %s2511_s30 = smov 0   ;;  %s2513_s10 = smov 0   ;;  %s2998_s0 = inlined_call_operand.vmem [shape: bf16[2,16,128], index: 0, kind: input, shape index: {}]   ;;  %s2999_s1 = inlined_call_operand.vmem [shape: bf16[384,128], index: 1, kind: input, shape index: {}]   ;;  %s3000_s2 = inlined_call_operand.vmem [shape: f32[1,128], index: 2, kind: input, shape index: {}]   ;;  %s3001_s3 = inlined_call_operand.vmem [shape: bf16[384,128], index: 3, kind: input, shape index: {}]   ;;  %s3002_s4 = inlined_call_operand.vmem [shape: bf16[128,128], index: 4, kind: input, shape index: {}]   ;;  %s3003_s5 = inlined_call_operand.vmem [shape: bf16[384,128], index: 5, kind: input, shape index: {}]   ;;  %s3004_s6 = inlined_call_operand.vmem [shape: bf16[128,128], index: 6, kind: input, shape index: {}]   ;;  %s3005_s7 = inlined_call_operand.vmem [shape: bf16[384,128], index: 7, kind: input, shape index: {}]   ;;  %s3006_s8 = inlined_call_operand.vmem [shape: f32[1,128], index: 8, kind: input, shape index: {}]   ;;  %s3007_s9 = inlined_call_operand.vmem [shape: f32[2,8,128], index: 9, kind: output, shape index: {}]  }
   0x1   :  { %s2515_s11 = smov 0  }
   0x2 LB: > { %s31_s12 = sadd.s32 1, %s2453_s10  ;;  %p1912_p0 = scmp.ge.s32.totalorder %s2457_s11, 1  ;;  %s2457_s11 = sphi %s2515_s11, %s19_s11   ;;  %s2453_s10 = sphi %s2513_s10, %s3009_s10   ;;  %s2449_s30 = sphi %s2511_s30, %s3008_s30  }
   0x3   : > { %p33_p1 = scmp.ge.s32.totalorder %s31_s12, 2  ;;  %p301_p2 = scmp.lt.s32.totalorder %s2457_s11, 3 }
   0x5   : > { %s3011_s12 = smov (%p33_p1, %s31_s12), 0  ;;  %p302_p3 = pnand %p1912_p0, %p301_p2 }
   0x6   : > { %p339_p4 = scmp.lt.s32.totalorder (!%p302_p3), %s2449_s30, 1 }
   0x7   : > { %305 = sbr.rel (%p302_p3) target bundleno = 1295 (0x50f), region = 56 }
   0xc   : > { %v2322_v0 = vld [vmem:[%s2999_s1 + $0x78] sm:$0xff]   ;;  %v2459_v1 = vmov 0.0   ;;  %v2325_v4 = vld [vmem:[%s2999_s1 + $0x70] sm:$0xff]   ;;  %vm2460_vm0 = vmmov 0   ;;  %v2328_v7 = vld [vmem:[%s2999_s1 + $0x68] sm:$0xff]   ;;  %s3013_s30 = smov (!%p339_p4, %s2449_s30), 1  ;;  %v656_v55 = vlaneseq }
   0xd   : > { %2176 = vmatprep.subr.bf16.mxu1 %v2459_v1  ;;  %v2323_v2 = vld [vmem:[%s2999_s1 + $0x38] sm:$0xff]   ;;  %2034 = vmatprep.subr.bf16.mxu0 %v2322_v0  ;;  %v2326_v5 = vld [vmem:[%s2999_s1 + $0x30] sm:$0xff]   ;;  %v2329_v8 = vld [vmem:[%s2999_s1 + $0x28] sm:$0xff]   ;;  %s2033_s13 = sshll.u32 %s3013_s30, 3  ;;  %vm679_vm4 = vcmask 1046528   ;;  %vm685_vm5 = vcmask 1045504  }
   0xe   : > { %v2324_v3 = vld [vmem:[%s2999_s1 + $0xb8] sm:$0xff]   ;;  %2035 = vmatpush3.bf16.msra.mxu0 %v2323_v2  ;;  %2192 = vmatprep.mubr.msk.bf16.mxu1 %vm2460_vm0, %v2459_v1  ;;  %v2327_v6 = vld [vmem:[%s2999_s1 + $0xb0] sm:$0xff]   ;;  %v2330_v9 = vld [vmem:[%s2999_s1 + $0xa8] sm:$0xff]   ;;  %s343_s22 = scalar_lea.vmem %s2998_s0, %s2033_s13  ;;  %v2706_v56 = vshrl.u32 %v656_v55, 7  ;;  %vm1078_vm6 = vcmask 1040384   ;;  %s350_s21 = scalar_lea.vmem %s3007_s9, %s2033_s13 }
   0xf   : > { %2177 = vmatpush3.bf16.msra.mxu1 %v2324_v3  ;;  %2036 = vmatprep.subr.bf16.mxu0 %v2325_v4  ;;  %v2331_v10 = vld [vmem:[%s2999_s1 + $0x60] sm:$0xff]   ;;  %v2334_v13 = vld [vmem:[%s2999_s1 + $0x58] sm:$0xff]   ;;  %v2337_v16 = vld [vmem:[%s2999_s1 + $0x50] sm:$0xff]  }
  0x10   : > { %2178 = vmatprep.subr.bf16.mxu1 %v2459_v1  ;;  %v2332_v11 = vld [vmem:[%s2999_s1 + $0x20] sm:$0xff]   ;;  %v2335_v14 = vld [vmem:[%s2999_s1 + $0x18] sm:$0xff]   ;;  %v2338_v17 = vld [vmem:[%s2999_s1 + $0x10] sm:$0xff]   ;;  %v661_v57 = vadd.s32 4294967293, %v2706_v56 }
  0x11   : > { %v2333_v12 = vld [vmem:[%s2999_s1 + $0xa0] sm:$0xff]   ;;  %v2336_v15 = vld [vmem:[%s2999_s1 + $0x98] sm:$0xff]   ;;  %v2339_v18 = vld [vmem:[%s2999_s1 + $0x90] sm:$0xff]  }
  0x12   : > { %2037 = vmatpush3.bf16.msra.mxu0 %v2326_v5  ;;  %v2340_v19 = vld [vmem:[%s2999_s1 + $0x48] sm:$0xff]   ;;  %v2343_v22 = vld [vmem:[%s2999_s1 + $0x40] sm:$0xff]   ;;  %v2347_v29 = vld [vmem:[%s3001_s3 + $0x78] sm:$0xff]   ;;  %vm663_vm1 = vcmp.ge.s32.totalorder %v661_v57, 0  ;;  %vm665_vm2 = vcmp.lt.s32.totalorder %v661_v57, 4 }
  0x13   : > { %2179 = vmatpush3.bf16.msra.mxu1 %v2327_v6  ;;  %2038 = vmatprep.subr.bf16.mxu0 %v2328_v7  ;;  %v2341_v20 = vld [vmem:[%s2999_s1 + $0x8] sm:$0xff]   ;;  %v2346_v23 = vld [vmem:[%s343_s22] sm:$0xff]   ;;  %v2348_v31 = vld [vmem:[%s3001_s3 + $0xb8] sm:$0xff]  }
  0x14   : > { %2180 = vmatprep.subr.bf16.mxu1 %v2459_v1  ;;  %v2342_v21 = vld [vmem:[%s2999_s1 + $0x88] sm:$0xff]   ;;  %v2344_v24 = vld [vmem:[%s2999_s1] sm:$0xff]   ;;  %v366_v25 = vshrl.u32 %v2346_v23, 16  ;;  %v368_v26 = vshll.u32 %v2346_v23, 16  ;;  %v373_v32 = vrot.slane %v2346_v23, 1  ;;  %v2349_v33 = vld [vmem:[%s3001_s3 + $0x38] sm:$0xff]  }
  0x15   : > { %v2345_v27 = vld [vmem:[%s2999_s1 + $0x80] sm:$0xff]   ;;  %v2350_v34 = vld [vmem:[%s3001_s3 + $0x70] sm:$0xff]   ;;  %v2353_v37 = vld [vmem:[%s3001_s3 + $0x68] sm:$0xff]  }
  0x16   : > { %2039 = vmatpush3.bf16.msra.mxu0 %v2329_v8  ;;  %v370_v28 = vrot.slane %v368_v26, 1  ;;  %v2351_v35 = vld [vmem:[%s3001_s3 + $0xb0] sm:$0xff]   ;;  %v2355_v38 = vld [vmem:[%s3001_s3 + $0x28] sm:$0xff]   ;;  %v2356_v40 = vld [vmem:[%s3001_s3 + $0x60] sm:$0xff]  }
  0x17   : > { %2181 = vmatpush3.bf16.msra.mxu1 %v2330_v9  ;;  %2040 = vmatprep.subr.bf16.mxu0 %v2331_v10  ;;  %v2352_v36 = vld [vmem:[%s3001_s3 + $0x30] sm:$0xff]   ;;  %v2354_v39 = vld [vmem:[%s3001_s3 + $0xa8] sm:$0xff]   ;;  %v2358_v41 = vld [vmem:[%s3001_s3 + $0x20] sm:$0xff]   ;;  %v2716_v9 = vrot.slane %v2459_v1, 1  ;;  %v2719_v10 = vrot.slane %v2459_v1, 2 }
  0x18   : > { %2182 = vmatprep.subr.bf16.mxu1 %v2459_v1  ;;  %v371_v30 = vor.u32 %v370_v28, %v366_v25  ;;  %v2357_v42 = vld [vmem:[%s3001_s3 + $0xa0] sm:$0xff]   ;;  %v2359_v43 = vld [vmem:[%s3001_s3 + $0x58] sm:$0xff]   ;;  %v2362_v46 = vld [vmem:[%s3001_s3 + $0x50] sm:$0xff]  }
  0x19   : > { %v2360_v44 = vld [vmem:[%s3001_s3 + $0x98] sm:$0xff]   ;;  %v2363_v47 = vld [vmem:[%s3001_s3 + $0x90] sm:$0xff]   ;;  %v2365_v49 = vld [vmem:[%s3001_s3 + $0x48] sm:$0xff]  }
  0x1a   : > { %2041 = vmatpush3.bf16.msra.mxu0 %v2332_v11  ;;  %606 = vmatprep.mubr.bf16.mxu0 %v371_v30  ;;  %v2361_v45 = vld [vmem:[%s3001_s3 + $0x18] sm:$0xff]   ;;  %v2364_v48 = vld [vmem:[%s3001_s3 + $0x10] sm:$0xff]   ;;  %v2366_v50 = vld [vmem:[%s3001_s3 + $0x88] sm:$0xff]  }
  0x1b   : > { %2183 = vmatpush3.bf16.msra.mxu1 %v2333_v12  ;;  %2042 = vmatprep.subr.bf16.mxu0 %v2334_v13  ;;  %v2367_v51 = vld [vmem:[%s3001_s3 + $0x8] sm:$0xff]   ;;  %v2368_v52 = vld [vmem:[%s3001_s3 + $0x40] sm:$0xff]   ;;  %vm667_vm3 = vmand %vm663_vm1, %vm665_vm2 }
  0x1c   : > { %2184 = vmatprep.subr.bf16.mxu1 %v2459_v1  ;;  %v2369_v53 = vld [vmem:[%s3001_s3 + $0x80] sm:$0xff]   ;;  %v2379_v26 = vld [vmem:[%s3003_s5 + $0x78] sm:$0xff]   ;;  %v2382_v28 = vld [vmem:[%s3003_s5 + $0x70] sm:$0xff]  }
  0x1d   : > { %v2370_v54 = vld [vmem:[%s3001_s3] sm:$0xff]   ;;  %v2385_v30 = vld [vmem:[%s3003_s5 + $0x68] sm:$0xff]   ;;  %v2393_v55 = vld [vmem:[%s3003_s5 + $0x18] sm:$0xff]  }
  0x1e   : > { %2043 = vmatpush3.bf16.msra.mxu0 %v2335_v14  ;;  %v1917_v60 = vld [vmem:[%s3000_s2] ss:$0 sm:$0xff]  ;;  %v2394_v57 = vld [vmem:[%s3003_s5 + $0x50] sm:$0xff]  }
  0x1f   : > { %2185 = vmatpush3.bf16.msra.mxu1 %v2336_v15  ;;  %2044 = vmatprep.subr.bf16.mxu0 %v2337_v16  ;;  %v2378_v25 = vld [vmem:[%s3002_s4] sm:$0xff]  }
  0x20   : > { %2186 = vmatprep.subr.bf16.mxu1 %v2459_v1 }
  0x22   : > { %2045 = vmatpush3.bf16.msra.mxu0 %v2338_v17  ;;  %v2371_v17 = vld [vmem:[%s3002_s4 + $0x38] sm:$0xff]  }
  0x23   : > { %2187 = vmatpush3.bf16.msra.mxu1 %v2339_v18  ;;  %2046 = vmatprep.subr.bf16.mxu0 %v2340_v19  ;;  %v2372_v19 = vld [vmem:[%s3002_s4 + $0x30] sm:$0xff]  }
  0x24   : > { %2188 = vmatprep.subr.bf16.mxu1 %v2459_v1 }
  0x26   : > { %2047 = vmatpush3.bf16.msra.mxu0 %v2341_v20  ;;  %v2373_v20 = vld [vmem:[%s3002_s4 + $0x28] sm:$0xff]  }
  0x27   : > { %2189 = vmatpush3.bf16.msra.mxu1 %v2342_v21  ;;  %2048 = vmatprep.subr.bf16.mxu0 %v2343_v22  ;;  %v2374_v21 = vld [vmem:[%s3002_s4 + $0x20] sm:$0xff]   ;;  %v2375_v22 = vld [vmem:[%s3002_s4 + $0x18] sm:$0xff]  }
  0x28   : > { %2190 = vmatprep.subr.bf16.mxu1 %v2459_v1 }
  0x2a   : > { %2049 = vmatpush3.bf16.msra.mxu0 %v2344_v24  ;;  %v2377_v24 = vld [vmem:[%s3002_s4 + $0x8] sm:$0xff]  }
  0x2b   : > { %2191 = vmatpush3.bf16.msra.mxu1 %v2345_v27  ;;  %2065 = vmatprep.subr.bf16.mxu0 %v2347_v29  ;;  %v2381_v27 = vld [vmem:[%s3003_s5 + $0x38] sm:$0xff]   ;;  %v2384_v29 = vld [vmem:[%s3003_s5 + $0x30] sm:$0xff]  }
  0x2c   : > { %2196 = vmatprep.subr.bf16.mxu1 %v2459_v1 }
  0x2d   : > { %607 = vmatmul.mubr.bf16.vlgmr.msra.gmra.mxu0 %v2346_v23  ;;  %v2376_v23 = vld [vmem:[%s3002_s4 + $0x10] sm:$0xff]  }
  0x2e   : > { %2193 = vmatmul.mubr.bf16.vlgmr.msra.gmra.mxu1 %v373_v32  ;;  %2066 = vmatpush3.bf16.msra.mxu0 %v2349_v33 }
  0x2f   : > { %2197 = vmatpush3.bf16.msra.mxu1 %v2348_v31  ;;  %2067 = vmatprep.subr.bf16.mxu0 %v2350_v34  ;;  %v2387_v31 = vld [vmem:[%s3003_s5 + $0x28] sm:$0xff]  }
  0x30   : > { %2198 = vmatprep.subr.bf16.mxu1 %v2459_v1  ;;  %2212 = vmatprep.mubr.msk.bf16.mxu1 %vm2460_vm0, %v2459_v1 }
  0x32   : > { %2068 = vmatpush3.bf16.msra.mxu0 %v2352_v36 }
  0x33   : > { %2199 = vmatpush3.bf16.msra.mxu1 %v2351_v35  ;;  %2069 = vmatprep.subr.bf16.mxu0 %v2353_v37 }
  0x34   : > { %2200 = vmatprep.subr.bf16.mxu1 %v2459_v1 }
  0x36   : > { %2070 = vmatpush3.bf16.msra.mxu0 %v2355_v38 }
  0x37   : > { %2201 = vmatpush3.bf16.msra.mxu1 %v2354_v39  ;;  %2071 = vmatprep.subr.bf16.mxu0 %v2356_v40 }
  0x38   : > { %2202 = vmatprep.subr.bf16.mxu1 %v2459_v1 }
  0x3a   : > { %2072 = vmatpush3.bf16.msra.mxu0 %v2358_v41 }
  0x3b   : > { %2203 = vmatpush3.bf16.msra.mxu1 %v2357_v42  ;;  %2073 = vmatprep.subr.bf16.mxu0 %v2359_v43 }
  0x3c   : > { %2204 = vmatprep.subr.bf16.mxu1 %v2459_v1 }
  0x3e   : > { %2074 = vmatpush3.bf16.msra.mxu0 %v2361_v45 }
  0x3f   : > { %2205 = vmatpush3.bf16.msra.mxu1 %v2360_v44  ;;  %2075 = vmatprep.subr.bf16.mxu0 %v2362_v46  ;;  %v2380_v46 = vld [vmem:[%s3003_s5 + $0xb8] sm:$0xff]  }
  0x40   : > { %2206 = vmatprep.subr.bf16.mxu1 %v2459_v1 }
  0x42   : > { %2076 = vmatpush3.bf16.msra.mxu0 %v2364_v48  ;;  %v2383_v48 = vld [vmem:[%s3003_s5 + $0xb0] sm:$0xff]  }
  0x43   : > { %2207 = vmatpush3.bf16.msra.mxu1 %v2363_v47  ;;  %2077 = vmatprep.subr.bf16.mxu0 %v2365_v49  ;;  %v2386_v49 = vld [vmem:[%s3003_s5 + $0xa8] sm:$0xff]  }
  0x44   : > { %2208 = vmatprep.subr.bf16.mxu1 %v2459_v1 }
  0x46   : > { %2078 = vmatpush3.bf16.msra.mxu0 %v2367_v51  ;;  %v2389_v51 = vld [vmem:[%s3003_s5 + $0xa0] sm:$0xff]  }
  0x47   : > { %2209 = vmatpush3.bf16.msra.mxu1 %v2366_v50  ;;  %2079 = vmatprep.subr.bf16.mxu0 %v2368_v52  ;;  %v2388_v50 = vld [vmem:[%s3003_s5 + $0x60] sm:$0xff]  }
  0x48   : > { %2210 = vmatprep.subr.bf16.mxu1 %v2459_v1  ;;  %v2390_v52 = vld [vmem:[%s3003_s5 + $0x20] sm:$0xff]  }
  0x4a   : > { %2080 = vmatpush3.bf16.msra.mxu0 %v2370_v54  ;;  %v2392_v54 = vld [vmem:[%s3003_s5 + $0x98] sm:$0xff]  }
  0x4b   : > { %2211 = vmatpush3.bf16.msra.mxu1 %v2369_v53  ;;  %2216 = vmatprep.subr.bf16.mxu0 %v2459_v1  ;;  %v2391_v53 = vld [vmem:[%s3003_s5 + $0x58] sm:$0xff]  }
  0x4c   : > { %2105 = vmatprep.subr.bf16.mxu1 %v2379_v26 }
  0xed   : > { %v2050_v58 = vpop.f32.mrf.mxu0 }
  0xee   : > { %v649_v59 = vpop.f32.mrf.mxu1 }
  0xef   : > { %v2051_v61 = vpop.f32.mrf.mxu0 }
  0xf0   : > { %v2052_v62 = vadd.f32 %v2051_v61, %v2050_v58  ;;  %v2194_v63 = vpop.f32.mrf.mxu1  ;;  %v2395_v58 = vld [vmem:[%s3003_s5 + $0x90] sm:$0xff]   ;;  %v2398_v61 = vld [vmem:[%s3003_s5 + $0x88] sm:$0xff]  }
  0xf1   : > { %v2053_v0 = vpop.f32.mrf.mxu0  ;;  %v2400_v63 = vld [vmem:[%s3003_s5 + $0x40] sm:$0xff]  }
  0xf2   : > { %v609_v2 = vadd.f32 %v2052_v62, %v1917_v60  ;;  %v652_v3 = vpop.f32.mrf.mxu1  ;;  %v2397_v60 = vld [vmem:[%s3003_s5 + $0x48] sm:$0xff]   ;;  %v2401_v0 = vld [vmem:[%s3003_s5 + $0x80] sm:$0xff]  }
  0xf3   : > { %v2054_v4 = vpop.f32.mrf.mxu0  ;;  %v2399_v62 = vld [vmem:[%s3003_s5 + $0x8] sm:$0xff]  }
  0xf4   : > { %v650_v5 = vadd.f32 %v649_v59, %v609_v2  ;;  %v2195_v6 = vpop.f32.mrf.mxu1  ;;  %v2396_v59 = vld [vmem:[%s3003_s5 + $0x10] sm:$0xff]   ;;  %v2402_v2 = vld [vmem:[%s3003_s5] sm:$0xff]  }
  0xf6   : > { %v2712_v7 = vsel %vm667_vm3, %v650_v5, 0.0  ;;  %v1088_v5 = vadd.s32 4294967294, %v2706_v56 }
  0xf7   : > { %v675_v8 = vmax.f32 %v2712_v7, 0.0 }
  0xf8   : > { %vm1090_vm7 = vcmp.ge.s32.totalorder %v1088_v5, 0  ;;  %vm1092_vm8 = vcmp.lt.s32.totalorder %v1088_v5, 4  ;;  %v2429_v5 = vld [vmem:[%s3005_s7 + $0x48] sm:$0xff]  }
  0xf9   : > { %v686_v11 = vrot.slane %v675_v8, 2  ;;  %v680_v12 = vrot.slane %v675_v8, 1  ;;  %v691_v18 = vpack.c.bf16 %v2459_v1, %v675_v8  ;;  %vm1094_vm9 = vmand %vm1090_vm7, %vm1092_vm8 }
  0xfb   : > { %v682_v13 = vsel %vm679_vm4, %v680_v12, %v2716_v9  ;;  %v688_v14 = vsel %vm685_vm5, %v686_v11, %v2719_v10 }
  0xfc   : > { %v692_v15 = vpack.c.bf16 %v2716_v9, %v682_v13  ;;  %v693_v16 = vpack.c.bf16 %v2719_v10, %v688_v14 }
  0xfe   : > { %918 = vmatprep.mubr.bf16.mxu0 %v692_v15  ;;  %2213 = vmatmul.mubr.bf16.vlgmr.msra.gmra.mxu1 %v693_v16 }
  0xff   : > { %919 = vmatmul.mubr.bf16.vlgmr.msra.gmra.mxu0 %v691_v18  ;;  %2106 = vmatpush3.bf16.msra.mxu1 %v2381_v27  ;;  %v2404_v27 = vld [vmem:[%s3004_s6 + $0x30] sm:$0xff]  }
 0x100   : > { %2217 = vmatpush3.bf16.msra.mxu0 %v2371_v17  ;;  %2232 = vmatprep.mubr.msk.bf16.mxu0 %vm2460_vm0, %v2459_v1 }
 0x101   : > { %2218 = vmatprep.subr.bf16.mxu0 %v2459_v1  ;;  %2107 = vmatprep.subr.bf16.mxu1 %v2382_v28  ;;  %v2405_v28 = vld [vmem:[%s3004_s6 + $0x28] sm:$0xff]  }
 0x103   : > { %2108 = vmatpush3.bf16.msra.mxu1 %v2384_v29  ;;  %v2406_v29 = vld [vmem:[%s3004_s6 + $0x20] sm:$0xff]  }
 0x104   : > { %2219 = vmatpush3.bf16.msra.mxu0 %v2372_v19  ;;  %2109 = vmatprep.subr.bf16.mxu1 %v2385_v30  ;;  %v2407_v30 = vld [vmem:[%s3004_s6 + $0x18] sm:$0xff]  }
 0x105   : > { %2220 = vmatprep.subr.bf16.mxu0 %v2459_v1 }
 0x107   : > { %2110 = vmatpush3.bf16.msra.mxu1 %v2387_v31  ;;  %v2408_v31 = vld [vmem:[%s3004_s6 + $0x10] sm:$0xff]  }
 0x108   : > { %2221 = vmatpush3.bf16.msra.mxu0 %v2373_v20  ;;  %2111 = vmatprep.subr.bf16.mxu1 %v2388_v50 }
 0x109   : > { %2222 = vmatprep.subr.bf16.mxu0 %v2459_v1 }
 0x10b   : > { %2112 = vmatpush3.bf16.msra.mxu1 %v2390_v52 }
 0x10c   : > { %2223 = vmatpush3.bf16.msra.mxu0 %v2374_v21  ;;  %2113 = vmatprep.subr.bf16.mxu1 %v2391_v53 }
 0x10d   : > { %2224 = vmatprep.subr.bf16.mxu0 %v2459_v1 }
 0x10f   : > { %2114 = vmatpush3.bf16.msra.mxu1 %v2393_v55 }
 0x110   : > { %2225 = vmatpush3.bf16.msra.mxu0 %v2375_v22  ;;  %2115 = vmatprep.subr.bf16.mxu1 %v2394_v57  ;;  %v2415_v57 = vld [vmem:[%s3005_s7 + $0xb0] sm:$0xff]  }
 0x111   : > { %2226 = vmatprep.subr.bf16.mxu0 %v2459_v1 }
 0x113   : > { %2116 = vmatpush3.bf16.msra.mxu1 %v2396_v59  ;;  %v2420_v59 = vld [vmem:[%s3005_s7 + $0x60] sm:$0xff]  }
 0x114   : > { %2227 = vmatpush3.bf16.msra.mxu0 %v2376_v23  ;;  %2117 = vmatprep.subr.bf16.mxu1 %v2397_v60  ;;  %v2421_v60 = vld [vmem:[%s3005_s7 + $0xa0] sm:$0xff]  }
 0x115   : > { %2228 = vmatprep.subr.bf16.mxu0 %v2459_v1 }
 0x117   : > { %2118 = vmatpush3.bf16.msra.mxu1 %v2399_v62  ;;  %v2423_v62 = vld [vmem:[%s3005_s7 + $0x58] sm:$0xff]  }
 0x118   : > { %2229 = vmatpush3.bf16.msra.mxu0 %v2377_v24  ;;  %2119 = vmatprep.subr.bf16.mxu1 %v2400_v63  ;;  %v2424_v63 = vld [vmem:[%s3005_s7 + $0x98] sm:$0xff]  }
 0x119   : > { %2230 = vmatprep.subr.bf16.mxu0 %v2459_v1 }
 0x11b   : > { %2120 = vmatpush3.bf16.msra.mxu1 %v2402_v2  ;;  %v2426_v2 = vld [vmem:[%s3005_s7 + $0x50] sm:$0xff]  }
 0x11c   : > { %2231 = vmatpush3.bf16.msra.mxu0 %v2378_v25  ;;  %2256 = vmatprep.subr.bf16.mxu1 %v2459_v1  ;;  %v2403_v25 = vld [vmem:[%s3004_s6 + $0x38] sm:$0xff]  }
 0x11d   : > { %2236 = vmatprep.subr.bf16.mxu0 %v2459_v1 }
 0x1be   : > { %v961_v32 = vpop.f32.mrf.mxu1 }
 0x1bf   : > { %v2081_v33 = vpop.f32.mrf.mxu0 }
 0x1c0   : > { %v2214_v34 = vpop.f32.mrf.mxu1 }
 0x1c1   : > { %v2082_v35 = vpop.f32.mrf.mxu0  ;;  %v2411_v34 = vld [vmem:[%s3005_s7 + $0x78] sm:$0xff]  }
 0x1c2   : > { %v2083_v36 = vadd.f32 %v2082_v35, %v2081_v33  ;;  %v964_v37 = vpop.f32.mrf.mxu1  ;;  %v2410_v33 = vld [vmem:[%s3004_s6] sm:$0xff]   ;;  %v2413_v35 = vld [vmem:[%s3005_s7 + $0x38] sm:$0xff]  }
 0x1c3   : > { %v2084_v38 = vpop.f32.mrf.mxu0 }
 0x1c4   : > { %v2215_v39 = vpop.f32.mrf.mxu1  ;;  %v962_v41 = vadd.f32 %v2083_v36, %v961_v32  ;;  %v2409_v32 = vld [vmem:[%s3004_s6 + $0x8] sm:$0xff]   ;;  %v2414_v36 = vld [vmem:[%s3005_s7 + $0x70] sm:$0xff]  }
 0x1c5   : > { %v2085_v40 = vpop.f32.mrf.mxu0  ;;  %v2419_v39 = vld [vmem:[%s3005_s7 + $0x28] sm:$0xff]  }
 0x1c6   : > { %v2086_v42 = vadd.f32 %v2085_v40, %v2084_v38  ;;  %v968_v44 = vmax.f32 %v962_v41, 0.0  ;;  %v2417_v38 = vld [vmem:[%s3005_s7 + $0x68] sm:$0xff]  }
 0x1c8   : > { %v965_v43 = vadd.f32 %v2086_v42, %v964_v37  ;;  %v2416_v37 = vld [vmem:[%s3005_s7 + $0x30] sm:$0xff]  }
 0x1ca   : > { %v969_v45 = vmax.f32 %v965_v43, 0.0 }
 0x1cc   : > { %v970_v47 = vpack.c.bf16 %v969_v45, %v968_v44 }
 0x1ce   : > { %2233 = vmatmul.mubr.bf16.vlgmr.msra.gmra.mxu0 %v970_v47 }
 0x1cf   : > { %2237 = vmatpush3.bf16.msra.mxu0 %v2380_v46  ;;  %2252 = vmatprep.mubr.msk.bf16.mxu0 %vm2460_vm0, %v2459_v1 }
 0x1d0   : > { %2238 = vmatprep.subr.bf16.mxu0 %v2459_v1 }
 0x1d3   : > { %2239 = vmatpush3.bf16.msra.mxu0 %v2383_v48 }
 0x1d4   : > { %2240 = vmatprep.subr.bf16.mxu0 %v2459_v1 }
 0x1d7   : > { %2241 = vmatpush3.bf16.msra.mxu0 %v2386_v49 }
 0x1d8   : > { %2242 = vmatprep.subr.bf16.mxu0 %v2459_v1 }
 0x1db   : > { %2243 = vmatpush3.bf16.msra.mxu0 %v2389_v51 }
 0x1dc   : > { %2244 = vmatprep.subr.bf16.mxu0 %v2459_v1 }
 0x1df   : > { %2245 = vmatpush3.bf16.msra.mxu0 %v2392_v54  ;;  %v2412_v54 = vld [vmem:[%s3005_s7 + $0xb8] sm:$0xff]  }
 0x1e0   : > { %2246 = vmatprep.subr.bf16.mxu0 %v2459_v1 }
 0x1e3   : > { %2247 = vmatpush3.bf16.msra.mxu0 %v2395_v58  ;;  %v2418_v58 = vld [vmem:[%s3005_s7 + $0xa8] sm:$0xff]  }
 0x1e4   : > { %2248 = vmatprep.subr.bf16.mxu0 %v2459_v1 }
 0x1e7   : > { %2249 = vmatpush3.bf16.msra.mxu0 %v2398_v61  ;;  %v2422_v61 = vld [vmem:[%s3005_s7 + $0x20] sm:$0xff]  }
 0x1e8   : > { %2250 = vmatprep.subr.bf16.mxu0 %v2459_v1 }
 0x1eb   : > { %2251 = vmatpush3.bf16.msra.mxu0 %v2401_v0  ;;  %v2425_v0 = vld [vmem:[%s3005_s7 + $0x18] sm:$0xff]  }
 0x1ec   : > { %2145 = vmatprep.subr.bf16.mxu0 %v2411_v34 }
 0x28e   : > { %v1069_v3 = vpop.f32.mrf.mxu0 }
 0x28f   : > { %v1079_v4 = vrot.slane %v1069_v3, 7  ;;  %v2427_v3 = vld [vmem:[%s3005_s7 + $0x90] sm:$0xff]  }
 0x290   : > { %v2234_v6 = vpop.f32.mrf.mxu0 }
 0x291   : > { %v1084_v8 = vadd.f32 %v1079_v4, %v2712_v7  ;;  %v2430_v6 = vld [vmem:[%s3005_s7 + $0x88] sm:$0xff]  }
 0x292   : > { %v1072_v11 = vpop.f32.mrf.mxu0 }
 0x293   : > { %v1080_v12 = vrot.slane %v1072_v11, 7  ;;  %v1102_v15 = vrot.slane %v1084_v8, 1  ;;  %v2431_v8 = vld [vmem:[%s3005_s7 + $0x8] sm:$0xff]   ;;  %v2432_v11 = vld [vmem:[%s3005_s7 + $0x40] sm:$0xff]  }
 0x294   : > { %v2235_v13 = vpop.f32.mrf.mxu0 }
 0x295   : > { %v1081_v14 = vsel %vm1078_vm6, %v1079_v4, %v1080_v12  ;;  %v2428_v4 = vld [vmem:[%s3005_s7 + $0x10] sm:$0xff]   ;;  %v2433_v12 = vld [vmem:[%s3005_s7 + $0x80] sm:$0xff]  }
 0x296   : > { %v1103_v16 = vrot.slane %v1081_v14, 1  ;;  %v2434_v13 = vld [vmem:[%s3005_s7] sm:$0xff]  }
 0x298   : > { %v1104_v17 = vsel %vm679_vm4, %v1102_v15, %v1103_v16  ;;  %v1519_v16 = vadd.s32 4294967295, %v2706_v56 }
 0x299   : > { %v2848_v18 = vsel %vm1094_vm9, %v1104_v17, 0.0 }
 0x29a   : > { %v1109_v19 = vmax.f32 %v2848_v18, 0.0  ;;  %vm1521_vm10 = vcmp.ge.s32.totalorder %v1519_v16, 0  ;;  %vm1523_vm11 = vcmp.lt.s32.totalorder %v1519_v16, 4 }
 0x29b   : > { %vm1525_vm12 = vmand %vm1521_vm10, %vm1523_vm11 }
 0x29c   : > { %v1113_v20 = vrot.slane %v1109_v19, 1  ;;  %v1118_v21 = vrot.slane %v1109_v19, 2  ;;  %v1123_v26 = vpack.c.bf16 %v2459_v1, %v1109_v19 }
 0x29e   : > { %v1115_v7 = vsel %vm679_vm4, %v1113_v20, %v2716_v9  ;;  %v1120_v22 = vsel %vm685_vm5, %v1118_v21, %v2719_v10 }
 0x29f   : > { %v1124_v23 = vpack.c.bf16 %v2716_v9, %v1115_v7  ;;  %v1125_v24 = vpack.c.bf16 %v2719_v10, %v1120_v22 }
 0x2a1   : > { %1350 = vmatprep.mubr.bf16.mxu1 %v1124_v23  ;;  %2253 = vmatmul.mubr.bf16.vlgmr.msra.gmra.mxu0 %v1125_v24 }
 0x2a2   : > { %1351 = vmatmul.mubr.bf16.vlgmr.msra.gmra.mxu1 %v1123_v26  ;;  %2146 = vmatpush3.bf16.msra.mxu0 %v2413_v35  ;;  %v2006_v35 = vld [vmem:[%s3006_s8] ss:$0 sm:$0xff] }
 0x2a3   : > { %2257 = vmatpush3.bf16.msra.mxu1 %v2403_v25  ;;  %2272 = vmatprep.mubr.msk.bf16.mxu1 %vm2460_vm0, %v2459_v1 }
 0x2a4   : > { %2258 = vmatprep.subr.bf16.mxu1 %v2459_v1  ;;  %2147 = vmatprep.subr.bf16.mxu0 %v2414_v36 }
 0x2a6   : > { %2148 = vmatpush3.bf16.msra.mxu0 %v2416_v37 }
 0x2a7   : > { %2259 = vmatpush3.bf16.msra.mxu1 %v2404_v27  ;;  %2149 = vmatprep.subr.bf16.mxu0 %v2417_v38 }
 0x2a8   : > { %2260 = vmatprep.subr.bf16.mxu1 %v2459_v1 }
 0x2aa   : > { %2150 = vmatpush3.bf16.msra.mxu0 %v2419_v39 }
 0x2ab   : > { %2261 = vmatpush3.bf16.msra.mxu1 %v2405_v28  ;;  %2151 = vmatprep.subr.bf16.mxu0 %v2420_v59 }
 0x2ac   : > { %2262 = vmatprep.subr.bf16.mxu1 %v2459_v1 }
 0x2ae   : > { %2152 = vmatpush3.bf16.msra.mxu0 %v2422_v61 }
 0x2af   : > { %2263 = vmatpush3.bf16.msra.mxu1 %v2406_v29  ;;  %2153 = vmatprep.subr.bf16.mxu0 %v2423_v62 }
 0x2b0   : > { %2264 = vmatprep.subr.bf16.mxu1 %v2459_v1 }
 0x2b2   : > { %2154 = vmatpush3.bf16.msra.mxu0 %v2425_v0 }
 0x2b3   : > { %2265 = vmatpush3.bf16.msra.mxu1 %v2407_v30  ;;  %2155 = vmatprep.subr.bf16.mxu0 %v2426_v2 }
 0x2b4   : > { %2266 = vmatprep.subr.bf16.mxu1 %v2459_v1 }
 0x2b6   : > { %2156 = vmatpush3.bf16.msra.mxu0 %v2428_v4 }
 0x2b7   : > { %2267 = vmatpush3.bf16.msra.mxu1 %v2408_v31  ;;  %2157 = vmatprep.subr.bf16.mxu0 %v2429_v5 }
 0x2b8   : > { %2268 = vmatprep.subr.bf16.mxu1 %v2459_v1 }
 0x2ba   : > { %2158 = vmatpush3.bf16.msra.mxu0 %v2431_v8 }
 0x2bb   : > { %2269 = vmatpush3.bf16.msra.mxu1 %v2409_v32  ;;  %2159 = vmatprep.subr.bf16.mxu0 %v2432_v11 }
 0x2bc   : > { %2270 = vmatprep.subr.bf16.mxu1 %v2459_v1 }
 0x2be   : > { %2160 = vmatpush3.bf16.msra.mxu0 %v2434_v13 }
 0x2bf   : > { %2271 = vmatpush3.bf16.msra.mxu1 %v2410_v33 }
 0x2c0   : > { %2276 = vmatprep.subr.bf16.mxu1 %v2459_v1 }
 0x361   : > { %v1393_v40 = vpop.f32.mrf.mxu0 }
 0x362   : > { %v2121_v41 = vpop.f32.mrf.mxu1 }
 0x363   : > { %v2254_v42 = vpop.f32.mrf.mxu0 }
 0x364   : > { %v2122_v43 = vpop.f32.mrf.mxu1 }
 0x365   : > { %v2123_v44 = vadd.f32 %v2122_v43, %v2121_v41  ;;  %v1396_v45 = vpop.f32.mrf.mxu0 }
 0x366   : > { %v2124_v46 = vpop.f32.mrf.mxu1 }
 0x367   : > { %v2255_v47 = vpop.f32.mrf.mxu0  ;;  %v1394_v49 = vadd.f32 %v2123_v44, %v1393_v40 }
 0x368   : > { %v2125_v48 = vpop.f32.mrf.mxu1 }
 0x369   : > { %v2126_v50 = vadd.f32 %v2125_v48, %v2124_v46  ;;  %v1400_v52 = vmax.f32 %v1394_v49, 0.0 }
 0x36b   : > { %v1397_v51 = vadd.f32 %v2126_v50, %v1396_v45 }
 0x36d   : > { %v1401_v53 = vmax.f32 %v1397_v51, 0.0 }
 0x36f   : > { %v1402_v55 = vpack.c.bf16 %v1401_v53, %v1400_v52 }
 0x371   : > { %2273 = vmatmul.mubr.bf16.vlgmr.msra.gmra.mxu1 %v1402_v55 }
 0x372   : > { %2277 = vmatpush3.bf16.msra.mxu1 %v2412_v54  ;;  %2292 = vmatprep.mubr.msk.bf16.mxu1 %vm2460_vm0, %v2459_v1 }
 0x373   : > { %2278 = vmatprep.subr.bf16.mxu1 %v2459_v1 }
 0x376   : > { %2279 = vmatpush3.bf16.msra.mxu1 %v2415_v57 }
 0x377   : > { %2280 = vmatprep.subr.bf16.mxu1 %v2459_v1 }
 0x37a   : > { %2281 = vmatpush3.bf16.msra.mxu1 %v2418_v58 }
 0x37b   : > { %2282 = vmatprep.subr.bf16.mxu1 %v2459_v1 }
 0x37e   : > { %2283 = vmatpush3.bf16.msra.mxu1 %v2421_v60 }
 0x37f   : > { %2284 = vmatprep.subr.bf16.mxu1 %v2459_v1 }
 0x382   : > { %2285 = vmatpush3.bf16.msra.mxu1 %v2424_v63 }
 0x383   : > { %2286 = vmatprep.subr.bf16.mxu1 %v2459_v1 }
 0x386   : > { %2287 = vmatpush3.bf16.msra.mxu1 %v2427_v3 }
 0x387   : > { %2288 = vmatprep.subr.bf16.mxu1 %v2459_v1 }
 0x38a   : > { %2289 = vmatpush3.bf16.msra.mxu1 %v2430_v6 }
 0x38b   : > { %2290 = vmatprep.subr.bf16.mxu1 %v2459_v1 }
 0x38e   : > { %2291 = vmatpush3.bf16.msra.mxu1 %v2433_v12 }
 0x431   : > { %v1501_v14 = vpop.f32.mrf.mxu1 }
 0x432   : > { %v1510_v15 = vrot.slane %v1501_v14, 7 }
 0x433   : > { %v2274_v17 = vpop.f32.mrf.mxu1 }
 0x434   : > { %v1515_v19 = vadd.f32 %v1510_v15, %v2848_v18 }
 0x435   : > { %v1504_v20 = vpop.f32.mrf.mxu1 }
 0x436   : > { %v1511_v21 = vrot.slane %v1504_v20, 7  ;;  %v1533_v22 = vrot.slane %v1515_v19, 1 }
 0x437   : > { %v2275_v7 = vpop.f32.mrf.mxu1 }
 0x438   : > { %v1512_v1 = vsel %vm1078_vm6, %v1510_v15, %v1511_v21 }
 0x439   : > { %v1534_v23 = vrot.slane %v1512_v1, 1 }
 0x43b   : > { %v1535_v24 = vsel %vm679_vm4, %v1533_v22, %v1534_v23 }
 0x43c   : > { %v1538_v25 = vsel %vm1525_vm12, %v1535_v24, 0.0 }
 0x43d   : > { %v1540_v26 = vmax.f32 %v1538_v25, 0.0 }
 0x43f   : > { %v1544_v27 = vrot.slane %v1540_v26, 1  ;;  %v1548_v28 = vrot.slane %v1540_v26, 2  ;;  %v1552_v31 = vpack.c.bf16 %v1540_v26, %v1540_v26 }
 0x441   : > { %v1546_v56 = vsel %vm679_vm4, %v1544_v27, %v2716_v9  ;;  %v1550_v18 = vsel %vm685_vm5, %v1548_v28, %v2719_v10 }
 0x442   : > { %v1553_v29 = vpack.c.bf16 %v1546_v56, %v1546_v56  ;;  %v1554_v30 = vpack.c.bf16 %v1550_v18, %v1550_v18 }
 0x444   : > { %1786 = vmatprep.mubr.bf16.mxu0 %v1553_v29  ;;  %2293 = vmatmul.mubr.bf16.vlgmr.msra.gmra.mxu1 %v1554_v30 }
 0x445   : > { %1787 = vmatmul.mubr.bf16.vlgmr.msra.gmra.mxu0 %v1552_v31 }
 0x504   : > { %v1828_v32 = vpop.f32.mrf.mxu1 }
 0x505   : > { %v2161_v33 = vpop.f32.mrf.mxu0 }
 0x506   : > { %v2294_v34 = vpop.f32.mrf.mxu1 }
 0x507   : > { %v2162_v36 = vpop.f32.mrf.mxu0 }
 0x508   : > { %v2163_v37 = vadd.f32 %v2162_v36, %v2161_v33  ;;  %v1831_v9 = vpop.f32.mrf.mxu1 }
 0x509   : > { %v2164_v38 = vpop.f32.mrf.mxu0 }
 0x50a   : > { %v1789_v39 = vadd.f32 %v2163_v37, %v2006_v35  ;;  %v2295_v10 = vpop.f32.mrf.mxu1 }
 0x50b   : > { %v2165_v40 = vpop.f32.mrf.mxu0 }
 0x50c   : > { %v1829_v41 = vadd.f32 %v1828_v32, %v1789_v39 }
 0x50e   : > { %1834 = vst [vmem:[%s350_s21] sm:$0xff] %v1829_v41 }
 0x50f PF: > { %s19_s11 = sadd.s32 1, %s2457_s11   ;;  %s3008_s30 = smov %s2453_s10 }
 0x510   : > { %p16_p5 = scmp.ge.s32.totalorder %s19_s11, 4   ;;  %s3009_s10 = smov %s3011_s12 }
 0x512   :  { %18 = sbr.rel (!%p16_p5) target bundleno = 2 (0x2), region = 87 }

// kernel: vqvae_forward.13
= control target key start
LH: loop header
LB: loop body
LE: loop exit
PB: predicated region body
PF: predicated region fallthrough
CT: control target
= control target key end

     0   :  { %s1081_s15 = smov 0   ;;  %s1083_s16 = smov 0   ;;  %s1317_s0 = inlined_call_operand.vmem [shape: bf16[2,10,128], index: 0, kind: input, shape index: {}]   ;;  %s1318_s1 = inlined_call_operand.vmem [shape: bf16[256,256], index: 1, kind: input, shape index: {}]   ;;  %s1319_s2 = inlined_call_operand.vmem [shape: bf16[256,256], index: 2, kind: input, shape index: {}]   ;;  %s1320_s3 = inlined_call_operand.vmem [shape: f32[1,256], index: 3, kind: input, shape index: {}]   ;;  %s1321_s4 = inlined_call_operand.vmem [shape: bf16[2,8,512], index: 4, kind: output, shape index: {}]  }
   0x1   :  { %s1085_s17 = smov 0  }
   0x2 LB: > { %s26_s18 = sadd.s32 1, %s1050_s16  ;;  %p833_p0 = scmp.ge.s32.totalorder %s1054_s17, 1  ;;  %s1054_s17 = sphi %s1085_s17, %s14_s17   ;;  %s1050_s16 = sphi %s1083_s16, %s1323_s16   ;;  %s1046_s15 = sphi %s1081_s15, %s1322_s15  }
   0x3   : > { %p28_p1 = scmp.ge.s32.totalorder %s26_s18, 2  ;;  %p176_p2 = scmp.lt.s32.totalorder %s1054_s17, 3 }
   0x5   : > { %s1325_s18 = smov (%p28_p1, %s26_s18), 0  ;;  %p177_p3 = pnand %p833_p0, %p176_p2 }
   0x6   : > { %p206_p4 = scmp.lt.s32.totalorder (!%p177_p3), %s1046_s15, 1 }
   0x7   : > { %180 = sbr.rel (%p177_p3) target bundleno = 278 (0x116), region = 36 }
   0xc   : > { %v935_v0 = vld [vmem:[%s1318_s1 + $0x74] ss:$8 sps:$4 sm:$0xff]   ;;  %v939_v2 = vld [vmem:[%s1318_s1 + $0x70] ss:$8 sps:$4 sm:$0xff]   ;;  %v941_v4 = vld [vmem:[%s1318_s1 + $0x64] ss:$8 sps:$4 sm:$0xff]  }
   0xd   : > { %v937_v1 = vld [vmem:[%s1319_s2 + $0x74] ss:$8 sps:$4 sm:$0xff]   ;;  %444 = vmatprep.subr.bf16.mxu0 %v935_v0  ;;  %v940_v3 = vld [vmem:[%s1319_s2 + $0x70] ss:$8 sps:$4 sm:$0xff]   ;;  %v943_v5 = vld [vmem:[%s1319_s2 + $0x64] ss:$8 sps:$4 sm:$0xff]  }
   0xe   : > { %685 = vmatprep.subr.bf16.mxu1 %v937_v1  ;;  %445 = vmatpush1.bf16.msra.mxu0 %v939_v2  ;;  %v945_v6 = vld [vmem:[%s1318_s1 + $0x60] ss:$8 sps:$4 sm:$0xff]   ;;  %v947_v8 = vld [vmem:[%s1318_s1 + $0x54] ss:$8 sps:$4 sm:$0xff]   ;;  %v951_v10 = vld [vmem:[%s1318_s1 + $0x50] ss:$8 sps:$4 sm:$0xff]  }
   0xf   : > { %686 = vmatpush1.bf16.msra.mxu1 %v940_v3  ;;  %446 = vmatprep.subr.bf16.mxu0 %v941_v4  ;;  %v946_v7 = vld [vmem:[%s1319_s2 + $0x60] ss:$8 sps:$4 sm:$0xff]   ;;  %v949_v9 = vld [vmem:[%s1319_s2 + $0x54] ss:$8 sps:$4 sm:$0xff]   ;;  %v952_v11 = vld [vmem:[%s1319_s2 + $0x50] ss:$8 sps:$4 sm:$0xff]  }
  0x10   : > { %687 = vmatprep.subr.bf16.mxu1 %v943_v5  ;;  %v953_v12 = vld [vmem:[%s1318_s1 + $0x44] ss:$8 sps:$4 sm:$0xff]   ;;  %v957_v14 = vld [vmem:[%s1318_s1 + $0x40] ss:$8 sps:$4 sm:$0xff]   ;;  %v959_v16 = vld [vmem:[%s1318_s1 + $0x34] ss:$8 sps:$4 sm:$0xff]  }
  0x11   : > { %v955_v13 = vld [vmem:[%s1319_s2 + $0x44] ss:$8 sps:$4 sm:$0xff]   ;;  %v958_v15 = vld [vmem:[%s1319_s2 + $0x40] ss:$8 sps:$4 sm:$0xff]   ;;  %v961_v17 = vld [vmem:[%s1319_s2 + $0x34] ss:$8 sps:$4 sm:$0xff]  }
  0x12   : > { %447 = vmatpush1.bf16.msra.mxu0 %v945_v6  ;;  %v963_v18 = vld [vmem:[%s1318_s1 + $0x30] ss:$8 sps:$4 sm:$0xff]   ;;  %v965_v20 = vld [vmem:[%s1318_s1 + $0x24] ss:$8 sps:$4 sm:$0xff]   ;;  %v969_v22 = vld [vmem:[%s1318_s1 + $0x20] ss:$8 sps:$4 sm:$0xff]  }
  0x13   : > { %688 = vmatpush1.bf16.msra.mxu1 %v946_v7  ;;  %448 = vmatprep.subr.bf16.mxu0 %v947_v8  ;;  %v964_v19 = vld [vmem:[%s1319_s2 + $0x30] ss:$8 sps:$4 sm:$0xff]   ;;  %v967_v21 = vld [vmem:[%s1319_s2 + $0x24] ss:$8 sps:$4 sm:$0xff]   ;;  %v970_v23 = vld [vmem:[%s1319_s2 + $0x20] ss:$8 sps:$4 sm:$0xff]  }
  0x14   : > { %689 = vmatprep.subr.bf16.mxu1 %v949_v9  ;;  %v971_v24 = vld [vmem:[%s1318_s1 + $0x14] ss:$8 sps:$4 sm:$0xff]   ;;  %v975_v26 = vld [vmem:[%s1318_s1 + $0x10] ss:$8 sps:$4 sm:$0xff]   ;;  %v977_v28 = vld [vmem:[%s1318_s1 + $0x4] ss:$8 sps:$4 sm:$0xff]  }
  0x15   : > { %v973_v25 = vld [vmem:[%s1319_s2 + $0x14] ss:$8 sps:$4 sm:$0xff]   ;;  %v976_v27 = vld [vmem:[%s1319_s2 + $0x10] ss:$8 sps:$4 sm:$0xff]   ;;  %v979_v29 = vld [vmem:[%s1319_s2 + $0x4] ss:$8 sps:$4 sm:$0xff]  }
  0x16   : > { %449 = vmatpush1.bf16.msra.mxu0 %v951_v10  ;;  %v981_v30 = vld [vmem:[%s1318_s1] ss:$8 sps:$4 sm:$0xff]   ;;  %v983_v32 = vld [vmem:[%s1318_s1 + $0xf4] ss:$8 sps:$4 sm:$0xff]   ;;  %v987_v34 = vld [vmem:[%s1318_s1 + $0xf0] ss:$8 sps:$4 sm:$0xff]  }
  0x17   : > { %690 = vmatpush1.bf16.msra.mxu1 %v952_v11  ;;  %450 = vmatprep.subr.bf16.mxu0 %v953_v12  ;;  %v982_v31 = vld [vmem:[%s1319_s2] ss:$8 sps:$4 sm:$0xff]   ;;  %v985_v33 = vld [vmem:[%s1319_s2 + $0xf4] ss:$8 sps:$4 sm:$0xff]   ;;  %v988_v35 = vld [vmem:[%s1319_s2 + $0xf0] ss:$8 sps:$4 sm:$0xff]   ;;  %v274_v11 = vlaneseq }
  0x18   : > { %691 = vmatprep.subr.bf16.mxu1 %v955_v13  ;;  %v989_v36 = vld [vmem:[%s1318_s1 + $0xe4] ss:$8 sps:$4 sm:$0xff]   ;;  %s1327_s15 = smov (!%p206_p4, %s1046_s15), 1  ;;  %v993_v38 = vld [vmem:[%s1318_s1 + $0xe0] ss:$8 sps:$4 sm:$0xff]  }
  0x19   : > { %v991_v37 = vld [vmem:[%s1319_s2 + $0xe4] ss:$8 sps:$4 sm:$0xff]   ;;  %v994_v39 = vld [vmem:[%s1319_s2 + $0xe0] ss:$8 sps:$4 sm:$0xff]   ;;  %v995_v40 = vld [vmem:[%s1318_s1 + $0xd4] ss:$8 sps:$4 sm:$0xff]  }
  0x1a   : > { %451 = vmatpush1.bf16.msra.mxu0 %v957_v14  ;;  %s907_s9 = sshll.u32 %s1327_s15, 3  ;;  %v997_v41 = vld [vmem:[%s1319_s2 + $0xd4] ss:$8 sps:$4 sm:$0xff]   ;;  %v999_v42 = vld [vmem:[%s1318_s1 + $0xd0] ss:$8 sps:$4 sm:$0xff]   ;;  %v275_v12 = vshrl.u32 %v274_v11, 7 }
  0x1b   : > { %692 = vmatpush1.bf16.msra.mxu1 %v958_v15  ;;  %452 = vmatprep.subr.bf16.mxu0 %v959_v16  ;;  %v1000_v43 = vld [vmem:[%s1319_s2 + $0xd0] ss:$8 sps:$4 sm:$0xff]   ;;  %s210_s22 = scalar_lea.vmem %s1317_s0, %s907_s9  ;;  %v1001_v44 = vld [vmem:[%s1318_s1 + $0xc4] ss:$8 sps:$4 sm:$0xff]   ;;  %v1005_v48 = vld [vmem:[%s1318_s1 + $0xc0] ss:$8 sps:$4 sm:$0xff]  }
  0x1c   : > { %693 = vmatprep.subr.bf16.mxu1 %v961_v17  ;;  %v1003_v45 = vld [vmem:[%s1319_s2 + $0xc4] ss:$8 sps:$4 sm:$0xff]   ;;  %v225_v46 = vld [vmem:[%s210_s22] sm:$0xf]  ;;  %v1007_v51 = vld [vmem:[%s1318_s1 + $0xb4] ss:$8 sps:$4 sm:$0xff]  }
  0x1d   : > { %v226_v47 = vld [vmem:[%s210_s22 + $0x4] sm:$0x1]  ;;  %v1006_v49 = vld [vmem:[%s1319_s2 + $0xc0] ss:$8 sps:$4 sm:$0xff]   ;;  %v1009_v52 = vld [vmem:[%s1319_s2 + $0xb4] ss:$8 sps:$4 sm:$0xff]  }
  0x1e   : > { %453 = vmatpush1.bf16.msra.mxu0 %v963_v18  ;;  %v838_v50 = vcombine.low %v225_v46, %v226_v47  ;;  %v1011_v55 = vld [vmem:[%s1318_s1 + $0xb0] ss:$8 sps:$4 sm:$0xff]   ;;  %v1013_v58 = vld [vmem:[%s1318_s1 + $0xa4] ss:$8 sps:$4 sm:$0xff]   ;;  %v1017_v61 = vld [vmem:[%s1318_s1 + $0xa0] ss:$8 sps:$4 sm:$0xff]  }
  0x1f   : > { %694 = vmatpush1.bf16.msra.mxu1 %v964_v19  ;;  %454 = vmatprep.subr.bf16.mxu0 %v965_v20  ;;  %v1012_v56 = vld [vmem:[%s1319_s2 + $0xb0] ss:$8 sps:$4 sm:$0xff]   ;;  %v1015_v59 = vld [vmem:[%s1319_s2 + $0xa4] ss:$8 sps:$4 sm:$0xff]   ;;  %v1018_v62 = vld [vmem:[%s1319_s2 + $0xa0] ss:$8 sps:$4 sm:$0xff]  }
  0x20   : > { %695 = vmatprep.subr.bf16.mxu1 %v967_v21  ;;  %v233_v53 = vshrl.u32 %v838_v50, 16  ;;  %v235_v54 = vshll.u32 %v838_v50, 16  ;;  %v1019_v1 = vld [vmem:[%s1318_s1 + $0x94] ss:$8 sps:$4 sm:$0xff]   ;;  %v1023_v4 = vld [vmem:[%s1318_s1 + $0x90] ss:$8 sps:$4 sm:$0xff]  }
  0x21   : > { %v1021_v2 = vld [vmem:[%s1319_s2 + $0x94] ss:$8 sps:$4 sm:$0xff]   ;;  %v1024_v5 = vld [vmem:[%s1319_s2 + $0x90] ss:$8 sps:$4 sm:$0xff]   ;;  %v1025_v7 = vld [vmem:[%s1318_s1 + $0x84] ss:$8 sps:$4 sm:$0xff]  }
  0x22   : > { %455 = vmatpush1.bf16.msra.mxu0 %v969_v22  ;;  %v237_v57 = vrot.slane %v235_v54, 1  ;;  %v1027_v8 = vld [vmem:[%s1319_s2 + $0x84] ss:$8 sps:$4 sm:$0xff]   ;;  %v1029_v9 = vld [vmem:[%s1318_s1 + $0x80] ss:$8 sps:$4 sm:$0xff]   ;;  %v276_v13 = vsub.s32 0, %v275_v12 }
  0x23   : > { %696 = vmatpush1.bf16.msra.mxu1 %v970_v23  ;;  %456 = vmatprep.subr.bf16.mxu0 %v971_v24  ;;  %v1030_v10 = vld [vmem:[%s1319_s2 + $0x80] ss:$8 sps:$4 sm:$0xff]   ;;  %v280_v14 = vsub.s32 1, %v275_v12  ;;  %s908_s21 = sshll.u32 %s1327_s15, 4 }
  0x24   : > { %697 = vmatprep.subr.bf16.mxu1 %v973_v25  ;;  %v238_v60 = vor.u32 %v237_v57, %v233_v53  ;;  %v240_v15 = vld [vmem:[%s1320_s3] sm:$0x3]  ;;  %s219_s24 = scalar_lea.vmem %s1321_s4, %s908_s21 }
  0x25   : > { %v277_v16 = vrot.slane %v240_v15, %v276_v13  ;;  %v281_v17 = vrot.slane %v240_v15, %v280_v14 }
  0x26   : > { %457 = vmatpush1.bf16.msra.mxu0 %v975_v26  ;;  %v518_v63 = vshrl.u32 %v238_v60, 16  ;;  %v520_v0 = vshll.u32 %v238_v60, 16  ;;  %476 = vmatprep.mubr.bf16.mxu0 %v238_v60 }
  0x27   : > { %698 = vmatpush1.bf16.msra.mxu1 %v976_v27  ;;  %458 = vmatprep.subr.bf16.mxu0 %v977_v28 }
  0x28   : > { %699 = vmatprep.subr.bf16.mxu1 %v979_v29  ;;  %v522_v3 = vrot.slane %v520_v0, 1 }
  0x2a   : > { %459 = vmatpush1.bf16.msra.mxu0 %v981_v30  ;;  %v523_v6 = vor.u32 %v522_v3, %v518_v63 }
  0x2b   : > { %700 = vmatpush1.bf16.msra.mxu1 %v982_v31  ;;  %460 = vmatprep.subr.bf16.mxu0 %v983_v32 }
  0x2c   : > { %701 = vmatprep.subr.bf16.mxu1 %v985_v33  ;;  %717 = vmatprep.mubr.bf16.mxu1 %v523_v6 }
  0x2e   : > { %461 = vmatpush2.bf16.msra.mxu0 %v987_v34 }
  0x2f   : > { %702 = vmatpush2.bf16.msra.mxu1 %v988_v35  ;;  %462 = vmatprep.subr.bf16.mxu0 %v989_v36 }
  0x30   : > { %703 = vmatprep.subr.bf16.mxu1 %v991_v37 }
  0x32   : > { %463 = vmatpush2.bf16.msra.mxu0 %v993_v38 }
  0x33   : > { %704 = vmatpush2.bf16.msra.mxu1 %v994_v39  ;;  %464 = vmatprep.subr.bf16.mxu0 %v995_v40 }
  0x34   : > { %705 = vmatprep.subr.bf16.mxu1 %v997_v41 }
  0x36   : > { %465 = vmatpush2.bf16.msra.mxu0 %v999_v42 }
  0x37   : > { %706 = vmatpush2.bf16.msra.mxu1 %v1000_v43  ;;  %466 = vmatprep.subr.bf16.mxu0 %v1001_v44 }
  0x38   : > { %707 = vmatprep.subr.bf16.mxu1 %v1003_v45 }
  0x3a   : > { %467 = vmatpush2.bf16.msra.mxu0 %v1005_v48 }
  0x3b   : > { %708 = vmatpush2.bf16.msra.mxu1 %v1006_v49  ;;  %468 = vmatprep.subr.bf16.mxu0 %v1007_v51 }
  0x3c   : > { %709 = vmatprep.subr.bf16.mxu1 %v1009_v52 }
  0x3e   : > { %469 = vmatpush2.bf16.msra.mxu0 %v1011_v55 }
  0x3f   : > { %710 = vmatpush2.bf16.msra.mxu1 %v1012_v56  ;;  %470 = vmatprep.subr.bf16.mxu0 %v1013_v58 }
  0x40   : > { %711 = vmatprep.subr.bf16.mxu1 %v1015_v59 }
  0x42   : > { %471 = vmatpush2.bf16.msra.mxu0 %v1017_v61 }
  0x43   : > { %712 = vmatpush2.bf16.msra.mxu1 %v1018_v62  ;;  %472 = vmatprep.subr.bf16.mxu0 %v1019_v1 }
  0x44   : > { %713 = vmatprep.subr.bf16.mxu1 %v1021_v2 }
  0x46   : > { %473 = vmatpush2.bf16.msra.mxu0 %v1023_v4 }
  0x47   : > { %714 = vmatpush2.bf16.msra.mxu1 %v1024_v5  ;;  %474 = vmatprep.subr.bf16.mxu0 %v1025_v7 }
  0x48   : > { %715 = vmatprep.subr.bf16.mxu1 %v1027_v8 }
  0x4a   : > { %475 = vmatpush2.bf16.msra.mxu0 %v1029_v9 }
  0x4b   : > { %716 = vmatpush2.bf16.msra.mxu1 %v1030_v10 }
  0x4d   : > { %477 = vmatmul.mubr.bf16.vlgmr.msra.gmra.mxu0 %v225_v46 }
  0x4e   : > { %718 = vmatmul.mubr.bf16.vlgmr.msra.gmra.mxu1 %v238_v60 }
 0x10d   : > { %v478_v18 = vpop.f32.mrf.mxu0 }
 0x10e   : > { %v719_v19 = vpop.f32.mrf.mxu1  ;;  %v479_v22 = vadd.f32 %v478_v18, %v277_v16 }
 0x10f   : > { %v480_v20 = vpop.f32.mrf.mxu0  ;;  %v720_v23 = vadd.f32 %v719_v19, %v277_v16 }
 0x110   : > { %v721_v21 = vpop.f32.mrf.mxu1  ;;  %v481_v24 = vadd.f32 %v480_v20, %v281_v17 }
 0x111   : > { %v722_v25 = vadd.f32 %v721_v21, %v281_v17  ;;  %v482_v26 = vpop.f32.mrf.mxu0 }
 0x112   : > { %v723_v27 = vpop.f32.mrf.mxu1  ;;  %v909_v28 = vpack.c.bf16 %v481_v24, %v479_v22 }
 0x113   : > { %v910_v29 = vpack.c.bf16 %v722_v25, %v720_v23  ;;  %v483_v30 = vpop.f32.mrf.mxu0 }
 0x114   : > { %v724_v31 = vpop.f32.mrf.mxu1  ;;  %742 = vst [vmem:[%s219_s24] sm:$0xff] %v909_v28 }
 0x115   : > { %743 = vst [vmem:[%s219_s24 + $0x8] sm:$0xff] %v910_v29 }
 0x116 PF: > { %s14_s17 = sadd.s32 1, %s1054_s17   ;;  %s1322_s15 = smov %s1050_s16 }
 0x117   : > { %p11_p5 = scmp.ge.s32.totalorder %s14_s17, 4   ;;  %s1323_s16 = smov %s1325_s18 }
 0x119   :  { %13 = sbr.rel (!%p11_p5) target bundleno = 2 (0x2), region = 67 }

// kernel: vqvae_forward.12
= control target key start
LH: loop header
LB: loop body
LE: loop exit
PB: predicated region body
PF: predicated region fallthrough
CT: control target
= control target key end

     0   :  { %s890_s15 = smov 0   ;;  %s892_s16 = smov 0   ;;  %s1033_s0 = inlined_call_operand.vmem [shape: bf16[2,10,128], index: 0, kind: input, shape index: {}]   ;;  %s1034_s1 = inlined_call_operand.vmem [shape: bf16[256,128], index: 1, kind: input, shape index: {}]   ;;  %s1035_s2 = inlined_call_operand.vmem [shape: bf16[256,128], index: 2, kind: input, shape index: {}]   ;;  %s1036_s3 = inlined_call_operand.vmem [shape: f32[1,128], index: 3, kind: input, shape index: {}]   ;;  %s1037_s4 = inlined_call_operand.vmem [shape: bf16[2,8,256], index: 4, kind: output, shape index: {}]  }
   0x1   :  { %s894_s17 = smov 0  }
   0x2 LB: > { %s26_s18 = sadd.s32 1, %s858_s16  ;;  %p694_p0 = scmp.ge.s32.totalorder %s862_s17, 1  ;;  %s862_s17 = sphi %s894_s17, %s14_s17   ;;  %s858_s16 = sphi %s892_s16, %s1039_s16   ;;  %s854_s15 = sphi %s890_s15, %s1038_s15  }
   0x3   : > { %p28_p1 = scmp.ge.s32.totalorder %s26_s18, 2  ;;  %p176_p2 = scmp.lt.s32.totalorder %s862_s17, 3 }
   0x5   : > { %s1041_s18 = smov (%p28_p1, %s26_s18), 0  ;;  %p177_p3 = pnand %p694_p0, %p176_p2 }
   0x6   : > { %p206_p4 = scmp.lt.s32.totalorder (!%p177_p3), %s854_s15, 1 }
   0x7   : > { %180 = sbr.rel (%p177_p3) target bundleno = 251 (0xfb), region = 36 }
   0xc   : > { %v808_v0 = vld [vmem:[%s1034_s1 + $0x78] sm:$0xff]   ;;  %v812_v4 = vld [vmem:[%s1034_s1 + $0x70] sm:$0xff]   ;;  %v816_v8 = vld [vmem:[%s1034_s1 + $0x68] sm:$0xff]   ;;  %s1043_s15 = smov (!%p206_p4, %s854_s15), 1  ;;  %v864_v34 = vmov 0  }
   0xd   : > { %v809_v1 = vld [vmem:[%s1035_s2 + $0x78] sm:$0xff]   ;;  %739 = vmatprep.subr.bf16.mxu0 %v808_v0  ;;  %v813_v5 = vld [vmem:[%s1035_s2 + $0x70] sm:$0xff]   ;;  %v817_v9 = vld [vmem:[%s1035_s2 + $0x68] sm:$0xff]   ;;  %s736_s29 = sshll.u32 %s1043_s15, 3 }
   0xe   : > { %v810_v2 = vld [vmem:[%s1034_s1 + $0x38] sm:$0xff]   ;;  %761 = vmatprep.subr.bf16.mxu1 %v809_v1  ;;  %v814_v6 = vld [vmem:[%s1034_s1 + $0x30] sm:$0xff]   ;;  %v818_v10 = vld [vmem:[%s1034_s1 + $0x28] sm:$0xff]   ;;  %s210_s12 = scalar_lea.vmem %s1033_s0, %s736_s29  ;;  %s219_s25 = scalar_lea.vmem %s1037_s4, %s736_s29 }
   0xf   : > { %v811_v3 = vld [vmem:[%s1035_s2 + $0x38] sm:$0xff]   ;;  %740 = vmatpush3.bf16.msra.mxu0 %v810_v2  ;;  %v815_v7 = vld [vmem:[%s1035_s2 + $0x30] sm:$0xff]   ;;  %v819_v11 = vld [vmem:[%s1035_s2 + $0x28] sm:$0xff]  }
  0x10   : > { %762 = vmatpush3.bf16.msra.mxu1 %v811_v3  ;;  %741 = vmatprep.subr.bf16.mxu0 %v812_v4  ;;  %v820_v12 = vld [vmem:[%s1034_s1 + $0x60] sm:$0xff]   ;;  %v824_v16 = vld [vmem:[%s1034_s1 + $0x58] sm:$0xff]   ;;  %v828_v20 = vld [vmem:[%s1034_s1 + $0x50] sm:$0xff]  }
  0x11   : > { %763 = vmatprep.subr.bf16.mxu1 %v813_v5  ;;  %v821_v13 = vld [vmem:[%s1035_s2 + $0x60] sm:$0xff]   ;;  %v825_v17 = vld [vmem:[%s1035_s2 + $0x58] sm:$0xff]   ;;  %v829_v21 = vld [vmem:[%s1035_s2 + $0x50] sm:$0xff]  }
  0x12   : > { %v822_v14 = vld [vmem:[%s1034_s1 + $0x20] sm:$0xff]   ;;  %v826_v18 = vld [vmem:[%s1034_s1 + $0x18] sm:$0xff]   ;;  %v830_v22 = vld [vmem:[%s1034_s1 + $0x10] sm:$0xff]  }
  0x13   : > { %742 = vmatpush3.bf16.msra.mxu0 %v814_v6  ;;  %v823_v15 = vld [vmem:[%s1035_s2 + $0x20] sm:$0xff]   ;;  %v827_v19 = vld [vmem:[%s1035_s2 + $0x18] sm:$0xff]   ;;  %v831_v23 = vld [vmem:[%s1035_s2 + $0x10] sm:$0xff]  }
  0x14   : > { %764 = vmatpush3.bf16.msra.mxu1 %v815_v7  ;;  %743 = vmatprep.subr.bf16.mxu0 %v816_v8  ;;  %v832_v24 = vld [vmem:[%s1034_s1 + $0x48] sm:$0xff]   ;;  %v836_v28 = vld [vmem:[%s1034_s1 + $0x40] sm:$0xff]  }
  0x15   : > { %765 = vmatprep.subr.bf16.mxu1 %v817_v9  ;;  %v833_v25 = vld [vmem:[%s1035_s2 + $0x48] sm:$0xff]   ;;  %v837_v29 = vld [vmem:[%s1035_s2 + $0x40] sm:$0xff]  }
  0x16   : > { %v834_v26 = vld [vmem:[%s1034_s1 + $0x8] sm:$0xff]   ;;  %v838_v30 = vld [vmem:[%s1034_s1] sm:$0xff]  }
  0x17   : > { %744 = vmatpush3.bf16.msra.mxu0 %v818_v10  ;;  %v835_v27 = vld [vmem:[%s1035_s2 + $0x8] sm:$0xff]   ;;  %v839_v31 = vld [vmem:[%s1035_s2] sm:$0xff]  }
  0x18   : > { %766 = vmatpush3.bf16.msra.mxu1 %v819_v11  ;;  %745 = vmatprep.subr.bf16.mxu0 %v820_v12  ;;  %v226_v32 = vld [vmem:[%s210_s12] sm:$0xf]  ;;  %v227_v33 = vld [vmem:[%s210_s12 + $0x4] sm:$0x1] }
  0x19   : > { %767 = vmatprep.subr.bf16.mxu1 %v821_v13  ;;  %v228_v35 = vmax.bf16 %v864_v34, %v226_v32  ;;  %v229_v36 = vmax.bf16 %v864_v34, %v227_v33  ;;  %v700_v49 = vld [vmem:[%s1036_s3] ss:$0 sm:$0xff] }
  0x1b   : > { %746 = vmatpush3.bf16.msra.mxu0 %v822_v14  ;;  %v699_v37 = vcombine.low %v228_v35, %v229_v36 }
  0x1c   : > { %768 = vmatpush3.bf16.msra.mxu1 %v823_v15  ;;  %747 = vmatprep.subr.bf16.mxu0 %v824_v16 }
  0x1d   : > { %769 = vmatprep.subr.bf16.mxu1 %v825_v17  ;;  %v236_v38 = vshrl.u32 %v699_v37, 16  ;;  %v238_v39 = vshll.u32 %v699_v37, 16 }
  0x1f   : > { %748 = vmatpush3.bf16.msra.mxu0 %v826_v18  ;;  %v240_v40 = vrot.slane %v238_v39, 1 }
  0x20   : > { %770 = vmatpush3.bf16.msra.mxu1 %v827_v19  ;;  %749 = vmatprep.subr.bf16.mxu0 %v828_v20 }
  0x21   : > { %771 = vmatprep.subr.bf16.mxu1 %v829_v21  ;;  %v241_v41 = vor.u32 %v240_v40, %v236_v38 }
  0x23   : > { %750 = vmatpush3.bf16.msra.mxu0 %v830_v22  ;;  %410 = vmatprep.mubr.bf16.mxu0 %v241_v41  ;;  %v451_v42 = vshrl.u32 %v241_v41, 16  ;;  %v453_v43 = vshll.u32 %v241_v41, 16 }
  0x24   : > { %772 = vmatpush3.bf16.msra.mxu1 %v831_v23  ;;  %751 = vmatprep.subr.bf16.mxu0 %v832_v24 }
  0x25   : > { %773 = vmatprep.subr.bf16.mxu1 %v833_v25  ;;  %v455_v44 = vrot.slane %v453_v43, 1 }
  0x27   : > { %752 = vmatpush3.bf16.msra.mxu0 %v834_v26  ;;  %v456_v45 = vor.u32 %v455_v44, %v451_v42 }
  0x28   : > { %774 = vmatpush3.bf16.msra.mxu1 %v835_v27  ;;  %753 = vmatprep.subr.bf16.mxu0 %v836_v28 }
  0x29   : > { %775 = vmatprep.subr.bf16.mxu1 %v837_v29  ;;  %586 = vmatprep.mubr.bf16.mxu1 %v456_v45 }
  0x2b   : > { %754 = vmatpush3.bf16.msra.mxu0 %v838_v30 }
  0x2c   : > { %776 = vmatpush3.bf16.msra.mxu1 %v839_v31 }
  0x2e   : > { %411 = vmatmul.mubr.bf16.vlgmr.msra.gmra.mxu0 %v228_v35 }
  0x2f   : > { %587 = vmatmul.mubr.bf16.vlgmr.msra.gmra.mxu1 %v241_v41 }
  0xee   : > { %v755_v46 = vpop.f32.mrf.mxu0 }
  0xef   : > { %v777_v51 = vpop.f32.mrf.mxu1 }
  0xf0   : > { %v756_v47 = vpop.f32.mrf.mxu0 }
  0xf1   : > { %v757_v48 = vadd.f32 %v756_v47, %v755_v46  ;;  %v778_v54 = vpop.f32.mrf.mxu1 }
  0xf2   : > { %v758_v50 = vpop.f32.mrf.mxu0  ;;  %v779_v55 = vadd.f32 %v778_v54, %v777_v51 }
  0xf3   : > { %v413_v53 = vadd.f32 %v757_v48, %v700_v49  ;;  %v780_v56 = vpop.f32.mrf.mxu1 }
  0xf4   : > { %v759_v52 = vpop.f32.mrf.mxu0  ;;  %v589_v58 = vadd.f32 %v779_v55, %v700_v49 }
  0xf5   : > { %v594_v57 = vmax.f32 %v413_v53, 0.0  ;;  %v781_v59 = vpop.f32.mrf.mxu1 }
  0xf6   : > { %v595_v60 = vmax.f32 %v589_v58, 0.0 }
  0xf8   : > { %v738_v61 = vpack.c.bf16 %v595_v60, %v594_v57 }
  0xfa   : > { %604 = vst [vmem:[%s219_s25] sm:$0xff] %v738_v61 }
  0xfb PF: > { %s14_s17 = sadd.s32 1, %s862_s17   ;;  %s1038_s15 = smov %s858_s16 }
  0xfc   : > { %p11_p5 = scmp.ge.s32.totalorder %s14_s17, 4   ;;  %s1039_s16 = smov %s1041_s18 }
  0xfe   :  { %13 = sbr.rel (!%p11_p5) target bundleno = 2 (0x2), region = 67 }

// kernel: vqvae_forward.11
= control target key start
LH: loop header
LB: loop body
LE: loop exit
PB: predicated region body
PF: predicated region fallthrough
CT: control target
= control target key end

     0   :  { %s2042_s24 = smov 0   ;;  %s2044_s25 = smov 0   ;;  %s2428_s0 = inlined_call_operand.vmem [shape: f32[2,14,128], index: 0, kind: input, shape index: {}]   ;;  %s2429_s1 = inlined_call_operand.vmem [shape: bf16[384,128], index: 1, kind: input, shape index: {}]   ;;  %s2430_s2 = inlined_call_operand.vmem [shape: f32[1,128], index: 2, kind: input, shape index: {}]   ;;  %s2431_s3 = inlined_call_operand.vmem [shape: bf16[384,128], index: 3, kind: input, shape index: {}]   ;;  %s2432_s4 = inlined_call_operand.vmem [shape: bf16[128,128], index: 4, kind: input, shape index: {}]   ;;  %s2433_s5 = inlined_call_operand.vmem [shape: bf16[384,128], index: 5, kind: input, shape index: {}]   ;;  %s2434_s6 = inlined_call_operand.vmem [shape: bf16[128,128], index: 6, kind: input, shape index: {}]   ;;  %s2435_s7 = inlined_call_operand.vmem [shape: bf16[2,8,128], index: 7, kind: output, shape index: {}]  }
   0x1   :  { %s2046_s26 = smov 0  }
   0x2 LB: > { %s29_s27 = sadd.s32 1, %s1994_s25  ;;  %p1551_p0 = scmp.ge.s32.totalorder %s1998_s26, 1  ;;  %s1998_s26 = sphi %s2046_s26, %s17_s26   ;;  %s1994_s25 = sphi %s2044_s25, %s2437_s25   ;;  %s1990_s24 = sphi %s2042_s24, %s2436_s24  }
   0x3   : > { %p31_p1 = scmp.ge.s32.totalorder %s29_s27, 2  ;;  %p251_p2 = scmp.lt.s32.totalorder %s1998_s26, 3 }
   0x5   : > { %s2439_s27 = smov (%p31_p1, %s29_s27), 0  ;;  %p252_p3 = pnand %p1551_p0, %p251_p2 }
   0x6   : > { %p285_p4 = scmp.lt.s32.totalorder (!%p252_p3), %s1990_s24, 1 }
   0x7   : > { %255 = sbr.rel (%p252_p3) target bundleno = 1086 (0x43e), region = 48 }
   0xc   : > { %v1888_v0 = vld [vmem:[%s2429_s1 + $0x78] sm:$0xff]   ;;  %v2000_v1 = vmov 0.0   ;;  %v1891_v4 = vld [vmem:[%s2429_s1 + $0x70] sm:$0xff]   ;;  %v1894_v7 = vld [vmem:[%s2429_s1 + $0x68] sm:$0xff]   ;;  %vm2001_vm0 = vmmov 0   ;;  %s2441_s24 = smov (!%p285_p4, %s1990_s24), 1  ;;  %v600_v60 = vlaneseq }
   0xd   : > { %1762 = vmatprep.subr.bf16.mxu1 %v2000_v1  ;;  %v1889_v2 = vld [vmem:[%s2429_s1 + $0x38] sm:$0xff]   ;;  %1651 = vmatprep.subr.bf16.mxu0 %v1888_v0  ;;  %v1892_v5 = vld [vmem:[%s2429_s1 + $0x30] sm:$0xff]   ;;  %v1895_v8 = vld [vmem:[%s2429_s1 + $0x28] sm:$0xff]   ;;  %s1648_s20 = sshll.u32 %s2441_s24, 4  ;;  %vm304_vm1 = vcmask 1046528   ;;  %vm310_vm2 = vcmask 1045504  }
   0xe   : > { %v1890_v3 = vld [vmem:[%s2429_s1 + $0xb8] sm:$0xff]   ;;  %1652 = vmatpush3.bf16.msra.mxu0 %v1889_v2  ;;  %v1893_v6 = vld [vmem:[%s2429_s1 + $0xb0] sm:$0xff]   ;;  %1778 = vmatprep.mubr.msk.bf16.mxu1 %vm2001_vm0, %v2000_v1  ;;  %v1896_v9 = vld [vmem:[%s2429_s1 + $0xa8] sm:$0xff]   ;;  %s289_s10 = scalar_lea.vmem %s2428_s0, %s1648_s20  ;;  %v2237_v61 = vshrl.u32 %v600_v60, 7  ;;  %vm1020_vm6 = vcmask 1040384   ;;  %s1554_s16 = sshll.u32 %s2441_s24, 2 }
   0xf   : > { %1763 = vmatpush3.bf16.msra.mxu1 %v1890_v3  ;;  %1653 = vmatprep.subr.bf16.mxu0 %v1891_v4  ;;  %v1897_v10 = vld [vmem:[%s2429_s1 + $0x60] sm:$0xff]   ;;  %v1900_v13 = vld [vmem:[%s2429_s1 + $0x58] sm:$0xff]   ;;  %v1903_v16 = vld [vmem:[%s2429_s1 + $0x50] sm:$0xff]   ;;  %vm1455_vm10 = vsmask.f32 3328  ;;  %s296_s19 = scalar_lea.vmem %s2435_s7, %s1554_s16 }
  0x10   : > { %1764 = vmatprep.subr.bf16.mxu1 %v2000_v1  ;;  %v1898_v11 = vld [vmem:[%s2429_s1 + $0x20] sm:$0xff]   ;;  %v1901_v14 = vld [vmem:[%s2429_s1 + $0x18] sm:$0xff]   ;;  %v1904_v17 = vld [vmem:[%s2429_s1 + $0x10] sm:$0xff]   ;;  %v605_v62 = vadd.s32 4294967294, %v2237_v61  ;;  %vm1456_vm11 = vsmask.f32 7440 }
  0x11   : > { %v1899_v12 = vld [vmem:[%s2429_s1 + $0xa0] sm:$0xff]   ;;  %v1902_v15 = vld [vmem:[%s2429_s1 + $0x98] sm:$0xff]   ;;  %v1905_v18 = vld [vmem:[%s2429_s1 + $0x90] sm:$0xff]  }
  0x12   : > { %1654 = vmatpush3.bf16.msra.mxu0 %v1892_v5  ;;  %v1906_v19 = vld [vmem:[%s2429_s1 + $0x48] sm:$0xff]   ;;  %v1909_v22 = vld [vmem:[%s2429_s1 + $0x40] sm:$0xff]   ;;  %v1912_v34 = vld [vmem:[%s2431_s3 + $0x78] sm:$0xff]   ;;  %vm607_vm3 = vcmp.ge.s32.totalorder %v605_v62, 0  ;;  %vm609_vm4 = vcmp.lt.s32.totalorder %v605_v62, 4 }
  0x13   : > { %1765 = vmatpush3.bf16.msra.mxu1 %v1893_v6  ;;  %1655 = vmatprep.subr.bf16.mxu0 %v1894_v7  ;;  %v1907_v20 = vld [vmem:[%s2429_s1 + $0x8] sm:$0xff]   ;;  %v300_v23 = vld [vmem:[%s289_s10] sm:$0xff]  ;;  %v1913_v36 = vld [vmem:[%s2431_s3 + $0xb8] sm:$0xff]  }
  0x14   : > { %1766 = vmatprep.subr.bf16.mxu1 %v2000_v1  ;;  %v1908_v21 = vld [vmem:[%s2429_s1 + $0x88] sm:$0xff]   ;;  %v305_v25 = vrot.slane %v300_v23, 1  ;;  %v311_v27 = vrot.slane %v300_v23, 2  ;;  %v1910_v28 = vld [vmem:[%s2429_s1] sm:$0xff]   ;;  %v1914_v38 = vld [vmem:[%s2431_s3 + $0x38] sm:$0xff]  }
  0x15   : > { %v301_v24 = vld [vmem:[%s289_s10 + $0x8] sm:$0x3f]  ;;  %v1911_v30 = vld [vmem:[%s2429_s1 + $0x80] sm:$0xff]   ;;  %v1915_v39 = vld [vmem:[%s2431_s3 + $0x70] sm:$0xff]  }
  0x16   : > { %1656 = vmatpush3.bf16.msra.mxu0 %v1895_v8  ;;  %v306_v26 = vrot.slane %v301_v24, 1  ;;  %v312_v29 = vrot.slane %v301_v24, 2  ;;  %v316_v35 = vpack.c.bf16 %v301_v24, %v300_v23  ;;  %v1916_v40 = vld [vmem:[%s2431_s3 + $0xb0] sm:$0xff]   ;;  %v1918_v42 = vld [vmem:[%s2431_s3 + $0x68] sm:$0xff]   ;;  %v1921_v45 = vld [vmem:[%s2431_s3 + $0x60] sm:$0xff]  }
  0x17   : > { %1767 = vmatpush3.bf16.msra.mxu1 %v1896_v9  ;;  %1657 = vmatprep.subr.bf16.mxu0 %v1897_v10  ;;  %v1917_v41 = vld [vmem:[%s2431_s3 + $0x30] sm:$0xff]   ;;  %v1920_v43 = vld [vmem:[%s2431_s3 + $0x28] sm:$0xff]   ;;  %v1923_v46 = vld [vmem:[%s2431_s3 + $0x20] sm:$0xff]  }
  0x18   : > { %1768 = vmatprep.subr.bf16.mxu1 %v2000_v1  ;;  %v307_v31 = vsel %vm304_vm1, %v305_v25, %v306_v26  ;;  %v313_v33 = vsel %vm310_vm2, %v311_v27, %v312_v29  ;;  %v1919_v44 = vld [vmem:[%s2431_s3 + $0xa8] sm:$0xff]   ;;  %v1922_v47 = vld [vmem:[%s2431_s3 + $0xa0] sm:$0xff]   ;;  %v1924_v48 = vld [vmem:[%s2431_s3 + $0x58] sm:$0xff]  }
  0x19   : > { %v317_v32 = vpack.c.bf16 %v306_v26, %v307_v31  ;;  %v318_v37 = vpack.c.bf16 %v312_v29, %v313_v33  ;;  %v1925_v49 = vld [vmem:[%s2431_s3 + $0x98] sm:$0xff]   ;;  %v1927_v51 = vld [vmem:[%s2431_s3 + $0x50] sm:$0xff]   ;;  %v1930_v54 = vld [vmem:[%s2431_s3 + $0x48] sm:$0xff]  }
  0x1a   : > { %1658 = vmatpush3.bf16.msra.mxu0 %v1898_v11  ;;  %v1926_v50 = vld [vmem:[%s2431_s3 + $0x18] sm:$0xff]   ;;  %v1928_v52 = vld [vmem:[%s2431_s3 + $0x90] sm:$0xff]   ;;  %v1931_v55 = vld [vmem:[%s2431_s3 + $0x88] sm:$0xff]  }
  0x1b   : > { %1769 = vmatpush3.bf16.msra.mxu1 %v1899_v12  ;;  %1659 = vmatprep.subr.bf16.mxu0 %v1900_v13  ;;  %v1929_v53 = vld [vmem:[%s2431_s3 + $0x10] sm:$0xff]   ;;  %v1932_v56 = vld [vmem:[%s2431_s3 + $0x8] sm:$0xff]   ;;  %v1933_v57 = vld [vmem:[%s2431_s3 + $0x40] sm:$0xff]  }
  0x1c   : > { %1770 = vmatprep.subr.bf16.mxu1 %v2000_v1  ;;  %550 = vmatprep.mubr.bf16.mxu0 %v317_v32  ;;  %v1934_v58 = vld [vmem:[%s2431_s3 + $0x80] sm:$0xff]   ;;  %vm611_vm5 = vmand %vm607_vm3, %vm609_vm4  ;;  %v1937_v24 = vld [vmem:[%s2432_s4 + $0x30] sm:$0xff]  }
  0x1d   : > { %v1935_v59 = vld [vmem:[%s2431_s3] sm:$0xff]   ;;  %v1938_v25 = vld [vmem:[%s2432_s4 + $0x28] sm:$0xff]   ;;  %v1940_v27 = vld [vmem:[%s2432_s4 + $0x18] sm:$0xff]  }
  0x1e   : > { %1660 = vmatpush3.bf16.msra.mxu0 %v1901_v14  ;;  %v1555_v2 = vld [vmem:[%s2430_s2] ss:$0 sm:$0xff]  ;;  %v2247_v14 = vrot.slane %v2000_v1, 1  ;;  %v1942_v29 = vld [vmem:[%s2432_s4 + $0x8] sm:$0xff]   ;;  %v1944_v31 = vld [vmem:[%s2433_s5 + $0x78] sm:$0xff]  }
  0x1f   : > { %1771 = vmatpush3.bf16.msra.mxu1 %v1902_v15  ;;  %1661 = vmatprep.subr.bf16.mxu0 %v1903_v16  ;;  %v2250_v15 = vrot.slane %v2000_v1, 2  ;;  %v1939_v26 = vld [vmem:[%s2432_s4 + $0x20] sm:$0xff]   ;;  %v1946_v32 = vld [vmem:[%s2433_s5 + $0x38] sm:$0xff]   ;;  %v1947_v33 = vld [vmem:[%s2433_s5 + $0x70] sm:$0xff]  }
  0x20   : > { %1772 = vmatprep.subr.bf16.mxu1 %v2000_v1  ;;  %v1958_v60 = vld [vmem:[%s2433_s5 + $0x18] sm:$0xff]   ;;  %v1959_v62 = vld [vmem:[%s2433_s5 + $0x50] sm:$0xff]   ;;  %vm1457_vm12 = vmor %vm1455_vm10, %vm1456_vm11 }
  0x22   : > { %1662 = vmatpush3.bf16.msra.mxu0 %v1904_v17 }
  0x23   : > { %1773 = vmatpush3.bf16.msra.mxu1 %v1905_v18  ;;  %1663 = vmatprep.subr.bf16.mxu0 %v1906_v19 }
  0x24   : > { %1774 = vmatprep.subr.bf16.mxu1 %v2000_v1 }
  0x26   : > { %1664 = vmatpush3.bf16.msra.mxu0 %v1907_v20 }
  0x27   : > { %1775 = vmatpush3.bf16.msra.mxu1 %v1908_v21  ;;  %1665 = vmatprep.subr.bf16.mxu0 %v1909_v22  ;;  %v1936_v22 = vld [vmem:[%s2432_s4 + $0x38] sm:$0xff]  }
  0x28   : > { %1776 = vmatprep.subr.bf16.mxu1 %v2000_v1 }
  0x2a   : > { %1666 = vmatpush3.bf16.msra.mxu0 %v1910_v28  ;;  %v1941_v28 = vld [vmem:[%s2432_s4 + $0x10] sm:$0xff]  }
  0x2b   : > { %1777 = vmatpush3.bf16.msra.mxu1 %v1911_v30  ;;  %1682 = vmatprep.subr.bf16.mxu0 %v1912_v34  ;;  %v1943_v30 = vld [vmem:[%s2432_s4] sm:$0xff]   ;;  %v1949_v34 = vld [vmem:[%s2433_s5 + $0x30] sm:$0xff]  }
  0x2c   : > { %1782 = vmatprep.subr.bf16.mxu1 %v2000_v1 }
  0x2d   : > { %551 = vmatmul.mubr.bf16.vlgmr.msra.gmra.mxu0 %v316_v35  ;;  %v1950_v35 = vld [vmem:[%s2433_s5 + $0x68] sm:$0xff]  }
  0x2e   : > { %1779 = vmatmul.mubr.bf16.vlgmr.msra.gmra.mxu1 %v318_v37  ;;  %1683 = vmatpush3.bf16.msra.mxu0 %v1914_v38 }
  0x2f   : > { %1783 = vmatpush3.bf16.msra.mxu1 %v1913_v36  ;;  %1684 = vmatprep.subr.bf16.mxu0 %v1915_v39  ;;  %v1952_v36 = vld [vmem:[%s2433_s5 + $0x28] sm:$0xff]  }
  0x30   : > { %1784 = vmatprep.subr.bf16.mxu1 %v2000_v1  ;;  %1798 = vmatprep.mubr.msk.bf16.mxu1 %vm2001_vm0, %v2000_v1 }
  0x32   : > { %1685 = vmatpush3.bf16.msra.mxu0 %v1917_v41 }
  0x33   : > { %1785 = vmatpush3.bf16.msra.mxu1 %v1916_v40  ;;  %1686 = vmatprep.subr.bf16.mxu0 %v1918_v42 }
  0x34   : > { %1786 = vmatprep.subr.bf16.mxu1 %v2000_v1 }
  0x36   : > { %1687 = vmatpush3.bf16.msra.mxu0 %v1920_v43 }
  0x37   : > { %1787 = vmatpush3.bf16.msra.mxu1 %v1919_v44  ;;  %1688 = vmatprep.subr.bf16.mxu0 %v1921_v45 }
  0x38   : > { %1788 = vmatprep.subr.bf16.mxu1 %v2000_v1 }
  0x3a   : > { %1689 = vmatpush3.bf16.msra.mxu0 %v1923_v46 }
  0x3b   : > { %1789 = vmatpush3.bf16.msra.mxu1 %v1922_v47  ;;  %1690 = vmatprep.subr.bf16.mxu0 %v1924_v48 }
  0x3c   : > { %1790 = vmatprep.subr.bf16.mxu1 %v2000_v1 }
  0x3e   : > { %1691 = vmatpush3.bf16.msra.mxu0 %v1926_v50 }
  0x3f   : > { %1791 = vmatpush3.bf16.msra.mxu1 %v1925_v49  ;;  %1692 = vmatprep.subr.bf16.mxu0 %v1927_v51  ;;  %v1945_v51 = vld [vmem:[%s2433_s5 + $0xb8] sm:$0xff]  }
  0x40   : > { %1792 = vmatprep.subr.bf16.mxu1 %v2000_v1 }
  0x42   : > { %1693 = vmatpush3.bf16.msra.mxu0 %v1929_v53  ;;  %v1948_v53 = vld [vmem:[%s2433_s5 + $0xb0] sm:$0xff]  }
  0x43   : > { %1793 = vmatpush3.bf16.msra.mxu1 %v1928_v52  ;;  %1694 = vmatprep.subr.bf16.mxu0 %v1930_v54  ;;  %v1951_v54 = vld [vmem:[%s2433_s5 + $0xa8] sm:$0xff]  }
  0x44   : > { %1794 = vmatprep.subr.bf16.mxu1 %v2000_v1 }
  0x46   : > { %1695 = vmatpush3.bf16.msra.mxu0 %v1932_v56  ;;  %v1954_v56 = vld [vmem:[%s2433_s5 + $0xa0] sm:$0xff]  }
  0x47   : > { %1795 = vmatpush3.bf16.msra.mxu1 %v1931_v55  ;;  %1696 = vmatprep.subr.bf16.mxu0 %v1933_v57  ;;  %v1953_v55 = vld [vmem:[%s2433_s5 + $0x60] sm:$0xff]  }
  0x48   : > { %1796 = vmatprep.subr.bf16.mxu1 %v2000_v1  ;;  %v1955_v57 = vld [vmem:[%s2433_s5 + $0x20] sm:$0xff]  }
  0x4a   : > { %1697 = vmatpush3.bf16.msra.mxu0 %v1935_v59  ;;  %v1957_v59 = vld [vmem:[%s2433_s5 + $0x98] sm:$0xff]  }
  0x4b   : > { %1797 = vmatpush3.bf16.msra.mxu1 %v1934_v58  ;;  %1802 = vmatprep.subr.bf16.mxu0 %v2000_v1  ;;  %v1956_v58 = vld [vmem:[%s2433_s5 + $0x58] sm:$0xff]  }
  0x4c   : > { %1722 = vmatprep.subr.bf16.mxu1 %v1944_v31  ;;  %v1969_v31 = vld [vmem:[%s2434_s6 + $0x30] sm:$0xff]  }
  0xed   : > { %v1667_v63 = vpop.f32.mrf.mxu0 }
  0xee   : > { %v593_v0 = vpop.f32.mrf.mxu1 }
  0xef   : > { %v1668_v3 = vpop.f32.mrf.mxu0 }
  0xf0   : > { %v1669_v4 = vadd.f32 %v1668_v3, %v1667_v63  ;;  %v1780_v5 = vpop.f32.mrf.mxu1  ;;  %v1960_v63 = vld [vmem:[%s2433_s5 + $0x90] sm:$0xff]   ;;  %v1963_v3 = vld [vmem:[%s2433_s5 + $0x88] sm:$0xff]  }
  0xf1   : > { %v1670_v6 = vpop.f32.mrf.mxu0  ;;  %v1965_v5 = vld [vmem:[%s2433_s5 + $0x40] sm:$0xff]  }
  0xf2   : > { %v553_v7 = vadd.f32 %v1669_v4, %v1555_v2  ;;  %v596_v8 = vpop.f32.mrf.mxu1  ;;  %v1962_v2 = vld [vmem:[%s2433_s5 + $0x48] sm:$0xff]   ;;  %v1966_v6 = vld [vmem:[%s2433_s5 + $0x80] sm:$0xff]  }
  0xf3   : > { %v1671_v9 = vpop.f32.mrf.mxu0  ;;  %v1964_v4 = vld [vmem:[%s2433_s5 + $0x8] sm:$0xff]  }
  0xf4   : > { %v594_v10 = vadd.f32 %v593_v0, %v553_v7  ;;  %v1781_v11 = vpop.f32.mrf.mxu1  ;;  %v1961_v0 = vld [vmem:[%s2433_s5 + $0x10] sm:$0xff]   ;;  %v1967_v7 = vld [vmem:[%s2433_s5] sm:$0xff]   ;;  %v1030_v9 = vadd.s32 4294967295, %v2237_v61 }
  0xf6   : > { %v2243_v12 = vsel %vm611_vm5, %v594_v10, 0.0  ;;  %vm1032_vm7 = vcmp.ge.s32.totalorder %v1030_v9, 0  ;;  %vm1034_vm8 = vcmp.lt.s32.totalorder %v1030_v9, 4 }
  0xf7   : > { %v619_v13 = vmax.f32 %v2243_v12, 0.0  ;;  %vm1036_vm9 = vmand %vm1032_vm7, %vm1034_vm8 }
  0xf9   : > { %v628_v16 = vrot.slane %v619_v13, 2  ;;  %v623_v17 = vrot.slane %v619_v13, 1  ;;  %v633_v23 = vpack.c.bf16 %v2000_v1, %v619_v13 }
  0xfb   : > { %v625_v18 = vsel %vm304_vm1, %v623_v17, %v2247_v14  ;;  %v630_v19 = vsel %vm310_vm2, %v628_v16, %v2250_v15 }
  0xfc   : > { %v634_v20 = vpack.c.bf16 %v2247_v14, %v625_v18  ;;  %v635_v21 = vpack.c.bf16 %v2250_v15, %v630_v19 }
  0xfe   : > { %860 = vmatprep.mubr.bf16.mxu0 %v634_v20  ;;  %1799 = vmatmul.mubr.bf16.vlgmr.msra.gmra.mxu1 %v635_v21 }
  0xff   : > { %861 = vmatmul.mubr.bf16.vlgmr.msra.gmra.mxu0 %v633_v23  ;;  %1723 = vmatpush3.bf16.msra.mxu1 %v1946_v32  ;;  %v1972_v32 = vld [vmem:[%s2434_s6 + $0x18] sm:$0xff]  }
 0x100   : > { %1803 = vmatpush3.bf16.msra.mxu0 %v1936_v22  ;;  %1818 = vmatprep.mubr.msk.bf16.mxu0 %vm2001_vm0, %v2000_v1 }
 0x101   : > { %1804 = vmatprep.subr.bf16.mxu0 %v2000_v1  ;;  %1724 = vmatprep.subr.bf16.mxu1 %v1947_v33  ;;  %v1973_v33 = vld [vmem:[%s2434_s6 + $0x10] sm:$0xff]  }
 0x103   : > { %1725 = vmatpush3.bf16.msra.mxu1 %v1949_v34  ;;  %v1974_v34 = vld [vmem:[%s2434_s6 + $0x8] sm:$0xff]  }
 0x104   : > { %1805 = vmatpush3.bf16.msra.mxu0 %v1937_v24  ;;  %1726 = vmatprep.subr.bf16.mxu1 %v1950_v35  ;;  %v1975_v35 = vld [vmem:[%s2434_s6] sm:$0xff]  }
 0x105   : > { %1806 = vmatprep.subr.bf16.mxu0 %v2000_v1 }
 0x107   : > { %1727 = vmatpush3.bf16.msra.mxu1 %v1952_v36 }
 0x108   : > { %1807 = vmatpush3.bf16.msra.mxu0 %v1938_v25  ;;  %1728 = vmatprep.subr.bf16.mxu1 %v1953_v55 }
 0x109   : > { %1808 = vmatprep.subr.bf16.mxu0 %v2000_v1 }
 0x10b   : > { %1729 = vmatpush3.bf16.msra.mxu1 %v1955_v57 }
 0x10c   : > { %1809 = vmatpush3.bf16.msra.mxu0 %v1939_v26  ;;  %1730 = vmatprep.subr.bf16.mxu1 %v1956_v58 }
 0x10d   : > { %1810 = vmatprep.subr.bf16.mxu0 %v2000_v1 }
 0x10f   : > { %1731 = vmatpush3.bf16.msra.mxu1 %v1958_v60 }
 0x110   : > { %1811 = vmatpush3.bf16.msra.mxu0 %v1940_v27  ;;  %1732 = vmatprep.subr.bf16.mxu1 %v1959_v62 }
 0x111   : > { %1812 = vmatprep.subr.bf16.mxu0 %v2000_v1 }
 0x113   : > { %1733 = vmatpush3.bf16.msra.mxu1 %v1961_v0 }
 0x114   : > { %1813 = vmatpush3.bf16.msra.mxu0 %v1941_v28  ;;  %1734 = vmatprep.subr.bf16.mxu1 %v1962_v2 }
 0x115   : > { %1814 = vmatprep.subr.bf16.mxu0 %v2000_v1 }
 0x117   : > { %1735 = vmatpush3.bf16.msra.mxu1 %v1964_v4 }
 0x118   : > { %1815 = vmatpush3.bf16.msra.mxu0 %v1942_v29  ;;  %1736 = vmatprep.subr.bf16.mxu1 %v1965_v5  ;;  %v1968_v29 = vld [vmem:[%s2434_s6 + $0x38] sm:$0xff]  }
 0x119   : > { %1816 = vmatprep.subr.bf16.mxu0 %v2000_v1 }
 0x11b   : > { %1737 = vmatpush3.bf16.msra.mxu1 %v1967_v7 }
 0x11c   : > { %1817 = vmatpush3.bf16.msra.mxu0 %v1943_v30  ;;  %1842 = vmatprep.subr.bf16.mxu1 %v2000_v1 }
 0x11d   : > { %1822 = vmatprep.subr.bf16.mxu0 %v2000_v1 }
 0x1be   : > { %v903_v37 = vpop.f32.mrf.mxu1 }
 0x1bf   : > { %v1698_v38 = vpop.f32.mrf.mxu0 }
 0x1c0   : > { %v1800_v39 = vpop.f32.mrf.mxu1 }
 0x1c1   : > { %v1699_v40 = vpop.f32.mrf.mxu0 }
 0x1c2   : > { %v1700_v41 = vadd.f32 %v1699_v40, %v1698_v38  ;;  %v906_v42 = vpop.f32.mrf.mxu1 }
 0x1c3   : > { %v1701_v43 = vpop.f32.mrf.mxu0 }
 0x1c4   : > { %v1801_v44 = vpop.f32.mrf.mxu1  ;;  %v904_v46 = vadd.f32 %v1700_v41, %v903_v37 }
 0x1c5   : > { %v1702_v45 = vpop.f32.mrf.mxu0 }
 0x1c6   : > { %v1703_v47 = vadd.f32 %v1702_v45, %v1701_v43  ;;  %v910_v49 = vmax.f32 %v904_v46, 0.0 }
 0x1c8   : > { %v907_v48 = vadd.f32 %v1703_v47, %v906_v42 }
 0x1ca   : > { %v911_v50 = vmax.f32 %v907_v48, 0.0 }
 0x1cc   : > { %v912_v52 = vpack.c.bf16 %v911_v50, %v910_v49 }
 0x1ce   : > { %1819 = vmatmul.mubr.bf16.vlgmr.msra.gmra.mxu0 %v912_v52 }
 0x1cf   : > { %1823 = vmatpush3.bf16.msra.mxu0 %v1945_v51  ;;  %1838 = vmatprep.mubr.msk.bf16.mxu0 %vm2001_vm0, %v2000_v1 }
 0x1d0   : > { %1824 = vmatprep.subr.bf16.mxu0 %v2000_v1 }
 0x1d3   : > { %1825 = vmatpush3.bf16.msra.mxu0 %v1948_v53 }
 0x1d4   : > { %1826 = vmatprep.subr.bf16.mxu0 %v2000_v1 }
 0x1d7   : > { %1827 = vmatpush3.bf16.msra.mxu0 %v1951_v54 }
 0x1d8   : > { %1828 = vmatprep.subr.bf16.mxu0 %v2000_v1 }
 0x1db   : > { %1829 = vmatpush3.bf16.msra.mxu0 %v1954_v56 }
 0x1dc   : > { %1830 = vmatprep.subr.bf16.mxu0 %v2000_v1 }
 0x1df   : > { %1831 = vmatpush3.bf16.msra.mxu0 %v1957_v59 }
 0x1e0   : > { %1832 = vmatprep.subr.bf16.mxu0 %v2000_v1 }
 0x1e3   : > { %1833 = vmatpush3.bf16.msra.mxu0 %v1960_v63 }
 0x1e4   : > { %1834 = vmatprep.subr.bf16.mxu0 %v2000_v1 }
 0x1e7   : > { %1835 = vmatpush3.bf16.msra.mxu0 %v1963_v3 }
 0x1e8   : > { %1836 = vmatprep.subr.bf16.mxu0 %v2000_v1 }
 0x1eb   : > { %1837 = vmatpush3.bf16.msra.mxu0 %v1966_v6 }
 0x28e   : > { %v1011_v8 = vpop.f32.mrf.mxu0 }
 0x28f   : > { %v1021_v10 = vrot.slane %v1011_v8, 7 }
 0x290   : > { %v1820_v11 = vpop.f32.mrf.mxu0 }
 0x291   : > { %v1026_v13 = vadd.f32 %v1021_v10, %v2243_v12 }
 0x292   : > { %v1014_v16 = vpop.f32.mrf.mxu0 }
 0x293   : > { %v1022_v17 = vrot.slane %v1014_v16, 7  ;;  %v1044_v20 = vrot.slane %v1026_v13, 1 }
 0x294   : > { %v1821_v18 = vpop.f32.mrf.mxu0 }
 0x295   : > { %v1023_v19 = vsel %vm1020_vm6, %v1021_v10, %v1022_v17 }
 0x296   : > { %v1045_v21 = vrot.slane %v1023_v19, 1 }
 0x298   : > { %v1046_v22 = vsel %vm304_vm1, %v1044_v20, %v1045_v21 }
 0x299   : > { %v1049_v23 = vsel %vm1036_vm9, %v1046_v22, 0.0 }
 0x29a   : > { %v1051_v24 = vmax.f32 %v1049_v23, 0.0 }
 0x29c   : > { %v1055_v25 = vrot.slane %v1051_v24, 1  ;;  %v1059_v61 = vrot.slane %v1051_v24, 2  ;;  %v1063_v30 = vpack.c.bf16 %v1051_v24, %v1051_v24 }
 0x29e   : > { %v1057_v26 = vsel %vm304_vm1, %v1055_v25, %v2247_v14  ;;  %v1061_v12 = vsel %vm310_vm2, %v1059_v61, %v2250_v15  ;;  %v1970_v14 = vld [vmem:[%s2434_s6 + $0x28] sm:$0xff]   ;;  %v1971_v15 = vld [vmem:[%s2434_s6 + $0x20] sm:$0xff]  }
 0x29f   : > { %v1064_v27 = vpack.c.bf16 %v1057_v26, %v1057_v26  ;;  %v1065_v28 = vpack.c.bf16 %v1061_v12, %v1061_v12 }
 0x2a1   : > { %1290 = vmatprep.mubr.bf16.mxu1 %v1064_v27  ;;  %1839 = vmatmul.mubr.bf16.vlgmr.msra.gmra.mxu0 %v1065_v28 }
 0x2a2   : > { %1291 = vmatmul.mubr.bf16.vlgmr.msra.gmra.mxu1 %v1063_v30 }
 0x2a3   : > { %1843 = vmatpush3.bf16.msra.mxu1 %v1968_v29  ;;  %1858 = vmatprep.mubr.msk.bf16.mxu1 %vm2001_vm0, %v2000_v1 }
 0x2a4   : > { %1844 = vmatprep.subr.bf16.mxu1 %v2000_v1 }
 0x2a7   : > { %1845 = vmatpush3.bf16.msra.mxu1 %v1969_v31 }
 0x2a8   : > { %1846 = vmatprep.subr.bf16.mxu1 %v2000_v1 }
 0x2ab   : > { %1847 = vmatpush3.bf16.msra.mxu1 %v1970_v14 }
 0x2ac   : > { %1848 = vmatprep.subr.bf16.mxu1 %v2000_v1 }
 0x2af   : > { %1849 = vmatpush3.bf16.msra.mxu1 %v1971_v15 }
 0x2b0   : > { %1850 = vmatprep.subr.bf16.mxu1 %v2000_v1 }
 0x2b3   : > { %1851 = vmatpush3.bf16.msra.mxu1 %v1972_v32 }
 0x2b4   : > { %1852 = vmatprep.subr.bf16.mxu1 %v2000_v1 }
 0x2b7   : > { %1853 = vmatpush3.bf16.msra.mxu1 %v1973_v33 }
 0x2b8   : > { %1854 = vmatprep.subr.bf16.mxu1 %v2000_v1 }
 0x2bb   : > { %1855 = vmatpush3.bf16.msra.mxu1 %v1974_v34 }
 0x2bc   : > { %1856 = vmatprep.subr.bf16.mxu1 %v2000_v1 }
 0x2bf   : > { %1857 = vmatpush3.bf16.msra.mxu1 %v1975_v35 }
 0x361   : > { %v1332_v36 = vpop.f32.mrf.mxu0 }
 0x362   : > { %v1738_v37 = vpop.f32.mrf.mxu1 }
 0x363   : > { %v1840_v38 = vpop.f32.mrf.mxu0 }
 0x364   : > { %v1739_v39 = vpop.f32.mrf.mxu1 }
 0x365   : > { %v1740_v40 = vadd.f32 %v1739_v39, %v1738_v37  ;;  %v1335_v41 = vpop.f32.mrf.mxu0 }
 0x366   : > { %v1741_v42 = vpop.f32.mrf.mxu1 }
 0x367   : > { %v1333_v43 = vadd.f32 %v1740_v40, %v1332_v36  ;;  %v1841_v44 = vpop.f32.mrf.mxu0 }
 0x368   : > { %v1742_v45 = vpop.f32.mrf.mxu1 }
 0x369   : > { %v1338_v46 = vmax.f32 %v1333_v43, 0.0 }
 0x36b   : > { %v1339_v47 = vpack.c.bf16 %v1338_v46, %v1338_v46 }
 0x36d   : > { %1859 = vmatmul.mubr.bf16.vlgmr.msra.gmra.mxu1 %v1339_v47 }
 0x42d   : > { %v1438_v1 = vpop.f32.mrf.mxu1 }
 0x42e   : > { %v1445_v48 = vrot.slane %v1438_v1, 7 }
 0x42f   : > { %v1860_v49 = vpop.f32.mrf.mxu1 }
 0x430   : > { %v1447_v50 = vadd.f32 %v1445_v48, %v1049_v23  ;;  %v1650_v53 = vpack.c.bf16 %v1445_v48, %v1445_v48 }
 0x431   : > { %v1441_v51 = vpop.f32.mrf.mxu1 }
 0x432   : > { %v1649_v52 = vpack.c.bf16 %v1447_v50, %v1447_v50  ;;  %v1468_v59 = vshll.u32 %v1650_v53, 16 }
 0x433   : > { %v1861_v54 = vpop.f32.mrf.mxu1 }
 0x434   : > { %v1459_v55 = vshrl.u32 %v1649_v52, 16  ;;  %v1462_v56 = vshll.u32 %v1649_v52, 16  ;;  %v1470_v63 = vrot.slane %v1468_v59, 5 }
 0x436   : > { %v1461_v57 = vrot.slane %v1459_v55, 4  ;;  %v1464_v58 = vrot.slane %v1462_v56, 5 }
 0x438   : > { %v1465_v60 = vor.u32 %v1464_v58, %v1461_v57 }
 0x43a   : > { %v1466_v62 = vrot.slane %v1465_v60, 4 }
 0x43c   : > { %v1471_v0 = vsel %vm1457_vm12, %v1466_v62, %v1470_v63 }
 0x43d   : > { %1473 = vst [vmem:[%s296_s19] sm:$0xf] %v1471_v0 }
 0x43e PF: > { %s17_s26 = sadd.s32 1, %s1998_s26   ;;  %s2436_s24 = smov %s1994_s25 }
 0x43f   : > { %p14_p5 = scmp.ge.s32.totalorder %s17_s26, 4   ;;  %s2437_s25 = smov %s2439_s27 }
 0x441   :  { %16 = sbr.rel (!%p14_p5) target bundleno = 2 (0x2), region = 79 }

</bundles_post_ra>
